<compile_context>
chip_gen: v6e
topology: v6e:2x2x1
jax: 0.10.0
libtpu: 0.0.40
codegen_flags: <defaults>
</compile_context>

<pallas_src>
import math

import jax
import jax.numpy as jnp
from jax.experimental import pallas as pl
from jax.experimental.pallas import tpu as pltpu

# ---------------- config (small synthetic ViLT) ----------------
HIDDEN = 32
NUM_HEADS = 4
HEAD_DIM = HIDDEN // NUM_HEADS
NUM_LAYERS = 2
INTERMEDIATE = 4 * HIDDEN          # 128
VOCAB = 100
MAX_TEXT_POS = 40
CHANNELS = 3
IMG_SIZE = 32
PATCH = 16
NUM_PATCHES = (IMG_SIZE // PATCH) ** 2   # 4
NUM_IMG_TOKENS = NUM_PATCHES + 1         # +[CLS]
CLS_HIDDEN = 512
NUM_LABELS = 2
LN_EPS = 1e-12
ATTN_SCALE = 1.0 / math.sqrt(HEAD_DIM)


# ---------------- in-kernel math helpers ----------------
def _ln(x, g, b):
    """LayerNorm over the last axis. x:(N,H), g/b:(1,H)."""
    mu = jnp.mean(x, axis=-1, keepdims=True)
    var = jnp.mean((x - mu) ** 2, axis=-1, keepdims=True)
    return (x - mu) * jax.lax.rsqrt(var + LN_EPS) * g + b


def _erf_approx(z):
    # Abramowitz & Stegun 7.1.26, |err| <= 1.5e-7.  Only exp/mul/add/div/select,
    # which all lower on Mosaic (lax.erf has no native TPU-Pallas lowering).
    a1, a2, a3, a4, a5 = (0.254829592, -0.284496736, 1.421413741,
                          -1.453152027, 1.061405429)
    p = 0.3275911
    sign = jnp.where(z >= 0.0, 1.0, -1.0)
    za = jnp.abs(z)
    t = 1.0 / (1.0 + p * za)
    poly = ((((a5 * t + a4) * t + a3) * t + a2) * t + a1) * t
    return sign * (1.0 - poly * jnp.exp(-za * za))


def _gelu_exact(x):
    # PyTorch / HF ViLT use exact erf-GELU (not the tanh approximation).
    return 0.5 * x * (1.0 + _erf_approx(x * 0.7071067811865476))


# ---------------- the single fused kernel (grid = (batch,)) ----------------
def _vilt_kernel(text_ref, patch_ref, mask_ref,
                 tlng_ref, tlnb_ref, tok0_ref, pw_ref, padd_ref, cls_ref,
                 ln1g_ref, ln1b_ref, wqkv_ref, bqkv_ref, wo_ref, bo_ref,
                 ln2g_ref, ln2b_ref, wi_ref, bi_ref, wo2_ref, bo2_ref,
                 flng_ref, flnb_ref, poolw_ref, poolb_ref,
                 w1_ref, b1_ref, w2_ref, b2_ref,
                 o_ref):
    f32 = jnp.float32

    mask = mask_ref[...].astype(f32)                  # (1, S_pad) additive key mask
    s_pad = mask.shape[-1]

    # ---- fused embeddings: text LN + modality type, patch projection, [CLS], zero pad rows ----
    t = _ln(text_ref[...].astype(f32), tlng_ref[...], tlnb_ref[...]) + tok0_ref[...]   # (St, H)
    pe = jnp.dot(patch_ref[...].astype(f32), pw_ref[...],
                 preferred_element_type=f32) + padd_ref[...]                            # (P, H)
    n_pad = s_pad - (t.shape[0] + 1 + pe.shape[0])
    x = jnp.concatenate(
        [t, cls_ref[...], pe, jnp.zeros((n_pad, HIDDEN), f32)], axis=0)                 # (S_pad, H)

    # ---- transformer layers (static loop over stacked weights, all VMEM-resident) ----
    for l in range(NUM_LAYERS):
        # multi-head self-attention (pre-LN); ONE lane-dense fused QKV matmul
        h = _ln(x, ln1g_ref[l], ln1b_ref[l])
        qkv = jnp.dot(h, wqkv_ref[l], preferred_element_type=f32) + bqkv_ref[l]        # (S_pad, 3H)
        q = qkv[:, 0:HIDDEN] * ATTN_SCALE                # score scaling folded into q (incl. bias)
        k = qkv[:, HIDDEN:2 * HIDDEN]
        v = qkv[:, 2 * HIDDEN:3 * HIDDEN]

        ctx = []
        for hh in range(NUM_HEADS):
            sl = slice(hh * HEAD_DIM, (hh + 1) * HEAD_DIM)
            s = jax.lax.dot_general(q[:, sl], k[:, sl], (((1,), (1,)), ((), ())),
                                    preferred_element_type=f32)                        # (S_pad, S_pad)
            s = s + mask
            s = s - jnp.max(s, axis=-1, keepdims=True)
            p = jnp.exp(s)
            p = p * pl.reciprocal(jnp.sum(p, axis=-1, keepdims=True), approx=True)
            ctx.append(jnp.dot(p, v[:, sl], preferred_element_type=f32))               # (S_pad, Dh)
        ctx = jnp.concatenate(ctx, axis=-1)                                             # (S_pad, H)
        # single fused output projection + residual
        x = x + jnp.dot(ctx, wo_ref[l], preferred_element_type=f32) + bo_ref[l]

        # MLP (pre-LN, exact GELU) + residual
        h2 = _ln(x, ln2g_ref[l], ln2b_ref[l])
        inter = _gelu_exact(jnp.dot(h2, wi_ref[l], preferred_element_type=f32) + bi_ref[l])
        x = x + jnp.dot(inter, wo2_ref[l], preferred_element_type=f32) + bo2_ref[l]

    # ---- final LN (row-wise, only the [CLS] row is needed) + pooler + classifier head ----
    cls_tok = _ln(x[0:1, :], flng_ref[...], flnb_ref[...])                              # (1, H)
    pooled = jnp.tanh(jnp.dot(cls_tok, poolw_ref[...], preferred_element_type=f32)
                      + poolb_ref[...])
    hid = jnp.maximum(jnp.dot(pooled, w1_ref[...], preferred_element_type=f32)
                      + b1_ref[...], 0.0)                                               # (1, 512)
    logits = jnp.dot(hid, w2_ref[...], preferred_element_type=f32) + b2_ref[...]        # (1, 2)
    o_ref[...] = logits.astype(o_ref.dtype)


# ---------------- parameter init (deterministic, synthetic) ----------------
def init_params(key):
    keys = iter(jax.random.split(key, 256))

    def nrm(shape, s=0.02):
        return jax.random.normal(next(keys), shape, jnp.float32) * s

    def zeros(shape):
        return jnp.zeros(shape, jnp.float32)

    def ones(shape):
        return jnp.ones(shape, jnp.float32)

    p = dict(
        word_emb=nrm((VOCAB, HIDDEN)),
        text_pos_emb=nrm((MAX_TEXT_POS, HIDDEN)),
        token_type_emb=nrm((2, HIDDEN)),            # modality type (0=text, 1=image)
        text_ln_g=ones((1, HIDDEN)), text_ln_b=zeros((1, HIDDEN)),
        patch_w=nrm((CHANNELS * PATCH * PATCH, HIDDEN)),  # Conv2d(k=stride=PATCH) as matmul
        patch_b=zeros((1, HIDDEN)),
        img_cls=nrm((1, HIDDEN)),
        img_pos_emb=nrm((NUM_IMG_TOKENS, HIDDEN)),
        final_ln_g=ones((1, HIDDEN)), final_ln_b=zeros((1, HIDDEN)),
        pool_w=nrm((HIDDEN, HIDDEN)), pool_b=zeros((1, HIDDEN)),
        cls_w1=nrm((HIDDEN, CLS_HIDDEN)), cls_b1=zeros((1, CLS_HIDDEN)),
        cls_w2=nrm((CLS_HIDDEN, NUM_LABELS)), cls_b2=zeros((1, NUM_LABELS)),
    )

    enc = {k: [] for k in ("ln1_g", "ln1_b", "wqkv", "bqkv", "wo", "bo",
                           "ln2_g", "ln2_b", "wi", "bi", "wo2", "bo2")}
    for _ in range(NUM_LAYERS):
        wq, wk, wv = nrm((HIDDEN, HIDDEN)), nrm((HIDDEN, HIDDEN)), nrm((HIDDEN, HIDDEN))
        bq, bk, bv = zeros((1, HIDDEN)), zeros((1, HIDDEN)), zeros((1, HIDDEN))
        enc["ln1_g"].append(ones((1, HIDDEN))); enc["ln1_b"].append(zeros((1, HIDDEN)))
        enc["wqkv"].append(jnp.concatenate([wq, wk, wv], axis=1))   # (H, 3H) lane-dense fused QKV
        enc["bqkv"].append(jnp.concatenate([bq, bk, bv], axis=1))   # (1, 3H)
        enc["wo"].append(nrm((HIDDEN, HIDDEN)))                     # (H, H) fused out-proj
        enc["bo"].append(zeros((1, HIDDEN)))
        enc["ln2_g"].append(ones((1, HIDDEN))); enc["ln2_b"].append(zeros((1, HIDDEN)))
        enc["wi"].append(nrm((HIDDEN, INTERMEDIATE))); enc["bi"].append(zeros((1, INTERMEDIATE)))
        enc["wo2"].append(nrm((INTERMEDIATE, HIDDEN))); enc["bo2"].append(zeros((1, HIDDEN)))
    p["enc"] = {k: jnp.stack(v, axis=0) for k, v in enc.items()}   # leading layer axis
    return p


# ---------------- forward (glue in plain JAX, hot path in ONE Pallas kernel) ----------------
def extract_patches(pixel_values):
    # pixel_values: (B, C, H, W) NCHW  ->  (B, num_patches, C*PATCH*PATCH)
    B, C, Hh, Ww = pixel_values.shape
    ph, pw = Hh // PATCH, Ww // PATCH
    x = pixel_values.reshape(B, C, ph, PATCH, pw, PATCH)
    x = x.transpose(0, 2, 4, 1, 3, 5)
    return x.reshape(B, ph * pw, C * PATCH * PATCH)


def vilt_fake_news_forward(params, input_ids, attention_mask, pixel_values,
                           pixel_mask=None):
    B, St = input_ids.shape

    # --- text: embedding gathers stay in plain JAX ---
    text_in = params["word_emb"][input_ids] + params["text_pos_emb"][:St][None]   # (B, St, H)

    # --- image: patch extraction (pure reshape/transpose) ---
    patches = extract_patches(pixel_values)                                        # (B, P, C*p*p)
    P = patches.shape[1]
    S_real = St + 1 + P
    S_pad = ((S_real + 7) // 8) * 8    # pad sequence to a multiple of 8 sublanes

    # tiny parameter constant-folds (modality type / pos / bias rows) done once in the wrapper
    tok0 = params["token_type_emb"][0:1]
    tok1 = params["token_type_emb"][1:2]
    cls_row = params["img_cls"] + params["img_pos_emb"][0:1] + tok1                # (1, H)
    patch_add = params["patch_b"] + params["img_pos_emb"][1:] + tok1               # (P, H)

    # --- attention mask (pad columns automatically masked with -1e9) ---
    if pixel_mask is None:
        img_mask = jnp.ones((B, P + 1), jnp.float32)
    else:
        pm = pixel_mask.astype(jnp.float32).reshape(
            B, IMG_SIZE // PATCH, PATCH, IMG_SIZE // PATCH, PATCH)
        patch_mask = (pm.max(axis=(2, 4)) > 0).astype(jnp.float32).reshape(B, P)
        img_mask = jnp.concatenate([jnp.ones((B, 1), jnp.float32), patch_mask], axis=1)
    mask = jnp.concatenate([attention_mask.astype(jnp.float32), img_mask], axis=1)  # (B, S_real)
    mask = jnp.pad(mask, ((0, 0), (0, S_pad - S_real)))                             # pads -> 0
    add_mask = ((1.0 - mask) * -1e9).reshape(B, 1, S_pad)

    enc = params["enc"]
    CPP = CHANNELS * PATCH * PATCH
    b3 = lambda b: (b, 0, 0)     # per-batch blocks
    c2 = lambda b: (0, 0)        # shared 2-D weights (fetched once, stay resident)
    c3 = lambda b: (0, 0, 0)     # shared stacked (L, ...) weights

    logits = pl.pallas_call(
        _vilt_kernel,
        out_shape=jax.ShapeDtypeStruct((B, 1, NUM_LABELS), jnp.float32),
        grid=(B,),
        in_specs=[
            pl.BlockSpec((None, St, HIDDEN), b3),                 # text word+pos sums
            pl.BlockSpec((None, P, CPP), b3),                     # extracted patches
            pl.BlockSpec((None, 1, S_pad), b3),                   # additive attention mask
            pl.BlockSpec((1, HIDDEN), c2),                        # text LN gamma
            pl.BlockSpec((1, HIDDEN), c2),                        # text LN beta
            pl.BlockSpec((1, HIDDEN), c2),                        # token-type 0 (text)
            pl.BlockSpec((CPP, HIDDEN), c2),                      # patch projection weight
            pl.BlockSpec((P, HIDDEN), c2),                        # patch bias + pos + type (folded)
            pl.BlockSpec((1, HIDDEN), c2),                        # [CLS] row (folded)
            pl.BlockSpec((NUM_LAYERS, 1, HIDDEN), c3),            # ln1 gamma (stacked)
            pl.BlockSpec((NUM_LAYERS, 1, HIDDEN), c3),            # ln1 beta
            pl.BlockSpec((NUM_LAYERS, HIDDEN, 3 * HIDDEN), c3),   # fused QKV weight (H, 3H)
            pl.BlockSpec((NUM_LAYERS, 1, 3 * HIDDEN), c3),        # fused QKV bias (1, 3H)
            pl.BlockSpec((NUM_LAYERS, HIDDEN, HIDDEN), c3),       # out-proj weight
            pl.BlockSpec((NUM_LAYERS, 1, HIDDEN), c3),            # out-proj bias
            pl.BlockSpec((NUM_LAYERS, 1, HIDDEN), c3),            # ln2 gamma
            pl.BlockSpec((NUM_LAYERS, 1, HIDDEN), c3),            # ln2 beta
            pl.BlockSpec((NUM_LAYERS, HIDDEN, INTERMEDIATE), c3),  # MLP W1
            pl.BlockSpec((NUM_LAYERS, 1, INTERMEDIATE), c3),       # MLP b1
            pl.BlockSpec((NUM_LAYERS, INTERMEDIATE, HIDDEN), c3),  # MLP W2
            pl.BlockSpec((NUM_LAYERS, 1, HIDDEN), c3),             # MLP b2
            pl.BlockSpec((1, HIDDEN), c2),                        # final LN gamma
            pl.BlockSpec((1, HIDDEN), c2),                        # final LN beta
            pl.BlockSpec((HIDDEN, HIDDEN), c2),                   # pooler W
            pl.BlockSpec((1, HIDDEN), c2),                        # pooler b
            pl.BlockSpec((HIDDEN, CLS_HIDDEN), c2),               # classifier W1
            pl.BlockSpec((1, CLS_HIDDEN), c2),                    # classifier b1
            pl.BlockSpec((CLS_HIDDEN, NUM_LABELS), c2),           # classifier W2
            pl.BlockSpec((1, NUM_LABELS), c2),                    # classifier b2
        ],
        out_specs=pl.BlockSpec((None, 1, NUM_LABELS), b3),
        compiler_params=pltpu.CompilerParams(dimension_semantics=("parallel",)),
    )(text_in, patches, add_mask,
      params["text_ln_g"], params["text_ln_b"], tok0, params["patch_w"], patch_add, cls_row,
      enc["ln1_g"], enc["ln1_b"], enc["wqkv"], enc["bqkv"], enc["wo"], enc["bo"],
      enc["ln2_g"], enc["ln2_b"], enc["wi"], enc["bi"], enc["wo2"], enc["bo2"],
      params["final_ln_g"], params["final_ln_b"], params["pool_w"], params["pool_b"],
      params["cls_w1"], params["cls_b1"], params["cls_w2"], params["cls_b2"])

    return {"logits": logits.reshape(B, NUM_LABELS)}


# TODO(synk): training-mode dropout (stochastic) is omitted; forward matches eval() semantics.

if __name__ == "__main__":
    key = jax.random.PRNGKey(0)
    pkey, k_ids, k_pix = jax.random.split(key, 3)
    params = init_params(pkey)

    B, ST = 2, 8
    input_ids = jax.random.randint(k_ids, (B, ST), 0, VOCAB, dtype=jnp.int32)
    attention_mask = jnp.ones((B, ST), dtype=jnp.int32)
    pixel_values = jax.random.normal(k_pix, (B, CHANNELS, IMG_SIZE, IMG_SIZE), jnp.float32)

    fwd = jax.jit(vilt_fake_news_forward)
    out = fwd(params, input_ids, attention_mask, pixel_values)
    logits = jax.block_until_ready(out["logits"])
    assert logits.shape == (B, NUM_LABELS) and logits.dtype == jnp.float32
    assert bool(jnp.all(jnp.isfinite(logits)))
    print("KERNEL_OK")
</pallas_src>

<mosaic_0001>
module attributes {stable_mosaic.version = 11 : i64} {
  func.func @_vilt_kernel(%arg0: i32, %arg1: memref<1x8x32xf32, #tpu.memory_space<vmem>>, %arg2: memref<1x4x768xf32, #tpu.memory_space<vmem>>, %arg3: memref<1x1x16xf32, #tpu.memory_space<vmem>>, %arg4: memref<1x32xf32, #tpu.memory_space<vmem>>, %arg5: memref<1x32xf32, #tpu.memory_space<vmem>>, %arg6: memref<1x32xf32, #tpu.memory_space<vmem>>, %arg7: memref<768x32xf32, #tpu.memory_space<vmem>>, %arg8: memref<4x32xf32, #tpu.memory_space<vmem>>, %arg9: memref<1x32xf32, #tpu.memory_space<vmem>>, %arg10: memref<2x1x32xf32, #tpu.memory_space<vmem>>, %arg11: memref<2x1x32xf32, #tpu.memory_space<vmem>>, %arg12: memref<2x32x96xf32, #tpu.memory_space<vmem>>, %arg13: memref<2x1x96xf32, #tpu.memory_space<vmem>>, %arg14: memref<2x32x32xf32, #tpu.memory_space<vmem>>, %arg15: memref<2x1x32xf32, #tpu.memory_space<vmem>>, %arg16: memref<2x1x32xf32, #tpu.memory_space<vmem>>, %arg17: memref<2x1x32xf32, #tpu.memory_space<vmem>>, %arg18: memref<2x32x128xf32, #tpu.memory_space<vmem>>, %arg19: memref<2x1x128xf32, #tpu.memory_space<vmem>>, %arg20: memref<2x128x32xf32, #tpu.memory_space<vmem>>, %arg21: memref<2x1x32xf32, #tpu.memory_space<vmem>>, %arg22: memref<1x32xf32, #tpu.memory_space<vmem>>, %arg23: memref<1x32xf32, #tpu.memory_space<vmem>>, %arg24: memref<32x32xf32, #tpu.memory_space<vmem>>, %arg25: memref<1x32xf32, #tpu.memory_space<vmem>>, %arg26: memref<32x512xf32, #tpu.memory_space<vmem>>, %arg27: memref<1x512xf32, #tpu.memory_space<vmem>>, %arg28: memref<512x2xf32, #tpu.memory_space<vmem>>, %arg29: memref<1x2xf32, #tpu.memory_space<vmem>>, %arg30: memref<1x1x2xf32, #tpu.memory_space<vmem>>) attributes {dimension_semantics = [#tpu.dimension_semantics<parallel>], iteration_bounds = array<i64: 2>, scalar_prefetch = 0 : i64, scratch_operands = 0 : i64, tpu.core_type = #tpu.core_type<tc>, window_params = [{transform_indices = @transform_0, window_bounds = array<i64: 1, 8, 32>}, {transform_indices = @transform_1, window_bounds = array<i64: 1, 4, 768>}, {transform_indices = @transform_2, window_bounds = array<i64: 1, 1, 16>}, {pipeline_mode = #tpu.pipeline_mode<synchronous>, transform_indices = @transform_3, window_bounds = array<i64: 1, 32>}, {pipeline_mode = #tpu.pipeline_mode<synchronous>, transform_indices = @transform_4, window_bounds = array<i64: 1, 32>}, {pipeline_mode = #tpu.pipeline_mode<synchronous>, transform_indices = @transform_5, window_bounds = array<i64: 1, 32>}, {pipeline_mode = #tpu.pipeline_mode<synchronous>, transform_indices = @transform_6, window_bounds = array<i64: 768, 32>}, {pipeline_mode = #tpu.pipeline_mode<synchronous>, transform_indices = @transform_7, window_bounds = array<i64: 4, 32>}, {pipeline_mode = #tpu.pipeline_mode<synchronous>, transform_indices = @transform_8, window_bounds = array<i64: 1, 32>}, {pipeline_mode = #tpu.pipeline_mode<synchronous>, transform_indices = @transform_9, window_bounds = array<i64: 2, 1, 32>}, {pipeline_mode = #tpu.pipeline_mode<synchronous>, transform_indices = @transform_10, window_bounds = array<i64: 2, 1, 32>}, {pipeline_mode = #tpu.pipeline_mode<synchronous>, transform_indices = @transform_11, window_bounds = array<i64: 2, 32, 96>}, {pipeline_mode = #tpu.pipeline_mode<synchronous>, transform_indices = @transform_12, window_bounds = array<i64: 2, 1, 96>}, {pipeline_mode = #tpu.pipeline_mode<synchronous>, transform_indices = @transform_13, window_bounds = array<i64: 2, 32, 32>}, {pipeline_mode = #tpu.pipeline_mode<synchronous>, transform_indices = @transform_14, window_bounds = array<i64: 2, 1, 32>}, {pipeline_mode = #tpu.pipeline_mode<synchronous>, transform_indices = @transform_15, window_bounds = array<i64: 2, 1, 32>}, {pipeline_mode = #tpu.pipeline_mode<synchronous>, transform_indices = @transform_16, window_bounds = array<i64: 2, 1, 32>}, {pipeline_mode = #tpu.pipeline_mode<synchronous>, transform_indices = @transform_17, window_bounds = array<i64: 2, 32, 128>}, {pipeline_mode = #tpu.pipeline_mode<synchronous>, transform_indices = @transform_18, window_bounds = array<i64: 2, 1, 128>}, {pipeline_mode = #tpu.pipeline_mode<synchronous>, transform_indices = @transform_19, window_bounds = array<i64: 2, 128, 32>}, {pipeline_mode = #tpu.pipeline_mode<synchronous>, transform_indices = @transform_20, window_bounds = array<i64: 2, 1, 32>}, {pipeline_mode = #tpu.pipeline_mode<synchronous>, transform_indices = @transform_21, window_bounds = array<i64: 1, 32>}, {pipeline_mode = #tpu.pipeline_mode<synchronous>, transform_indices = @transform_22, window_bounds = array<i64: 1, 32>}, {pipeline_mode = #tpu.pipeline_mode<synchronous>, transform_indices = @transform_23, window_bounds = array<i64: 32, 32>}, {pipeline_mode = #tpu.pipeline_mode<synchronous>, transform_indices = @transform_24, window_bounds = array<i64: 1, 32>}, {pipeline_mode = #tpu.pipeline_mode<synchronous>, transform_indices = @transform_25, window_bounds = array<i64: 32, 512>}, {pipeline_mode = #tpu.pipeline_mode<synchronous>, transform_indices = @transform_26, window_bounds = array<i64: 1, 512>}, {pipeline_mode = #tpu.pipeline_mode<synchronous>, transform_indices = @transform_27, window_bounds = array<i64: 512, 2>}, {pipeline_mode = #tpu.pipeline_mode<synchronous>, transform_indices = @transform_28, window_bounds = array<i64: 1, 2>}, {transform_indices = @transform_29, window_bounds = array<i64: 1, 1, 2>}]} {
    %c0 = arith.constant 0 : index
    %c0_0 = arith.constant 0 : index
    %c0_1 = arith.constant 0 : index
    %0 = vector.load %arg3[%c0, %c0_0, %c0_1] : memref<1x1x16xf32, #tpu.memory_space<vmem>>, vector<1x1x16xf32>
    %1 = vector.shape_cast %0 : vector<1x1x16xf32> to vector<1x16xf32>
    %c0_2 = arith.constant 0 : index
    %c0_3 = arith.constant 0 : index
    %c0_4 = arith.constant 0 : index
    %2 = vector.load %arg1[%c0_2, %c0_3, %c0_4] : memref<1x8x32xf32, #tpu.memory_space<vmem>>, vector<1x8x32xf32>
    %3 = vector.shape_cast %2 : vector<1x8x32xf32> to vector<8x32xf32>
    %c0_5 = arith.constant 0 : index
    %c0_6 = arith.constant 0 : index
    %4 = vector.load %arg4[%c0_5, %c0_6] : memref<1x32xf32, #tpu.memory_space<vmem>>, vector<1x32xf32>
    %c0_7 = arith.constant 0 : index
    %c0_8 = arith.constant 0 : index
    %5 = vector.load %arg5[%c0_7, %c0_8] : memref<1x32xf32, #tpu.memory_space<vmem>>, vector<1x32xf32>
    %cst = arith.constant dense<0.000000e+00> : vector<8xf32>
    %6 = vector.multi_reduction <add>, %3, %cst [1] : vector<8x32xf32> to vector<8xf32>
    %7 = vector.shape_cast %6 : vector<8xf32> to vector<8x1xf32>
    %cst_9 = arith.constant 3.200000e+01 : f32
    %8 = vector.broadcast %cst_9 : f32 to vector<8x1xf32>
    %9 = arith.divf %7, %8 : vector<8x1xf32>
    %10 = vector.broadcast %9 : vector<8x1xf32> to vector<8x32xf32>
    %11 = arith.subf %3, %10 : vector<8x32xf32>
    %12 = arith.mulf %11, %11 : vector<8x32xf32>
    %cst_10 = arith.constant dense<0.000000e+00> : vector<8xf32>
    %13 = vector.multi_reduction <add>, %12, %cst_10 [1] : vector<8x32xf32> to vector<8xf32>
    %14 = vector.shape_cast %13 : vector<8xf32> to vector<8x1xf32>
    %cst_11 = arith.constant 3.200000e+01 : f32
    %15 = vector.broadcast %cst_11 : f32 to vector<8x1xf32>
    %16 = arith.divf %14, %15 : vector<8x1xf32>
    %17 = vector.broadcast %9 : vector<8x1xf32> to vector<8x32xf32>
    %18 = arith.subf %3, %17 : vector<8x32xf32>
    %cst_12 = arith.constant 9.99999996E-13 : f32
    %19 = vector.broadcast %cst_12 : f32 to vector<8x1xf32>
    %20 = arith.addf %16, %19 : vector<8x1xf32>
    %21 = math.rsqrt %20 : vector<8x1xf32>
    %22 = vector.broadcast %21 : vector<8x1xf32> to vector<8x32xf32>
    %23 = arith.mulf %18, %22 : vector<8x32xf32>
    %24 = vector.broadcast %4 : vector<1x32xf32> to vector<8x32xf32>
    %25 = arith.mulf %23, %24 : vector<8x32xf32>
    %26 = vector.broadcast %5 : vector<1x32xf32> to vector<8x32xf32>
    %27 = arith.addf %25, %26 : vector<8x32xf32>
    %c0_13 = arith.constant 0 : index
    %c0_14 = arith.constant 0 : index
    %28 = vector.load %arg6[%c0_13, %c0_14] : memref<1x32xf32, #tpu.memory_space<vmem>>, vector<1x32xf32>
    %29 = vector.broadcast %28 : vector<1x32xf32> to vector<8x32xf32>
    %30 = arith.addf %27, %29 : vector<8x32xf32>
    %c0_15 = arith.constant 0 : index
    %c0_16 = arith.constant 0 : index
    %c0_17 = arith.constant 0 : index
    %31 = vector.load %arg2[%c0_15, %c0_16, %c0_17] : memref<1x4x768xf32, #tpu.memory_space<vmem>>, vector<1x4x768xf32>
    %32 = vector.shape_cast %31 : vector<1x4x768xf32> to vector<4x768xf32>
    %c0_18 = arith.constant 0 : index
    %c0_19 = arith.constant 0 : index
    %33 = vector.load %arg7[%c0_18, %c0_19] : memref<768x32xf32, #tpu.memory_space<vmem>>, vector<768x32xf32>
    %cst_20 = arith.constant dense<0.000000e+00> : vector<4x32xf32>
    %34 = tpu.matmul %32, %33, %cst_20 {dimension_numbers = #tpu.dot_dimension_numbers<[1], [0], [0], [1], [0, 0, 1, 1], [], []>} : vector<4x768xf32>, vector<768x32xf32>, vector<4x32xf32> -> vector<4x32xf32>
    %c0_21 = arith.constant 0 : index
    %c0_22 = arith.constant 0 : index
    %35 = vector.load %arg8[%c0_21, %c0_22] : memref<4x32xf32, #tpu.memory_space<vmem>>, vector<4x32xf32>
    %36 = arith.addf %34, %35 : vector<4x32xf32>
    %c0_23 = arith.constant 0 : index
    %c0_24 = arith.constant 0 : index
    %37 = vector.load %arg9[%c0_23, %c0_24] : memref<1x32xf32, #tpu.memory_space<vmem>>, vector<1x32xf32>
    %cst_25 = arith.constant 0.000000e+00 : f32
    %38 = vector.broadcast %cst_25 : f32 to vector<3x32xf32>
    %39 = tpu.concatenate %30, %37, %36, %38 in 0 : vector<8x32xf32>, vector<1x32xf32>, vector<4x32xf32>, vector<3x32xf32> -> vector<16x32xf32>
    %c0_26 = arith.constant 0 : index
    %c0_27 = arith.constant 0 : index
    %c0_28 = arith.constant 0 : index
    %40 = vector.load %arg10[%c0_26, %c0_27, %c0_28] : memref<2x1x32xf32, #tpu.memory_space<vmem>>, vector<1x1x32xf32>
    %41 = vector.shape_cast %40 : vector<1x1x32xf32> to vector<1x32xf32>
    %c0_29 = arith.constant 0 : index
    %c0_30 = arith.constant 0 : index
    %c0_31 = arith.constant 0 : index
    %42 = vector.load %arg11[%c0_29, %c0_30, %c0_31] : memref<2x1x32xf32, #tpu.memory_space<vmem>>, vector<1x1x32xf32>
    %43 = vector.shape_cast %42 : vector<1x1x32xf32> to vector<1x32xf32>
    %cst_32 = arith.constant dense<0.000000e+00> : vector<16xf32>
    %44 = vector.multi_reduction <add>, %39, %cst_32 [1] : vector<16x32xf32> to vector<16xf32>
    %45 = vector.shape_cast %44 : vector<16xf32> to vector<16x1xf32>
    %cst_33 = arith.constant 3.200000e+01 : f32
    %46 = vector.broadcast %cst_33 : f32 to vector<16x1xf32>
    %47 = arith.divf %45, %46 : vector<16x1xf32>
    %48 = vector.broadcast %47 : vector<16x1xf32> to vector<16x32xf32>
    %49 = arith.subf %39, %48 : vector<16x32xf32>
    %50 = arith.mulf %49, %49 : vector<16x32xf32>
    %cst_34 = arith.constant dense<0.000000e+00> : vector<16xf32>
    %51 = vector.multi_reduction <add>, %50, %cst_34 [1] : vector<16x32xf32> to vector<16xf32>
    %52 = vector.shape_cast %51 : vector<16xf32> to vector<16x1xf32>
    %cst_35 = arith.constant 3.200000e+01 : f32
    %53 = vector.broadcast %cst_35 : f32 to vector<16x1xf32>
    %54 = arith.divf %52, %53 : vector<16x1xf32>
    %55 = vector.broadcast %47 : vector<16x1xf32> to vector<16x32xf32>
    %56 = arith.subf %39, %55 : vector<16x32xf32>
    %cst_36 = arith.constant 9.99999996E-13 : f32
    %57 = vector.broadcast %cst_36 : f32 to vector<16x1xf32>
    %58 = arith.addf %54, %57 : vector<16x1xf32>
    %59 = math.rsqrt %58 : vector<16x1xf32>
    %60 = vector.broadcast %59 : vector<16x1xf32> to vector<16x32xf32>
    %61 = arith.mulf %56, %60 : vector<16x32xf32>
    %62 = vector.broadcast %41 : vector<1x32xf32> to vector<16x32xf32>
    %63 = arith.mulf %61, %62 : vector<16x32xf32>
    %64 = vector.broadcast %43 : vector<1x32xf32> to vector<16x32xf32>
    %65 = arith.addf %63, %64 : vector<16x32xf32>
    %c0_37 = arith.constant 0 : index
    %c0_38 = arith.constant 0 : index
    %c0_39 = arith.constant 0 : index
    %66 = vector.load %arg12[%c0_37, %c0_38, %c0_39] : memref<2x32x96xf32, #tpu.memory_space<vmem>>, vector<1x32x96xf32>
    %67 = vector.shape_cast %66 : vector<1x32x96xf32> to vector<32x96xf32>
    %cst_40 = arith.constant dense<0.000000e+00> : vector<16x96xf32>
    %68 = tpu.matmul %65, %67, %cst_40 {dimension_numbers = #tpu.dot_dimension_numbers<[1], [0], [0], [1], [0, 0, 1, 1], [], []>} : vector<16x32xf32>, vector<32x96xf32>, vector<16x96xf32> -> vector<16x96xf32>
    %c0_41 = arith.constant 0 : index
    %c0_42 = arith.constant 0 : index
    %c0_43 = arith.constant 0 : index
    %69 = vector.load %arg13[%c0_41, %c0_42, %c0_43] : memref<2x1x96xf32, #tpu.memory_space<vmem>>, vector<1x1x96xf32>
    %70 = vector.shape_cast %69 : vector<1x1x96xf32> to vector<1x96xf32>
    %71 = vector.broadcast %70 : vector<1x96xf32> to vector<16x96xf32>
    %72 = arith.addf %68, %71 : vector<16x96xf32>
    %73 = vector.extract_strided_slice %72 {offsets = [0, 0], sizes = [16, 32], strides = [1, 1]} : vector<16x96xf32> to vector<16x32xf32>
    %cst_44 = arith.constant 0.353553385 : f32
    %74 = vector.broadcast %cst_44 : f32 to vector<16x32xf32>
    %75 = arith.mulf %73, %74 : vector<16x32xf32>
    %76 = vector.extract_strided_slice %72 {offsets = [0, 32], sizes = [16, 32], strides = [1, 1]} : vector<16x96xf32> to vector<16x32xf32>
    %77 = vector.extract_strided_slice %72 {offsets = [0, 64], sizes = [16, 32], strides = [1, 1]} : vector<16x96xf32> to vector<16x32xf32>
    %78 = vector.extract_strided_slice %75 {offsets = [0, 0], sizes = [16, 8], strides = [1, 1]} : vector<16x32xf32> to vector<16x8xf32>
    %79 = vector.extract_strided_slice %76 {offsets = [0, 0], sizes = [16, 8], strides = [1, 1]} : vector<16x32xf32> to vector<16x8xf32>
    %cst_45 = arith.constant dense<0.000000e+00> : vector<16x16xf32>
    %80 = tpu.matmul %78, %79, %cst_45 {dimension_numbers = #tpu.dot_dimension_numbers<[1], [1], [0], [0], [0, 0, 1, 0], [], []>} : vector<16x8xf32>, vector<16x8xf32>, vector<16x16xf32> -> vector<16x16xf32>
    %81 = vector.broadcast %1 : vector<1x16xf32> to vector<16x16xf32>
    %82 = arith.addf %80, %81 : vector<16x16xf32>
    %cst_46 = arith.constant dense<0xFF800000> : vector<16xf32>
    %83 = vector.multi_reduction <maximumf>, %82, %cst_46 [1] : vector<16x16xf32> to vector<16xf32>
    %84 = vector.shape_cast %83 : vector<16xf32> to vector<16x1xf32>
    %85 = vector.broadcast %84 : vector<16x1xf32> to vector<16x16xf32>
    %86 = arith.subf %82, %85 : vector<16x16xf32>
    %87 = math.exp %86 : vector<16x16xf32>
    %cst_47 = arith.constant dense<0.000000e+00> : vector<16xf32>
    %88 = vector.multi_reduction <add>, %87, %cst_47 [1] : vector<16x16xf32> to vector<16xf32>
    %89 = vector.shape_cast %88 : vector<16xf32> to vector<16x1xf32>
    %90 = tpu.reciprocal %89 {approx = true} : vector<16x1xf32> -> vector<16x1xf32>
    %91 = vector.broadcast %90 : vector<16x1xf32> to vector<16x16xf32>
    %92 = arith.mulf %87, %91 : vector<16x16xf32>
    %93 = vector.extract_strided_slice %77 {offsets = [0, 0], sizes = [16, 8], strides = [1, 1]} : vector<16x32xf32> to vector<16x8xf32>
    %cst_48 = arith.constant dense<0.000000e+00> : vector<16x8xf32>
    %94 = tpu.matmul %92, %93, %cst_48 {dimension_numbers = #tpu.dot_dimension_numbers<[1], [0], [0], [1], [0, 0, 1, 1], [], []>} : vector<16x16xf32>, vector<16x8xf32>, vector<16x8xf32> -> vector<16x8xf32>
    %95 = vector.extract_strided_slice %75 {offsets = [0, 8], sizes = [16, 8], strides = [1, 1]} : vector<16x32xf32> to vector<16x8xf32>
    %96 = vector.extract_strided_slice %76 {offsets = [0, 8], sizes = [16, 8], strides = [1, 1]} : vector<16x32xf32> to vector<16x8xf32>
    %cst_49 = arith.constant dense<0.000000e+00> : vector<16x16xf32>
    %97 = tpu.matmul %95, %96, %cst_49 {dimension_numbers = #tpu.dot_dimension_numbers<[1], [1], [0], [0], [0, 0, 1, 0], [], []>} : vector<16x8xf32>, vector<16x8xf32>, vector<16x16xf32> -> vector<16x16xf32>
    %98 = vector.broadcast %1 : vector<1x16xf32> to vector<16x16xf32>
    %99 = arith.addf %97, %98 : vector<16x16xf32>
    %cst_50 = arith.constant dense<0xFF800000> : vector<16xf32>
    %100 = vector.multi_reduction <maximumf>, %99, %cst_50 [1] : vector<16x16xf32> to vector<16xf32>
    %101 = vector.shape_cast %100 : vector<16xf32> to vector<16x1xf32>
    %102 = vector.broadcast %101 : vector<16x1xf32> to vector<16x16xf32>
    %103 = arith.subf %99, %102 : vector<16x16xf32>
    %104 = math.exp %103 : vector<16x16xf32>
    %cst_51 = arith.constant dense<0.000000e+00> : vector<16xf32>
    %105 = vector.multi_reduction <add>, %104, %cst_51 [1] : vector<16x16xf32> to vector<16xf32>
    %106 = vector.shape_cast %105 : vector<16xf32> to vector<16x1xf32>
    %107 = tpu.reciprocal %106 {approx = true} : vector<16x1xf32> -> vector<16x1xf32>
    %108 = vector.broadcast %107 : vector<16x1xf32> to vector<16x16xf32>
    %109 = arith.mulf %104, %108 : vector<16x16xf32>
    %110 = vector.extract_strided_slice %77 {offsets = [0, 8], sizes = [16, 8], strides = [1, 1]} : vector<16x32xf32> to vector<16x8xf32>
    %cst_52 = arith.constant dense<0.000000e+00> : vector<16x8xf32>
    %111 = tpu.matmul %109, %110, %cst_52 {dimension_numbers = #tpu.dot_dimension_numbers<[1], [0], [0], [1], [0, 0, 1, 1], [], []>} : vector<16x16xf32>, vector<16x8xf32>, vector<16x8xf32> -> vector<16x8xf32>
    %112 = vector.extract_strided_slice %75 {offsets = [0, 16], sizes = [16, 8], strides = [1, 1]} : vector<16x32xf32> to vector<16x8xf32>
    %113 = vector.extract_strided_slice %76 {offsets = [0, 16], sizes = [16, 8], strides = [1, 1]} : vector<16x32xf32> to vector<16x8xf32>
    %cst_53 = arith.constant dense<0.000000e+00> : vector<16x16xf32>
    %114 = tpu.matmul %112, %113, %cst_53 {dimension_numbers = #tpu.dot_dimension_numbers<[1], [1], [0], [0], [0, 0, 1, 0], [], []>} : vector<16x8xf32>, vector<16x8xf32>, vector<16x16xf32> -> vector<16x16xf32>
    %115 = vector.broadcast %1 : vector<1x16xf32> to vector<16x16xf32>
    %116 = arith.addf %114, %115 : vector<16x16xf32>
    %cst_54 = arith.constant dense<0xFF800000> : vector<16xf32>
    %117 = vector.multi_reduction <maximumf>, %116, %cst_54 [1] : vector<16x16xf32> to vector<16xf32>
    %118 = vector.shape_cast %117 : vector<16xf32> to vector<16x1xf32>
    %119 = vector.broadcast %118 : vector<16x1xf32> to vector<16x16xf32>
    %120 = arith.subf %116, %119 : vector<16x16xf32>
    %121 = math.exp %120 : vector<16x16xf32>
    %cst_55 = arith.constant dense<0.000000e+00> : vector<16xf32>
    %122 = vector.multi_reduction <add>, %121, %cst_55 [1] : vector<16x16xf32> to vector<16xf32>
    %123 = vector.shape_cast %122 : vector<16xf32> to vector<16x1xf32>
    %124 = tpu.reciprocal %123 {approx = true} : vector<16x1xf32> -> vector<16x1xf32>
    %125 = vector.broadcast %124 : vector<16x1xf32> to vector<16x16xf32>
    %126 = arith.mulf %121, %125 : vector<16x16xf32>
    %127 = vector.extract_strided_slice %77 {offsets = [0, 16], sizes = [16, 8], strides = [1, 1]} : vector<16x32xf32> to vector<16x8xf32>
    %cst_56 = arith.constant dense<0.000000e+00> : vector<16x8xf32>
    %128 = tpu.matmul %126, %127, %cst_56 {dimension_numbers = #tpu.dot_dimension_numbers<[1], [0], [0], [1], [0, 0, 1, 1], [], []>} : vector<16x16xf32>, vector<16x8xf32>, vector<16x8xf32> -> vector<16x8xf32>
    %129 = vector.extract_strided_slice %75 {offsets = [0, 24], sizes = [16, 8], strides = [1, 1]} : vector<16x32xf32> to vector<16x8xf32>
    %130 = vector.extract_strided_slice %76 {offsets = [0, 24], sizes = [16, 8], strides = [1, 1]} : vector<16x32xf32> to vector<16x8xf32>
    %cst_57 = arith.constant dense<0.000000e+00> : vector<16x16xf32>
    %131 = tpu.matmul %129, %130, %cst_57 {dimension_numbers = #tpu.dot_dimension_numbers<[1], [1], [0], [0], [0, 0, 1, 0], [], []>} : vector<16x8xf32>, vector<16x8xf32>, vector<16x16xf32> -> vector<16x16xf32>
    %132 = vector.broadcast %1 : vector<1x16xf32> to vector<16x16xf32>
    %133 = arith.addf %131, %132 : vector<16x16xf32>
    %cst_58 = arith.constant dense<0xFF800000> : vector<16xf32>
    %134 = vector.multi_reduction <maximumf>, %133, %cst_58 [1] : vector<16x16xf32> to vector<16xf32>
    %135 = vector.shape_cast %134 : vector<16xf32> to vector<16x1xf32>
    %136 = vector.broadcast %135 : vector<16x1xf32> to vector<16x16xf32>
    %137 = arith.subf %133, %136 : vector<16x16xf32>
    %138 = math.exp %137 : vector<16x16xf32>
    %cst_59 = arith.constant dense<0.000000e+00> : vector<16xf32>
    %139 = vector.multi_reduction <add>, %138, %cst_59 [1] : vector<16x16xf32> to vector<16xf32>
    %140 = vector.shape_cast %139 : vector<16xf32> to vector<16x1xf32>
    %141 = tpu.reciprocal %140 {approx = true} : vector<16x1xf32> -> vector<16x1xf32>
    %142 = vector.broadcast %141 : vector<16x1xf32> to vector<16x16xf32>
    %143 = arith.mulf %138, %142 : vector<16x16xf32>
    %144 = vector.extract_strided_slice %77 {offsets = [0, 24], sizes = [16, 8], strides = [1, 1]} : vector<16x32xf32> to vector<16x8xf32>
    %cst_60 = arith.constant dense<0.000000e+00> : vector<16x8xf32>
    %145 = tpu.matmul %143, %144, %cst_60 {dimension_numbers = #tpu.dot_dimension_numbers<[1], [0], [0], [1], [0, 0, 1, 1], [], []>} : vector<16x16xf32>, vector<16x8xf32>, vector<16x8xf32> -> vector<16x8xf32>
    %146 = tpu.concatenate %94, %111, %128, %145 in 1 : vector<16x8xf32>, vector<16x8xf32>, vector<16x8xf32>, vector<16x8xf32> -> vector<16x32xf32>
    %c0_61 = arith.constant 0 : index
    %c0_62 = arith.constant 0 : index
    %c0_63 = arith.constant 0 : index
    %147 = vector.load %arg14[%c0_61, %c0_62, %c0_63] : memref<2x32x32xf32, #tpu.memory_space<vmem>>, vector<1x32x32xf32>
    %148 = vector.shape_cast %147 : vector<1x32x32xf32> to vector<32x32xf32>
    %cst_64 = arith.constant dense<0.000000e+00> : vector<16x32xf32>
    %149 = tpu.matmul %146, %148, %cst_64 {dimension_numbers = #tpu.dot_dimension_numbers<[1], [0], [0], [1], [0, 0, 1, 1], [], []>} : vector<16x32xf32>, vector<32x32xf32>, vector<16x32xf32> -> vector<16x32xf32>
    %150 = arith.addf %39, %149 : vector<16x32xf32>
    %c0_65 = arith.constant 0 : index
    %c0_66 = arith.constant 0 : index
    %c0_67 = arith.constant 0 : index
    %151 = vector.load %arg15[%c0_65, %c0_66, %c0_67] : memref<2x1x32xf32, #tpu.memory_space<vmem>>, vector<1x1x32xf32>
    %152 = vector.shape_cast %151 : vector<1x1x32xf32> to vector<1x32xf32>
    %153 = vector.broadcast %152 : vector<1x32xf32> to vector<16x32xf32>
    %154 = arith.addf %150, %153 : vector<16x32xf32>
    %c0_68 = arith.constant 0 : index
    %c0_69 = arith.constant 0 : index
    %c0_70 = arith.constant 0 : index
    %155 = vector.load %arg16[%c0_68, %c0_69, %c0_70] : memref<2x1x32xf32, #tpu.memory_space<vmem>>, vector<1x1x32xf32>
    %156 = vector.shape_cast %155 : vector<1x1x32xf32> to vector<1x32xf32>
    %c0_71 = arith.constant 0 : index
    %c0_72 = arith.constant 0 : index
    %c0_73 = arith.constant 0 : index
    %157 = vector.load %arg17[%c0_71, %c0_72, %c0_73] : memref<2x1x32xf32, #tpu.memory_space<vmem>>, vector<1x1x32xf32>
    %158 = vector.shape_cast %157 : vector<1x1x32xf32> to vector<1x32xf32>
    %cst_74 = arith.constant dense<0.000000e+00> : vector<16xf32>
    %159 = vector.multi_reduction <add>, %154, %cst_74 [1] : vector<16x32xf32> to vector<16xf32>
    %160 = vector.shape_cast %159 : vector<16xf32> to vector<16x1xf32>
    %cst_75 = arith.constant 3.200000e+01 : f32
    %161 = vector.broadcast %cst_75 : f32 to vector<16x1xf32>
    %162 = arith.divf %160, %161 : vector<16x1xf32>
    %163 = vector.broadcast %162 : vector<16x1xf32> to vector<16x32xf32>
    %164 = arith.subf %154, %163 : vector<16x32xf32>
    %165 = arith.mulf %164, %164 : vector<16x32xf32>
    %cst_76 = arith.constant dense<0.000000e+00> : vector<16xf32>
    %166 = vector.multi_reduction <add>, %165, %cst_76 [1] : vector<16x32xf32> to vector<16xf32>
    %167 = vector.shape_cast %166 : vector<16xf32> to vector<16x1xf32>
    %cst_77 = arith.constant 3.200000e+01 : f32
    %168 = vector.broadcast %cst_77 : f32 to vector<16x1xf32>
    %169 = arith.divf %167, %168 : vector<16x1xf32>
    %170 = vector.broadcast %162 : vector<16x1xf32> to vector<16x32xf32>
    %171 = arith.subf %154, %170 : vector<16x32xf32>
    %cst_78 = arith.constant 9.99999996E-13 : f32
    %172 = vector.broadcast %cst_78 : f32 to vector<16x1xf32>
    %173 = arith.addf %169, %172 : vector<16x1xf32>
    %174 = math.rsqrt %173 : vector<16x1xf32>
    %175 = vector.broadcast %174 : vector<16x1xf32> to vector<16x32xf32>
    %176 = arith.mulf %171, %175 : vector<16x32xf32>
    %177 = vector.broadcast %156 : vector<1x32xf32> to vector<16x32xf32>
    %178 = arith.mulf %176, %177 : vector<16x32xf32>
    %179 = vector.broadcast %158 : vector<1x32xf32> to vector<16x32xf32>
    %180 = arith.addf %178, %179 : vector<16x32xf32>
    %c0_79 = arith.constant 0 : index
    %c0_80 = arith.constant 0 : index
    %c0_81 = arith.constant 0 : index
    %181 = vector.load %arg18[%c0_79, %c0_80, %c0_81] : memref<2x32x128xf32, #tpu.memory_space<vmem>>, vector<1x32x128xf32>
    %182 = vector.shape_cast %181 : vector<1x32x128xf32> to vector<32x128xf32>
    %cst_82 = arith.constant dense<0.000000e+00> : vector<16x128xf32>
    %183 = tpu.matmul %180, %182, %cst_82 {dimension_numbers = #tpu.dot_dimension_numbers<[1], [0], [0], [1], [0, 0, 1, 1], [], []>} : vector<16x32xf32>, vector<32x128xf32>, vector<16x128xf32> -> vector<16x128xf32>
    %c0_83 = arith.constant 0 : index
    %c0_84 = arith.constant 0 : index
    %c0_85 = arith.constant 0 : index
    %184 = vector.load %arg19[%c0_83, %c0_84, %c0_85] : memref<2x1x128xf32, #tpu.memory_space<vmem>>, vector<1x1x128xf32>
    %185 = vector.shape_cast %184 : vector<1x1x128xf32> to vector<1x128xf32>
    %186 = vector.broadcast %185 : vector<1x128xf32> to vector<16x128xf32>
    %187 = arith.addf %183, %186 : vector<16x128xf32>
    %cst_86 = arith.constant 5.000000e-01 : f32
    %188 = vector.broadcast %cst_86 : f32 to vector<16x128xf32>
    %189 = arith.mulf %188, %187 : vector<16x128xf32>
    %cst_87 = arith.constant 0.707106769 : f32
    %190 = vector.broadcast %cst_87 : f32 to vector<16x128xf32>
    %191 = arith.mulf %187, %190 : vector<16x128xf32>
    %cst_88 = arith.constant 0.000000e+00 : f32
    %192 = vector.broadcast %cst_88 : f32 to vector<16x128xf32>
    %193 = arith.cmpf oge, %191, %192 : vector<16x128xf32>
    %cst_89 = arith.constant 1.000000e+00 : f32
    %cst_90 = arith.constant -1.000000e+00 : f32
    %194 = vector.broadcast %cst_89 : f32 to vector<16x128xf32>
    %195 = vector.broadcast %cst_90 : f32 to vector<16x128xf32>
    %196 = arith.select %193, %194, %195 : vector<16x128xi1>, vector<16x128xf32>
    %197 = math.absf %191 : vector<16x128xf32>
    %cst_91 = arith.constant 0.327591091 : f32
    %198 = vector.broadcast %cst_91 : f32 to vector<16x128xf32>
    %199 = arith.mulf %198, %197 : vector<16x128xf32>
    %cst_92 = arith.constant 1.000000e+00 : f32
    %200 = vector.broadcast %cst_92 : f32 to vector<16x128xf32>
    %201 = arith.addf %200, %199 : vector<16x128xf32>
    %cst_93 = arith.constant 1.000000e+00 : f32
    %202 = vector.broadcast %cst_93 : f32 to vector<16x128xf32>
    %203 = arith.divf %202, %201 : vector<16x128xf32>
    %cst_94 = arith.constant 1.06140542 : f32
    %204 = vector.broadcast %cst_94 : f32 to vector<16x128xf32>
    %205 = arith.mulf %204, %203 : vector<16x128xf32>
    %cst_95 = arith.constant -1.45315206 : f32
    %206 = vector.broadcast %cst_95 : f32 to vector<16x128xf32>
    %207 = arith.addf %205, %206 : vector<16x128xf32>
    %208 = arith.mulf %207, %203 : vector<16x128xf32>
    %cst_96 = arith.constant 1.42141378 : f32
    %209 = vector.broadcast %cst_96 : f32 to vector<16x128xf32>
    %210 = arith.addf %208, %209 : vector<16x128xf32>
    %211 = arith.mulf %210, %203 : vector<16x128xf32>
    %cst_97 = arith.constant -0.284496725 : f32
    %212 = vector.broadcast %cst_97 : f32 to vector<16x128xf32>
    %213 = arith.addf %211, %212 : vector<16x128xf32>
    %214 = arith.mulf %213, %203 : vector<16x128xf32>
    %cst_98 = arith.constant 0.254829586 : f32
    %215 = vector.broadcast %cst_98 : f32 to vector<16x128xf32>
    %216 = arith.addf %214, %215 : vector<16x128xf32>
    %217 = arith.mulf %216, %203 : vector<16x128xf32>
    %cst_99 = arith.constant 0.000000e+00 : f32
    %218 = vector.broadcast %cst_99 : f32 to vector<16x128xf32>
    %219 = arith.subf %218, %197 : vector<16x128xf32>
    %220 = arith.mulf %219, %197 : vector<16x128xf32>
    %221 = math.exp %220 : vector<16x128xf32>
    %222 = arith.mulf %217, %221 : vector<16x128xf32>
    %cst_100 = arith.constant 1.000000e+00 : f32
    %223 = vector.broadcast %cst_100 : f32 to vector<16x128xf32>
    %224 = arith.subf %223, %222 : vector<16x128xf32>
    %225 = arith.mulf %196, %224 : vector<16x128xf32>
    %cst_101 = arith.constant 1.000000e+00 : f32
    %226 = vector.broadcast %cst_101 : f32 to vector<16x128xf32>
    %227 = arith.addf %226, %225 : vector<16x128xf32>
    %228 = arith.mulf %189, %227 : vector<16x128xf32>
    %c0_102 = arith.constant 0 : index
    %c0_103 = arith.constant 0 : index
    %c0_104 = arith.constant 0 : index
    %229 = vector.load %arg20[%c0_102, %c0_103, %c0_104] : memref<2x128x32xf32, #tpu.memory_space<vmem>>, vector<1x128x32xf32>
    %230 = vector.shape_cast %229 : vector<1x128x32xf32> to vector<128x32xf32>
    %cst_105 = arith.constant dense<0.000000e+00> : vector<16x32xf32>
    %231 = tpu.matmul %228, %230, %cst_105 {dimension_numbers = #tpu.dot_dimension_numbers<[1], [0], [0], [1], [0, 0, 1, 1], [], []>} : vector<16x128xf32>, vector<128x32xf32>, vector<16x32xf32> -> vector<16x32xf32>
    %232 = arith.addf %154, %231 : vector<16x32xf32>
    %c0_106 = arith.constant 0 : index
    %c0_107 = arith.constant 0 : index
    %c0_108 = arith.constant 0 : index
    %233 = vector.load %arg21[%c0_106, %c0_107, %c0_108] : memref<2x1x32xf32, #tpu.memory_space<vmem>>, vector<1x1x32xf32>
    %234 = vector.shape_cast %233 : vector<1x1x32xf32> to vector<1x32xf32>
    %235 = vector.broadcast %234 : vector<1x32xf32> to vector<16x32xf32>
    %236 = arith.addf %232, %235 : vector<16x32xf32>
    %c1 = arith.constant 1 : index
    %c0_109 = arith.constant 0 : index
    %c0_110 = arith.constant 0 : index
    %237 = vector.load %arg10[%c1, %c0_109, %c0_110] : memref<2x1x32xf32, #tpu.memory_space<vmem>>, vector<1x1x32xf32>
    %238 = vector.shape_cast %237 : vector<1x1x32xf32> to vector<1x32xf32>
    %c1_111 = arith.constant 1 : index
    %c0_112 = arith.constant 0 : index
    %c0_113 = arith.constant 0 : index
    %239 = vector.load %arg11[%c1_111, %c0_112, %c0_113] : memref<2x1x32xf32, #tpu.memory_space<vmem>>, vector<1x1x32xf32>
    %240 = vector.shape_cast %239 : vector<1x1x32xf32> to vector<1x32xf32>
    %cst_114 = arith.constant dense<0.000000e+00> : vector<16xf32>
    %241 = vector.multi_reduction <add>, %236, %cst_114 [1] : vector<16x32xf32> to vector<16xf32>
    %242 = vector.shape_cast %241 : vector<16xf32> to vector<16x1xf32>
    %cst_115 = arith.constant 3.200000e+01 : f32
    %243 = vector.broadcast %cst_115 : f32 to vector<16x1xf32>
    %244 = arith.divf %242, %243 : vector<16x1xf32>
    %245 = vector.broadcast %244 : vector<16x1xf32> to vector<16x32xf32>
    %246 = arith.subf %236, %245 : vector<16x32xf32>
    %247 = arith.mulf %246, %246 : vector<16x32xf32>
    %cst_116 = arith.constant dense<0.000000e+00> : vector<16xf32>
    %248 = vector.multi_reduction <add>, %247, %cst_116 [1] : vector<16x32xf32> to vector<16xf32>
    %249 = vector.shape_cast %248 : vector<16xf32> to vector<16x1xf32>
    %cst_117 = arith.constant 3.200000e+01 : f32
    %250 = vector.broadcast %cst_117 : f32 to vector<16x1xf32>
    %251 = arith.divf %249, %250 : vector<16x1xf32>
    %252 = vector.broadcast %244 : vector<16x1xf32> to vector<16x32xf32>
    %253 = arith.subf %236, %252 : vector<16x32xf32>
    %cst_118 = arith.constant 9.99999996E-13 : f32
    %254 = vector.broadcast %cst_118 : f32 to vector<16x1xf32>
    %255 = arith.addf %251, %254 : vector<16x1xf32>
    %256 = math.rsqrt %255 : vector<16x1xf32>
    %257 = vector.broadcast %256 : vector<16x1xf32> to vector<16x32xf32>
    %258 = arith.mulf %253, %257 : vector<16x32xf32>
    %259 = vector.broadcast %238 : vector<1x32xf32> to vector<16x32xf32>
    %260 = arith.mulf %258, %259 : vector<16x32xf32>
    %261 = vector.broadcast %240 : vector<1x32xf32> to vector<16x32xf32>
    %262 = arith.addf %260, %261 : vector<16x32xf32>
    %c1_119 = arith.constant 1 : index
    %c0_120 = arith.constant 0 : index
    %c0_121 = arith.constant 0 : index
    %263 = vector.load %arg12[%c1_119, %c0_120, %c0_121] : memref<2x32x96xf32, #tpu.memory_space<vmem>>, vector<1x32x96xf32>
    %264 = vector.shape_cast %263 : vector<1x32x96xf32> to vector<32x96xf32>
    %cst_122 = arith.constant dense<0.000000e+00> : vector<16x96xf32>
    %265 = tpu.matmul %262, %264, %cst_122 {dimension_numbers = #tpu.dot_dimension_numbers<[1], [0], [0], [1], [0, 0, 1, 1], [], []>} : vector<16x32xf32>, vector<32x96xf32>, vector<16x96xf32> -> vector<16x96xf32>
    %c1_123 = arith.constant 1 : index
    %c0_124 = arith.constant 0 : index
    %c0_125 = arith.constant 0 : index
    %266 = vector.load %arg13[%c1_123, %c0_124, %c0_125] : memref<2x1x96xf32, #tpu.memory_space<vmem>>, vector<1x1x96xf32>
    %267 = vector.shape_cast %266 : vector<1x1x96xf32> to vector<1x96xf32>
    %268 = vector.broadcast %267 : vector<1x96xf32> to vector<16x96xf32>
    %269 = arith.addf %265, %268 : vector<16x96xf32>
    %270 = vector.extract_strided_slice %269 {offsets = [0, 0], sizes = [16, 32], strides = [1, 1]} : vector<16x96xf32> to vector<16x32xf32>
    %cst_126 = arith.constant 0.353553385 : f32
    %271 = vector.broadcast %cst_126 : f32 to vector<16x32xf32>
    %272 = arith.mulf %270, %271 : vector<16x32xf32>
    %273 = vector.extract_strided_slice %269 {offsets = [0, 32], sizes = [16, 32], strides = [1, 1]} : vector<16x96xf32> to vector<16x32xf32>
    %274 = vector.extract_strided_slice %269 {offsets = [0, 64], sizes = [16, 32], strides = [1, 1]} : vector<16x96xf32> to vector<16x32xf32>
    %275 = vector.extract_strided_slice %272 {offsets = [0, 0], sizes = [16, 8], strides = [1, 1]} : vector<16x32xf32> to vector<16x8xf32>
    %276 = vector.extract_strided_slice %273 {offsets = [0, 0], sizes = [16, 8], strides = [1, 1]} : vector<16x32xf32> to vector<16x8xf32>
    %cst_127 = arith.constant dense<0.000000e+00> : vector<16x16xf32>
    %277 = tpu.matmul %275, %276, %cst_127 {dimension_numbers = #tpu.dot_dimension_numbers<[1], [1], [0], [0], [0, 0, 1, 0], [], []>} : vector<16x8xf32>, vector<16x8xf32>, vector<16x16xf32> -> vector<16x16xf32>
    %278 = vector.broadcast %1 : vector<1x16xf32> to vector<16x16xf32>
    %279 = arith.addf %277, %278 : vector<16x16xf32>
    %cst_128 = arith.constant dense<0xFF800000> : vector<16xf32>
    %280 = vector.multi_reduction <maximumf>, %279, %cst_128 [1] : vector<16x16xf32> to vector<16xf32>
    %281 = vector.shape_cast %280 : vector<16xf32> to vector<16x1xf32>
    %282 = vector.broadcast %281 : vector<16x1xf32> to vector<16x16xf32>
    %283 = arith.subf %279, %282 : vector<16x16xf32>
    %284 = math.exp %283 : vector<16x16xf32>
    %cst_129 = arith.constant dense<0.000000e+00> : vector<16xf32>
    %285 = vector.multi_reduction <add>, %284, %cst_129 [1] : vector<16x16xf32> to vector<16xf32>
    %286 = vector.shape_cast %285 : vector<16xf32> to vector<16x1xf32>
    %287 = tpu.reciprocal %286 {approx = true} : vector<16x1xf32> -> vector<16x1xf32>
    %288 = vector.broadcast %287 : vector<16x1xf32> to vector<16x16xf32>
    %289 = arith.mulf %284, %288 : vector<16x16xf32>
    %290 = vector.extract_strided_slice %274 {offsets = [0, 0], sizes = [16, 8], strides = [1, 1]} : vector<16x32xf32> to vector<16x8xf32>
    %cst_130 = arith.constant dense<0.000000e+00> : vector<16x8xf32>
    %291 = tpu.matmul %289, %290, %cst_130 {dimension_numbers = #tpu.dot_dimension_numbers<[1], [0], [0], [1], [0, 0, 1, 1], [], []>} : vector<16x16xf32>, vector<16x8xf32>, vector<16x8xf32> -> vector<16x8xf32>
    %292 = vector.extract_strided_slice %272 {offsets = [0, 8], sizes = [16, 8], strides = [1, 1]} : vector<16x32xf32> to vector<16x8xf32>
    %293 = vector.extract_strided_slice %273 {offsets = [0, 8], sizes = [16, 8], strides = [1, 1]} : vector<16x32xf32> to vector<16x8xf32>
    %cst_131 = arith.constant dense<0.000000e+00> : vector<16x16xf32>
    %294 = tpu.matmul %292, %293, %cst_131 {dimension_numbers = #tpu.dot_dimension_numbers<[1], [1], [0], [0], [0, 0, 1, 0], [], []>} : vector<16x8xf32>, vector<16x8xf32>, vector<16x16xf32> -> vector<16x16xf32>
    %295 = vector.broadcast %1 : vector<1x16xf32> to vector<16x16xf32>
    %296 = arith.addf %294, %295 : vector<16x16xf32>
    %cst_132 = arith.constant dense<0xFF800000> : vector<16xf32>
    %297 = vector.multi_reduction <maximumf>, %296, %cst_132 [1] : vector<16x16xf32> to vector<16xf32>
    %298 = vector.shape_cast %297 : vector<16xf32> to vector<16x1xf32>
    %299 = vector.broadcast %298 : vector<16x1xf32> to vector<16x16xf32>
    %300 = arith.subf %296, %299 : vector<16x16xf32>
    %301 = math.exp %300 : vector<16x16xf32>
    %cst_133 = arith.constant dense<0.000000e+00> : vector<16xf32>
    %302 = vector.multi_reduction <add>, %301, %cst_133 [1] : vector<16x16xf32> to vector<16xf32>
    %303 = vector.shape_cast %302 : vector<16xf32> to vector<16x1xf32>
    %304 = tpu.reciprocal %303 {approx = true} : vector<16x1xf32> -> vector<16x1xf32>
    %305 = vector.broadcast %304 : vector<16x1xf32> to vector<16x16xf32>
    %306 = arith.mulf %301, %305 : vector<16x16xf32>
    %307 = vector.extract_strided_slice %274 {offsets = [0, 8], sizes = [16, 8], strides = [1, 1]} : vector<16x32xf32> to vector<16x8xf32>
    %cst_134 = arith.constant dense<0.000000e+00> : vector<16x8xf32>
    %308 = tpu.matmul %306, %307, %cst_134 {dimension_numbers = #tpu.dot_dimension_numbers<[1], [0], [0], [1], [0, 0, 1, 1], [], []>} : vector<16x16xf32>, vector<16x8xf32>, vector<16x8xf32> -> vector<16x8xf32>
    %309 = vector.extract_strided_slice %272 {offsets = [0, 16], sizes = [16, 8], strides = [1, 1]} : vector<16x32xf32> to vector<16x8xf32>
    %310 = vector.extract_strided_slice %273 {offsets = [0, 16], sizes = [16, 8], strides = [1, 1]} : vector<16x32xf32> to vector<16x8xf32>
    %cst_135 = arith.constant dense<0.000000e+00> : vector<16x16xf32>
    %311 = tpu.matmul %309, %310, %cst_135 {dimension_numbers = #tpu.dot_dimension_numbers<[1], [1], [0], [0], [0, 0, 1, 0], [], []>} : vector<16x8xf32>, vector<16x8xf32>, vector<16x16xf32> -> vector<16x16xf32>
    %312 = vector.broadcast %1 : vector<1x16xf32> to vector<16x16xf32>
    %313 = arith.addf %311, %312 : vector<16x16xf32>
    %cst_136 = arith.constant dense<0xFF800000> : vector<16xf32>
    %314 = vector.multi_reduction <maximumf>, %313, %cst_136 [1] : vector<16x16xf32> to vector<16xf32>
    %315 = vector.shape_cast %314 : vector<16xf32> to vector<16x1xf32>
    %316 = vector.broadcast %315 : vector<16x1xf32> to vector<16x16xf32>
    %317 = arith.subf %313, %316 : vector<16x16xf32>
    %318 = math.exp %317 : vector<16x16xf32>
    %cst_137 = arith.constant dense<0.000000e+00> : vector<16xf32>
    %319 = vector.multi_reduction <add>, %318, %cst_137 [1] : vector<16x16xf32> to vector<16xf32>
    %320 = vector.shape_cast %319 : vector<16xf32> to vector<16x1xf32>
    %321 = tpu.reciprocal %320 {approx = true} : vector<16x1xf32> -> vector<16x1xf32>
    %322 = vector.broadcast %321 : vector<16x1xf32> to vector<16x16xf32>
    %323 = arith.mulf %318, %322 : vector<16x16xf32>
    %324 = vector.extract_strided_slice %274 {offsets = [0, 16], sizes = [16, 8], strides = [1, 1]} : vector<16x32xf32> to vector<16x8xf32>
    %cst_138 = arith.constant dense<0.000000e+00> : vector<16x8xf32>
    %325 = tpu.matmul %323, %324, %cst_138 {dimension_numbers = #tpu.dot_dimension_numbers<[1], [0], [0], [1], [0, 0, 1, 1], [], []>} : vector<16x16xf32>, vector<16x8xf32>, vector<16x8xf32> -> vector<16x8xf32>
    %326 = vector.extract_strided_slice %272 {offsets = [0, 24], sizes = [16, 8], strides = [1, 1]} : vector<16x32xf32> to vector<16x8xf32>
    %327 = vector.extract_strided_slice %273 {offsets = [0, 24], sizes = [16, 8], strides = [1, 1]} : vector<16x32xf32> to vector<16x8xf32>
    %cst_139 = arith.constant dense<0.000000e+00> : vector<16x16xf32>
    %328 = tpu.matmul %326, %327, %cst_139 {dimension_numbers = #tpu.dot_dimension_numbers<[1], [1], [0], [0], [0, 0, 1, 0], [], []>} : vector<16x8xf32>, vector<16x8xf32>, vector<16x16xf32> -> vector<16x16xf32>
    %329 = vector.broadcast %1 : vector<1x16xf32> to vector<16x16xf32>
    %330 = arith.addf %328, %329 : vector<16x16xf32>
    %cst_140 = arith.constant dense<0xFF800000> : vector<16xf32>
    %331 = vector.multi_reduction <maximumf>, %330, %cst_140 [1] : vector<16x16xf32> to vector<16xf32>
    %332 = vector.shape_cast %331 : vector<16xf32> to vector<16x1xf32>
    %333 = vector.broadcast %332 : vector<16x1xf32> to vector<16x16xf32>
    %334 = arith.subf %330, %333 : vector<16x16xf32>
    %335 = math.exp %334 : vector<16x16xf32>
    %cst_141 = arith.constant dense<0.000000e+00> : vector<16xf32>
    %336 = vector.multi_reduction <add>, %335, %cst_141 [1] : vector<16x16xf32> to vector<16xf32>
    %337 = vector.shape_cast %336 : vector<16xf32> to vector<16x1xf32>
    %338 = tpu.reciprocal %337 {approx = true} : vector<16x1xf32> -> vector<16x1xf32>
    %339 = vector.broadcast %338 : vector<16x1xf32> to vector<16x16xf32>
    %340 = arith.mulf %335, %339 : vector<16x16xf32>
    %341 = vector.extract_strided_slice %274 {offsets = [0, 24], sizes = [16, 8], strides = [1, 1]} : vector<16x32xf32> to vector<16x8xf32>
    %cst_142 = arith.constant dense<0.000000e+00> : vector<16x8xf32>
    %342 = tpu.matmul %340, %341, %cst_142 {dimension_numbers = #tpu.dot_dimension_numbers<[1], [0], [0], [1], [0, 0, 1, 1], [], []>} : vector<16x16xf32>, vector<16x8xf32>, vector<16x8xf32> -> vector<16x8xf32>
    %343 = tpu.concatenate %291, %308, %325, %342 in 1 : vector<16x8xf32>, vector<16x8xf32>, vector<16x8xf32>, vector<16x8xf32> -> vector<16x32xf32>
    %c1_143 = arith.constant 1 : index
    %c0_144 = arith.constant 0 : index
    %c0_145 = arith.constant 0 : index
    %344 = vector.load %arg14[%c1_143, %c0_144, %c0_145] : memref<2x32x32xf32, #tpu.memory_space<vmem>>, vector<1x32x32xf32>
    %345 = vector.shape_cast %344 : vector<1x32x32xf32> to vector<32x32xf32>
    %cst_146 = arith.constant dense<0.000000e+00> : vector<16x32xf32>
    %346 = tpu.matmul %343, %345, %cst_146 {dimension_numbers = #tpu.dot_dimension_numbers<[1], [0], [0], [1], [0, 0, 1, 1], [], []>} : vector<16x32xf32>, vector<32x32xf32>, vector<16x32xf32> -> vector<16x32xf32>
    %347 = arith.addf %236, %346 : vector<16x32xf32>
    %c1_147 = arith.constant 1 : index
    %c0_148 = arith.constant 0 : index
    %c0_149 = arith.constant 0 : index
    %348 = vector.load %arg15[%c1_147, %c0_148, %c0_149] : memref<2x1x32xf32, #tpu.memory_space<vmem>>, vector<1x1x32xf32>
    %349 = vector.shape_cast %348 : vector<1x1x32xf32> to vector<1x32xf32>
    %350 = vector.broadcast %349 : vector<1x32xf32> to vector<16x32xf32>
    %351 = arith.addf %347, %350 : vector<16x32xf32>
    %c1_150 = arith.constant 1 : index
    %c0_151 = arith.constant 0 : index
    %c0_152 = arith.constant 0 : index
    %352 = vector.load %arg16[%c1_150, %c0_151, %c0_152] : memref<2x1x32xf32, #tpu.memory_space<vmem>>, vector<1x1x32xf32>
    %353 = vector.shape_cast %352 : vector<1x1x32xf32> to vector<1x32xf32>
    %c1_153 = arith.constant 1 : index
    %c0_154 = arith.constant 0 : index
    %c0_155 = arith.constant 0 : index
    %354 = vector.load %arg17[%c1_153, %c0_154, %c0_155] : memref<2x1x32xf32, #tpu.memory_space<vmem>>, vector<1x1x32xf32>
    %355 = vector.shape_cast %354 : vector<1x1x32xf32> to vector<1x32xf32>
    %cst_156 = arith.constant dense<0.000000e+00> : vector<16xf32>
    %356 = vector.multi_reduction <add>, %351, %cst_156 [1] : vector<16x32xf32> to vector<16xf32>
    %357 = vector.shape_cast %356 : vector<16xf32> to vector<16x1xf32>
    %cst_157 = arith.constant 3.200000e+01 : f32
    %358 = vector.broadcast %cst_157 : f32 to vector<16x1xf32>
    %359 = arith.divf %357, %358 : vector<16x1xf32>
    %360 = vector.broadcast %359 : vector<16x1xf32> to vector<16x32xf32>
    %361 = arith.subf %351, %360 : vector<16x32xf32>
    %362 = arith.mulf %361, %361 : vector<16x32xf32>
    %cst_158 = arith.constant dense<0.000000e+00> : vector<16xf32>
    %363 = vector.multi_reduction <add>, %362, %cst_158 [1] : vector<16x32xf32> to vector<16xf32>
    %364 = vector.shape_cast %363 : vector<16xf32> to vector<16x1xf32>
    %cst_159 = arith.constant 3.200000e+01 : f32
    %365 = vector.broadcast %cst_159 : f32 to vector<16x1xf32>
    %366 = arith.divf %364, %365 : vector<16x1xf32>
    %367 = vector.broadcast %359 : vector<16x1xf32> to vector<16x32xf32>
    %368 = arith.subf %351, %367 : vector<16x32xf32>
    %cst_160 = arith.constant 9.99999996E-13 : f32
    %369 = vector.broadcast %cst_160 : f32 to vector<16x1xf32>
    %370 = arith.addf %366, %369 : vector<16x1xf32>
    %371 = math.rsqrt %370 : vector<16x1xf32>
    %372 = vector.broadcast %371 : vector<16x1xf32> to vector<16x32xf32>
    %373 = arith.mulf %368, %372 : vector<16x32xf32>
    %374 = vector.broadcast %353 : vector<1x32xf32> to vector<16x32xf32>
    %375 = arith.mulf %373, %374 : vector<16x32xf32>
    %376 = vector.broadcast %355 : vector<1x32xf32> to vector<16x32xf32>
    %377 = arith.addf %375, %376 : vector<16x32xf32>
    %c1_161 = arith.constant 1 : index
    %c0_162 = arith.constant 0 : index
    %c0_163 = arith.constant 0 : index
    %378 = vector.load %arg18[%c1_161, %c0_162, %c0_163] : memref<2x32x128xf32, #tpu.memory_space<vmem>>, vector<1x32x128xf32>
    %379 = vector.shape_cast %378 : vector<1x32x128xf32> to vector<32x128xf32>
    %cst_164 = arith.constant dense<0.000000e+00> : vector<16x128xf32>
    %380 = tpu.matmul %377, %379, %cst_164 {dimension_numbers = #tpu.dot_dimension_numbers<[1], [0], [0], [1], [0, 0, 1, 1], [], []>} : vector<16x32xf32>, vector<32x128xf32>, vector<16x128xf32> -> vector<16x128xf32>
    %c1_165 = arith.constant 1 : index
    %c0_166 = arith.constant 0 : index
    %c0_167 = arith.constant 0 : index
    %381 = vector.load %arg19[%c1_165, %c0_166, %c0_167] : memref<2x1x128xf32, #tpu.memory_space<vmem>>, vector<1x1x128xf32>
    %382 = vector.shape_cast %381 : vector<1x1x128xf32> to vector<1x128xf32>
    %383 = vector.broadcast %382 : vector<1x128xf32> to vector<16x128xf32>
    %384 = arith.addf %380, %383 : vector<16x128xf32>
    %cst_168 = arith.constant 5.000000e-01 : f32
    %385 = vector.broadcast %cst_168 : f32 to vector<16x128xf32>
    %386 = arith.mulf %385, %384 : vector<16x128xf32>
    %cst_169 = arith.constant 0.707106769 : f32
    %387 = vector.broadcast %cst_169 : f32 to vector<16x128xf32>
    %388 = arith.mulf %384, %387 : vector<16x128xf32>
    %cst_170 = arith.constant 0.000000e+00 : f32
    %389 = vector.broadcast %cst_170 : f32 to vector<16x128xf32>
    %390 = arith.cmpf oge, %388, %389 : vector<16x128xf32>
    %cst_171 = arith.constant 1.000000e+00 : f32
    %cst_172 = arith.constant -1.000000e+00 : f32
    %391 = vector.broadcast %cst_171 : f32 to vector<16x128xf32>
    %392 = vector.broadcast %cst_172 : f32 to vector<16x128xf32>
    %393 = arith.select %390, %391, %392 : vector<16x128xi1>, vector<16x128xf32>
    %394 = math.absf %388 : vector<16x128xf32>
    %cst_173 = arith.constant 0.327591091 : f32
    %395 = vector.broadcast %cst_173 : f32 to vector<16x128xf32>
    %396 = arith.mulf %395, %394 : vector<16x128xf32>
    %cst_174 = arith.constant 1.000000e+00 : f32
    %397 = vector.broadcast %cst_174 : f32 to vector<16x128xf32>
    %398 = arith.addf %397, %396 : vector<16x128xf32>
    %cst_175 = arith.constant 1.000000e+00 : f32
    %399 = vector.broadcast %cst_175 : f32 to vector<16x128xf32>
    %400 = arith.divf %399, %398 : vector<16x128xf32>
    %cst_176 = arith.constant 1.06140542 : f32
    %401 = vector.broadcast %cst_176 : f32 to vector<16x128xf32>
    %402 = arith.mulf %401, %400 : vector<16x128xf32>
    %cst_177 = arith.constant -1.45315206 : f32
    %403 = vector.broadcast %cst_177 : f32 to vector<16x128xf32>
    %404 = arith.addf %402, %403 : vector<16x128xf32>
    %405 = arith.mulf %404, %400 : vector<16x128xf32>
    %cst_178 = arith.constant 1.42141378 : f32
    %406 = vector.broadcast %cst_178 : f32 to vector<16x128xf32>
    %407 = arith.addf %405, %406 : vector<16x128xf32>
    %408 = arith.mulf %407, %400 : vector<16x128xf32>
    %cst_179 = arith.constant -0.284496725 : f32
    %409 = vector.broadcast %cst_179 : f32 to vector<16x128xf32>
    %410 = arith.addf %408, %409 : vector<16x128xf32>
    %411 = arith.mulf %410, %400 : vector<16x128xf32>
    %cst_180 = arith.constant 0.254829586 : f32
    %412 = vector.broadcast %cst_180 : f32 to vector<16x128xf32>
    %413 = arith.addf %411, %412 : vector<16x128xf32>
    %414 = arith.mulf %413, %400 : vector<16x128xf32>
    %cst_181 = arith.constant 0.000000e+00 : f32
    %415 = vector.broadcast %cst_181 : f32 to vector<16x128xf32>
    %416 = arith.subf %415, %394 : vector<16x128xf32>
    %417 = arith.mulf %416, %394 : vector<16x128xf32>
    %418 = math.exp %417 : vector<16x128xf32>
    %419 = arith.mulf %414, %418 : vector<16x128xf32>
    %cst_182 = arith.constant 1.000000e+00 : f32
    %420 = vector.broadcast %cst_182 : f32 to vector<16x128xf32>
    %421 = arith.subf %420, %419 : vector<16x128xf32>
    %422 = arith.mulf %393, %421 : vector<16x128xf32>
    %cst_183 = arith.constant 1.000000e+00 : f32
    %423 = vector.broadcast %cst_183 : f32 to vector<16x128xf32>
    %424 = arith.addf %423, %422 : vector<16x128xf32>
    %425 = arith.mulf %386, %424 : vector<16x128xf32>
    %c1_184 = arith.constant 1 : index
    %c0_185 = arith.constant 0 : index
    %c0_186 = arith.constant 0 : index
    %426 = vector.load %arg20[%c1_184, %c0_185, %c0_186] : memref<2x128x32xf32, #tpu.memory_space<vmem>>, vector<1x128x32xf32>
    %427 = vector.shape_cast %426 : vector<1x128x32xf32> to vector<128x32xf32>
    %cst_187 = arith.constant dense<0.000000e+00> : vector<16x32xf32>
    %428 = tpu.matmul %425, %427, %cst_187 {dimension_numbers = #tpu.dot_dimension_numbers<[1], [0], [0], [1], [0, 0, 1, 1], [], []>} : vector<16x128xf32>, vector<128x32xf32>, vector<16x32xf32> -> vector<16x32xf32>
    %429 = arith.addf %351, %428 : vector<16x32xf32>
    %c1_188 = arith.constant 1 : index
    %c0_189 = arith.constant 0 : index
    %c0_190 = arith.constant 0 : index
    %430 = vector.load %arg21[%c1_188, %c0_189, %c0_190] : memref<2x1x32xf32, #tpu.memory_space<vmem>>, vector<1x1x32xf32>
    %431 = vector.shape_cast %430 : vector<1x1x32xf32> to vector<1x32xf32>
    %432 = vector.broadcast %431 : vector<1x32xf32> to vector<16x32xf32>
    %433 = arith.addf %429, %432 : vector<16x32xf32>
    %434 = vector.extract_strided_slice %433 {offsets = [0, 0], sizes = [1, 32], strides = [1, 1]} : vector<16x32xf32> to vector<1x32xf32>
    %c0_191 = arith.constant 0 : index
    %c0_192 = arith.constant 0 : index
    %435 = vector.load %arg22[%c0_191, %c0_192] : memref<1x32xf32, #tpu.memory_space<vmem>>, vector<1x32xf32>
    %c0_193 = arith.constant 0 : index
    %c0_194 = arith.constant 0 : index
    %436 = vector.load %arg23[%c0_193, %c0_194] : memref<1x32xf32, #tpu.memory_space<vmem>>, vector<1x32xf32>
    %cst_195 = arith.constant dense<0.000000e+00> : vector<1xf32>
    %437 = vector.multi_reduction <add>, %434, %cst_195 [1] : vector<1x32xf32> to vector<1xf32>
    %438 = vector.shape_cast %437 : vector<1xf32> to vector<1x1xf32>
    %cst_196 = arith.constant 3.200000e+01 : f32
    %439 = vector.broadcast %cst_196 : f32 to vector<1x1xf32>
    %440 = arith.divf %438, %439 : vector<1x1xf32>
    %441 = vector.broadcast %440 : vector<1x1xf32> to vector<1x32xf32>
    %442 = arith.subf %434, %441 : vector<1x32xf32>
    %443 = arith.mulf %442, %442 : vector<1x32xf32>
    %cst_197 = arith.constant dense<0.000000e+00> : vector<1xf32>
    %444 = vector.multi_reduction <add>, %443, %cst_197 [1] : vector<1x32xf32> to vector<1xf32>
    %445 = vector.shape_cast %444 : vector<1xf32> to vector<1x1xf32>
    %cst_198 = arith.constant 3.200000e+01 : f32
    %446 = vector.broadcast %cst_198 : f32 to vector<1x1xf32>
    %447 = arith.divf %445, %446 : vector<1x1xf32>
    %448 = vector.broadcast %440 : vector<1x1xf32> to vector<1x32xf32>
    %449 = arith.subf %434, %448 : vector<1x32xf32>
    %cst_199 = arith.constant 9.99999996E-13 : f32
    %450 = vector.broadcast %cst_199 : f32 to vector<1x1xf32>
    %451 = arith.addf %447, %450 : vector<1x1xf32>
    %452 = math.rsqrt %451 : vector<1x1xf32>
    %453 = vector.broadcast %452 : vector<1x1xf32> to vector<1x32xf32>
    %454 = arith.mulf %449, %453 : vector<1x32xf32>
    %455 = arith.mulf %454, %435 : vector<1x32xf32>
    %456 = arith.addf %455, %436 : vector<1x32xf32>
    %c0_200 = arith.constant 0 : index
    %c0_201 = arith.constant 0 : index
    %457 = vector.load %arg24[%c0_200, %c0_201] : memref<32x32xf32, #tpu.memory_space<vmem>>, vector<32x32xf32>
    %cst_202 = arith.constant dense<0.000000e+00> : vector<1x32xf32>
    %458 = tpu.matmul %456, %457, %cst_202 {dimension_numbers = #tpu.dot_dimension_numbers<[1], [0], [0], [1], [0, 0, 1, 1], [], []>} : vector<1x32xf32>, vector<32x32xf32>, vector<1x32xf32> -> vector<1x32xf32>
    %c0_203 = arith.constant 0 : index
    %c0_204 = arith.constant 0 : index
    %459 = vector.load %arg25[%c0_203, %c0_204] : memref<1x32xf32, #tpu.memory_space<vmem>>, vector<1x32xf32>
    %460 = arith.addf %458, %459 : vector<1x32xf32>
    %461 = math.tanh %460 : vector<1x32xf32>
    %c0_205 = arith.constant 0 : index
    %c0_206 = arith.constant 0 : index
    %462 = vector.load %arg26[%c0_205, %c0_206] : memref<32x512xf32, #tpu.memory_space<vmem>>, vector<32x512xf32>
    %cst_207 = arith.constant dense<0.000000e+00> : vector<1x512xf32>
    %463 = tpu.matmul %461, %462, %cst_207 {dimension_numbers = #tpu.dot_dimension_numbers<[1], [0], [0], [1], [0, 0, 1, 1], [], []>} : vector<1x32xf32>, vector<32x512xf32>, vector<1x512xf32> -> vector<1x512xf32>
    %c0_208 = arith.constant 0 : index
    %c0_209 = arith.constant 0 : index
    %464 = vector.load %arg27[%c0_208, %c0_209] : memref<1x512xf32, #tpu.memory_space<vmem>>, vector<1x512xf32>
    %465 = arith.addf %463, %464 : vector<1x512xf32>
    %cst_210 = arith.constant 0.000000e+00 : f32
    %466 = vector.broadcast %cst_210 : f32 to vector<1x512xf32>
    %467 = arith.maximumf %465, %466 : vector<1x512xf32>
    %c0_211 = arith.constant 0 : index
    %c0_212 = arith.constant 0 : index
    %468 = vector.load %arg28[%c0_211, %c0_212] : memref<512x2xf32, #tpu.memory_space<vmem>>, vector<512x2xf32>
    %cst_213 = arith.constant dense<0.000000e+00> : vector<1x2xf32>
    %469 = tpu.matmul %467, %468, %cst_213 {dimension_numbers = #tpu.dot_dimension_numbers<[1], [0], [0], [1], [0, 0, 1, 1], [], []>} : vector<1x512xf32>, vector<512x2xf32>, vector<1x2xf32> -> vector<1x2xf32>
    %c0_214 = arith.constant 0 : index
    %c0_215 = arith.constant 0 : index
    %470 = vector.load %arg29[%c0_214, %c0_215] : memref<1x2xf32, #tpu.memory_space<vmem>>, vector<1x2xf32>
    %471 = arith.addf %469, %470 : vector<1x2xf32>
    %c0_216 = arith.constant 0 : index
    %c0_217 = arith.constant 0 : index
    %c0_218 = arith.constant 0 : index
    %472 = vector.load %arg30[%c0_216, %c0_217, %c0_218] : memref<1x1x2xf32, #tpu.memory_space<vmem>>, vector<1x1x2xf32>
    %473 = vector.shape_cast %472 : vector<1x1x2xf32> to vector<1x2xf32>
    %474 = vector.shape_cast %471 : vector<1x2xf32> to vector<1x1x2xf32>
    tpu.vector_store %arg30[%c0_216, %c0_217, %c0_218], %474 {strides = array<i32>} : memref<1x1x2xf32, #tpu.memory_space<vmem>>, vector<1x1x2xf32>,
    return
  }
  func.func @transform_0(%arg0: i32) -> (i32, i32, i32) {
    %c0_i32 = arith.constant 0 : i32
    %c0_i32_0 = arith.constant 0 : i32
    %c0_i32_1 = arith.constant 0 : i32
    return %arg0, %c0_i32, %c0_i32_0 : i32, i32, i32
  }
  func.func @transform_1(%arg0: i32) -> (i32, i32, i32) {
    %c0_i32 = arith.constant 0 : i32
    %c0_i32_0 = arith.constant 0 : i32
    %c0_i32_1 = arith.constant 0 : i32
    return %arg0, %c0_i32, %c0_i32_0 : i32, i32, i32
  }
  func.func @transform_2(%arg0: i32) -> (i32, i32, i32) {
    %c0_i32 = arith.constant 0 : i32
    %c0_i32_0 = arith.constant 0 : i32
    %c0_i32_1 = arith.constant 0 : i32
    return %arg0, %c0_i32, %c0_i32_0 : i32, i32, i32
  }
  func.func @transform_3(%arg0: i32) -> (i32, i32) {
    %c0_i32 = arith.constant 0 : i32
    %c0_i32_0 = arith.constant 0 : i32
    %c0_i32_1 = arith.constant 0 : i32
    return %c0_i32, %c0_i32_0 : i32, i32
  }
  func.func @transform_4(%arg0: i32) -> (i32, i32) {
    %c0_i32 = arith.constant 0 : i32
    %c0_i32_0 = arith.constant 0 : i32
    %c0_i32_1 = arith.constant 0 : i32
    return %c0_i32, %c0_i32_0 : i32, i32
  }
  func.func @transform_5(%arg0: i32) -> (i32, i32) {
    %c0_i32 = arith.constant 0 : i32
    %c0_i32_0 = arith.constant 0 : i32
    %c0_i32_1 = arith.constant 0 : i32
    return %c0_i32, %c0_i32_0 : i32, i32
  }
  func.func @transform_6(%arg0: i32) -> (i32, i32) {
    %c0_i32 = arith.constant 0 : i32
    %c0_i32_0 = arith.constant 0 : i32
    %c0_i32_1 = arith.constant 0 : i32
    return %c0_i32, %c0_i32_0 : i32, i32
  }
  func.func @transform_7(%arg0: i32) -> (i32, i32) {
    %c0_i32 = arith.constant 0 : i32
    %c0_i32_0 = arith.constant 0 : i32
    %c0_i32_1 = arith.constant 0 : i32
    return %c0_i32, %c0_i32_0 : i32, i32
  }
  func.func @transform_8(%arg0: i32) -> (i32, i32) {
    %c0_i32 = arith.constant 0 : i32
    %c0_i32_0 = arith.constant 0 : i32
    %c0_i32_1 = arith.constant 0 : i32
    return %c0_i32, %c0_i32_0 : i32, i32
  }
  func.func @transform_9(%arg0: i32) -> (i32, i32, i32) {
    %c0_i32 = arith.constant 0 : i32
    %c0_i32_0 = arith.constant 0 : i32
    %c0_i32_1 = arith.constant 0 : i32
    %c0_i32_2 = arith.constant 0 : i32
    return %c0_i32, %c0_i32_0, %c0_i32_1 : i32, i32, i32
  }
  func.func @transform_10(%arg0: i32) -> (i32, i32, i32) {
    %c0_i32 = arith.constant 0 : i32
    %c0_i32_0 = arith.constant 0 : i32
    %c0_i32_1 = arith.constant 0 : i32
    %c0_i32_2 = arith.constant 0 : i32
    return %c0_i32, %c0_i32_0, %c0_i32_1 : i32, i32, i32
  }
  func.func @transform_11(%arg0: i32) -> (i32, i32, i32) {
    %c0_i32 = arith.constant 0 : i32
    %c0_i32_0 = arith.constant 0 : i32
    %c0_i32_1 = arith.constant 0 : i32
    %c0_i32_2 = arith.constant 0 : i32
    return %c0_i32, %c0_i32_0, %c0_i32_1 : i32, i32, i32
  }
  func.func @transform_12(%arg0: i32) -> (i32, i32, i32) {
    %c0_i32 = arith.constant 0 : i32
    %c0_i32_0 = arith.constant 0 : i32
    %c0_i32_1 = arith.constant 0 : i32
    %c0_i32_2 = arith.constant 0 : i32
    return %c0_i32, %c0_i32_0, %c0_i32_1 : i32, i32, i32
  }
  func.func @transform_13(%arg0: i32) -> (i32, i32, i32) {
    %c0_i32 = arith.constant 0 : i32
    %c0_i32_0 = arith.constant 0 : i32
    %c0_i32_1 = arith.constant 0 : i32
    %c0_i32_2 = arith.constant 0 : i32
    return %c0_i32, %c0_i32_0, %c0_i32_1 : i32, i32, i32
  }
  func.func @transform_14(%arg0: i32) -> (i32, i32, i32) {
    %c0_i32 = arith.constant 0 : i32
    %c0_i32_0 = arith.constant 0 : i32
    %c0_i32_1 = arith.constant 0 : i32
    %c0_i32_2 = arith.constant 0 : i32
    return %c0_i32, %c0_i32_0, %c0_i32_1 : i32, i32, i32
  }
  func.func @transform_15(%arg0: i32) -> (i32, i32, i32) {
    %c0_i32 = arith.constant 0 : i32
    %c0_i32_0 = arith.constant 0 : i32
    %c0_i32_1 = arith.constant 0 : i32
    %c0_i32_2 = arith.constant 0 : i32
    return %c0_i32, %c0_i32_0, %c0_i32_1 : i32, i32, i32
  }
  func.func @transform_16(%arg0: i32) -> (i32, i32, i32) {
    %c0_i32 = arith.constant 0 : i32
    %c0_i32_0 = arith.constant 0 : i32
    %c0_i32_1 = arith.constant 0 : i32
    %c0_i32_2 = arith.constant 0 : i32
    return %c0_i32, %c0_i32_0, %c0_i32_1 : i32, i32, i32
  }
  func.func @transform_17(%arg0: i32) -> (i32, i32, i32) {
    %c0_i32 = arith.constant 0 : i32
    %c0_i32_0 = arith.constant 0 : i32
    %c0_i32_1 = arith.constant 0 : i32
    %c0_i32_2 = arith.constant 0 : i32
    return %c0_i32, %c0_i32_0, %c0_i32_1 : i32, i32, i32
  }
  func.func @transform_18(%arg0: i32) -> (i32, i32, i32) {
    %c0_i32 = arith.constant 0 : i32
    %c0_i32_0 = arith.constant 0 : i32
    %c0_i32_1 = arith.constant 0 : i32
    %c0_i32_2 = arith.constant 0 : i32
    return %c0_i32, %c0_i32_0, %c0_i32_1 : i32, i32, i32
  }
  func.func @transform_19(%arg0: i32) -> (i32, i32, i32) {
    %c0_i32 = arith.constant 0 : i32
    %c0_i32_0 = arith.constant 0 : i32
    %c0_i32_1 = arith.constant 0 : i32
    %c0_i32_2 = arith.constant 0 : i32
    return %c0_i32, %c0_i32_0, %c0_i32_1 : i32, i32, i32
  }
  func.func @transform_20(%arg0: i32) -> (i32, i32, i32) {
    %c0_i32 = arith.constant 0 : i32
    %c0_i32_0 = arith.constant 0 : i32
    %c0_i32_1 = arith.constant 0 : i32
    %c0_i32_2 = arith.constant 0 : i32
    return %c0_i32, %c0_i32_0, %c0_i32_1 : i32, i32, i32
  }
  func.func @transform_21(%arg0: i32) -> (i32, i32) {
    %c0_i32 = arith.constant 0 : i32
    %c0_i32_0 = arith.constant 0 : i32
    %c0_i32_1 = arith.constant 0 : i32
    return %c0_i32, %c0_i32_0 : i32, i32
  }
  func.func @transform_22(%arg0: i32) -> (i32, i32) {
    %c0_i32 = arith.constant 0 : i32
    %c0_i32_0 = arith.constant 0 : i32
    %c0_i32_1 = arith.constant 0 : i32
    return %c0_i32, %c0_i32_0 : i32, i32
  }
  func.func @transform_23(%arg0: i32) -> (i32, i32) {
    %c0_i32 = arith.constant 0 : i32
    %c0_i32_0 = arith.constant 0 : i32
    %c0_i32_1 = arith.constant 0 : i32
    return %c0_i32, %c0_i32_0 : i32, i32
  }
  func.func @transform_24(%arg0: i32) -> (i32, i32) {
    %c0_i32 = arith.constant 0 : i32
    %c0_i32_0 = arith.constant 0 : i32
    %c0_i32_1 = arith.constant 0 : i32
    return %c0_i32, %c0_i32_0 : i32, i32
  }
  func.func @transform_25(%arg0: i32) -> (i32, i32) {
    %c0_i32 = arith.constant 0 : i32
    %c0_i32_0 = arith.constant 0 : i32
    %c0_i32_1 = arith.constant 0 : i32
    return %c0_i32, %c0_i32_0 : i32, i32
  }
  func.func @transform_26(%arg0: i32) -> (i32, i32) {
    %c0_i32 = arith.constant 0 : i32
    %c0_i32_0 = arith.constant 0 : i32
    %c0_i32_1 = arith.constant 0 : i32
    return %c0_i32, %c0_i32_0 : i32, i32
  }
  func.func @transform_27(%arg0: i32) -> (i32, i32) {
    %c0_i32 = arith.constant 0 : i32
    %c0_i32_0 = arith.constant 0 : i32
    %c0_i32_1 = arith.constant 0 : i32
    return %c0_i32, %c0_i32_0 : i32, i32
  }
  func.func @transform_28(%arg0: i32) -> (i32, i32) {
    %c0_i32 = arith.constant 0 : i32
    %c0_i32_0 = arith.constant 0 : i32
    %c0_i32_1 = arith.constant 0 : i32
    return %c0_i32, %c0_i32_0 : i32, i32
  }
  func.func @transform_29(%arg0: i32) -> (i32, i32, i32) {
    %c0_i32 = arith.constant 0 : i32
    %c0_i32_0 = arith.constant 0 : i32
    %c0_i32_1 = arith.constant 0 : i32
    return %arg0, %c0_i32, %c0_i32_0 : i32, i32, i32
  }
}

</mosaic_0001>

<bundles_post_ra>
// kernel: vilt_fake_news_forward.1
= control target key start
LH: loop header
LB: loop body
LE: loop exit
PB: predicated region body
PF: predicated region fallthrough
CT: control target
= control target key end

     0   :  { %s5595_s6 = smov 1   ;;  %s5596_s10 = smov 2   ;;  %s6506_s0 = inlined_call_operand.smem [shape: u32[30], index: -1, kind: input, shape index: {}] }
   0x1   :  { %s5650_s5 = sld [smem:[%s6506_s0]]   ;;  %s5597_s14 = smov 3  }
   0x2   :  { %s5655_s9 = sld [smem:[%s6506_s0 + %s5595_s6]]   ;;  %s5598_s18 = smov 4  }
   0x3   :  { %s5660_s13 = sld [smem:[%s6506_s0 + %s5596_s10]]   ;;  %s5599_s22 = smov 5  }
   0x4   :  { %s5665_s17 = sld [smem:[%s6506_s0 + %s5597_s14]]   ;;  %s5600_s26 = smov 6  }
   0x5   :  { %s5670_s21 = sld [smem:[%s6506_s0 + %s5598_s18]]   ;;  %s5601_s30 = smov 7  }
   0x6   :  { %s5675_s25 = sld [smem:[%s6506_s0 + %s5599_s22]]   ;;  %s5602_s4 = smov 8  }
   0x7   :  { %6552 = sst [smem:[#allocation5_spill]] %s5650_s5  ;;  %s5603_s10 = smov 9  }
   0x8   :  { %6553 = sst [smem:[#allocation6_spill]] %s5655_s9  ;;  %s5604_s15 = smov 10  }
   0x9   :  { %6554 = sst [smem:[#allocation7_spill]] %s5660_s13  ;;  %s5605_s20 = smov 11  }
   0xa   :  { %6555 = sst [smem:[#allocation8_spill]] %s5665_s17  ;;  %s5607_s1 = smov 13  }
   0xb   :  { %s5680_s29 = sld [smem:[%s6506_s0 + %s5600_s26]]   ;;  %s5606_s26 = smov 12  }
   0xc   :  { %s5685_s3 = sld [smem:[%s6506_s0 + %s5601_s30]]   ;;  %s5608_s7 = smov 14  }
   0xd   :  { %s5690_s8 = sld [smem:[%s6506_s0 + %s5602_s4]]   ;;  %s5610_s22 = smov 16  }
   0xe   :  { %s5695_s14 = sld [smem:[%s6506_s0 + %s5603_s10]]   ;;  %s5611_s28 = smov 17  }
   0xf   :  { %s5700_s19 = sld [smem:[%s6506_s0 + %s5604_s15]]   ;;  %s5609_s15 = smov 15  }
  0x10   :  { %s5705_s24 = sld [smem:[%s6506_s0 + %s5605_s20]]  }
  0x11   :  { %s5710_s30 = sld [smem:[%s6506_s0 + %s5606_s26]]  }
  0x12   :  { %6556 = sst [smem:[#allocation9_spill]] %s5685_s3 }
  0x13   :  { %6557 = sst [smem:[#allocation10_spill]] %s5690_s8 }
  0x14   :  { %6558 = sst [smem:[#allocation11_spill]] %s5695_s14 }
  0x15   :  { %s5715_s6 = sld [smem:[%s6506_s0 + %s5607_s1]]  }
  0x16   :  { %s5720_s12 = sld [smem:[%s6506_s0 + %s5608_s7]]   ;;  %s5612_s7 = smov 18  }
  0x17   :  { %s5725_s20 = sld [smem:[%s6506_s0 + %s5609_s15]]   ;;  %s5613_s15 = smov 19  }
  0x18   :  { %s5730_s27 = sld [smem:[%s6506_s0 + %s5610_s22]]   ;;  %s5614_s22 = smov 20  }
  0x19   :  { %s5735_s4 = sld [smem:[%s6506_s0 + %s5611_s28]]   ;;  %s5615_s28 = smov 21  }
  0x1b   :  { %6559 = sst [smem:[#allocation12_spill]] %s5715_s6 }
  0x1c   :  { %6560 = sst [smem:[#allocation13_spill]] %s5720_s12 }
  0x1d   :  { %6561 = sst [smem:[#allocation14_spill]] %s5725_s20 }
  0x1e   :  { %6562 = sst [smem:[#allocation15_spill]] %s5730_s27 }
  0x1f   :  { %6563 = sst [smem:[#allocation16_spill]] %s5735_s4 }
  0x20   :  { %s5740_s12 = sld [smem:[%s6506_s0 + %s5612_s7]]   ;;  %s5616_s7 = smov 22  }
  0x21   :  { %s5745_s20 = sld [smem:[%s6506_s0 + %s5613_s15]]   ;;  %s5617_s15 = smov 23  }
  0x22   :  { %s5750_s27 = sld [smem:[%s6506_s0 + %s5614_s22]]   ;;  %s5618_s22 = smov 24  }
  0x23   :  { %s5755_s4 = sld [smem:[%s6506_s0 + %s5615_s28]]   ;;  %s5619_s28 = smov 25  }
  0x26   :  { %6564 = sst [smem:[#allocation17_spill]] %s5740_s12 }
  0x27   :  { %6565 = sst [smem:[#allocation18_spill]] %s5745_s20 }
  0x28   :  { %6566 = sst [smem:[#allocation19_spill]] %s5750_s27 }
  0x29   :  { %6567 = sst [smem:[#allocation20_spill]] %s5755_s4 }
  0x2a   :  { %s5760_s12 = sld [smem:[%s6506_s0 + %s5616_s7]]   ;;  %s5620_s7 = smov 26  }
  0x2b   :  { %s5765_s20 = sld [smem:[%s6506_s0 + %s5617_s15]]   ;;  %s5621_s15 = smov 27  }
  0x2c   :  { %s5770_s27 = sld [smem:[%s6506_s0 + %s5618_s22]]   ;;  %s5622_s22 = smov 28  }
  0x2d   :  { %s5775_s4 = sld [smem:[%s6506_s0 + %s5619_s28]]   ;;  %s5623_s28 = smov 29  }
  0x30   :  { %6568 = sst [smem:[#allocation21_spill]] %s5760_s12 }
  0x31   :  { %6569 = sst [smem:[#allocation22_spill]] %s5765_s20 }
  0x32   :  { %6570 = sst [smem:[#allocation23_spill]] %s5770_s27 }
  0x33   :  { %6571 = sst [smem:[#allocation24_spill]] %s5775_s4 }
  0x34   :  { %s5780_s12 = sld [smem:[%s6506_s0 + %s5620_s7]]  }
  0x35   :  { %s5785_s20 = sld [smem:[%s6506_s0 + %s5621_s15]]  }
  0x36   :  { %s5790_s27 = sld [smem:[%s6506_s0 + %s5622_s22]]  }
  0x37   :  { %s5795_s4 = sld [smem:[%s6506_s0 + %s5623_s28]]  }
  0x3a   :  { %6572 = sst [smem:[#allocation25_spill]] %s5780_s12 }
  0x3b   :  { %64 = vsyncpa [#allocation3], 0 }
  0x3c   :  { %66 = vsyncpa [#allocation3 + $0x1], 0  ;;  %s5797_s7 = smov 0   ;;  %s5799_s10 = smov 0  }
  0x3d   :  { %s5801_s11 = smov 0   ;;  %s5803_s15 = smov 0  }
  0x3e LB: > { %s6573_s6 = sld [smem:[#allocation12_spill]]  ;;  %s5818_s0 = sadd.s32 4294967295, %s5593_s15   ;;  %s5585_s10 = sphi %s5799_s10, %s6611_s10   ;;  %s5581_s7 = sphi %s5797_s7, %s6610_s7   ;;  %s5593_s15 = sphi %s5803_s15, %s6613_s15   ;;  %s5589_s11 = sphi %s5801_s11, %s6612_s11  }
  0x3f   : > { %s6574_s14 = sld [smem:[#allocation11_spill]]  ;;  %s4638_s16 = sadd.s32 4294967294, %s5593_s15  }
  0x40   : > { %s5822_s18 = sadd.s32 1, %s5593_s15   ;;  %s703_s22 = sadd.s32 1, %s5589_s11 }
  0x41   : > { %s700_s23 = ssub.s32 %s5593_s15, %s5822_s18  ;;  %p713_p0 = scmp.ne.s32.totalorder %s5589_s11, %s5585_s10 }
  0x42   : > { %p701_p1 = scmp.eq.s32.totalorder %s700_s23, 0  ;;  %p714_p2 = scmp.eq.s32.totalorder %s5818_s0, 1 }
  0x43   : > { %p719_p3 = scmp.ne.s32.totalorder %s5585_s10, %s5581_s7  ;;  %p720_p4 = scmp.eq.s32.totalorder %s4638_s16, 1 }
  0x44   : > { %s5833_s26 = scalar_select %p701_p1, %s5589_s11, %s703_s22  }
  0x45   : > { %p5835_p5 = por %p714_p2, %p713_p0  ;;  %p5839_p6 = por %p720_p4, %p719_p3 }
  0x46   : > { %p4641_p7 = scmp.ge.s32.totalorder %s5593_s15, 1  ;;  %p837_p8 = scmp.lt.s32.totalorder %s5593_s15, 3 }
  0x48   : > { %p838_p9 = pnand %p4641_p7, %p837_p8 }
  0x49   : > { %s6577_s5 = sld [smem:[#allocation5_spill]] (!%p838_p9)  ;;  %p919_p10 = scmp.lt.s32.totalorder (!%p838_p9), %s5818_s0, 1 }
  0x4a   : > { %841 = sbr.rel (%p838_p9) target bundleno = 8254 (0x203e), region = 136  ;;  %s6578_s9 = sld [smem:[#allocation6_spill]] (!%p838_p9) }
  0x4b   : > { %s6579_s3 = sld [smem:[#allocation9_spill]] (!%p838_p9) }
  0x4c   : > { %s6580_s17 = sld [smem:[#allocation8_spill]] (!%p838_p9) }
  0x4d   : > { %s6581_s8 = sld [smem:[#allocation10_spill]] (!%p838_p9) }
  0x4e   : > { %s6582_s13 = sld [smem:[#allocation7_spill]] (!%p838_p9) }
  0x4f   : > { %v1006_v0 = vld [vmem:[%s5680_s29 + $0xf8] sm:$0xff]  ;;  %v1005_v2 = vld [vmem:[%s5680_s29 + $0xf0] sm:$0xff]  ;;  %s5851_s2 = scalar_select %p919_p10, %s5818_s0, 1  ;;  %v1004_v4 = vld [vmem:[%s5680_s29 + $0xe8] sm:$0xff]  ;;  %vm935_vm0 = vcmask 261120   ;;  %vm1295_vm1 = vcmask 1040384  }
  0x50   : > { %v990_v1 = vld [vmem:[%s5680_s29 + $0x78] sm:$0xff]  ;;  %4766 = vmatprep.subr.mxu0 %v1006_v0  ;;  %v989_v3 = vld [vmem:[%s5680_s29 + $0x70] sm:$0xff]  ;;  %v988_v5 = vld [vmem:[%s5680_s29 + $0x68] sm:$0xff]  ;;  %vm1297_vm2 = vcmask 1044480   ;;  %vm1449_vm3 = vcmask 64512   ;;  %vm1535_vm4 = vcmask 130048  }
  0x51   : > { %4767 = vmatpush3.msra.mxu0 %v990_v1  ;;  %s4642_s16 = sshll.u32 %s5851_s2, 3  ;;  %v1003_v6 = vld [vmem:[%s5680_s29 + $0xe0] sm:$0xff]  ;;  %s5341_s23 = smul.u32 24, %s5851_s2  ;;  %v1002_v9 = vld [vmem:[%s5680_s29 + $0xd8] sm:$0xff]  ;;  %v1001_v12 = vld [vmem:[%s5680_s29 + $0xd0] sm:$0xff]  ;;  %vm2273_vm5 = vcmask 195584  }
  0x52   : > { %4768 = vmatprep.subr.mxu0 %v1005_v2  ;;  %s922_s22 = scalar_lea.vmem %s6577_s5, %s4642_s16  ;;  %v987_v7 = vld [vmem:[%s5680_s29 + $0x60] sm:$0xff]  ;;  %v986_v11 = vld [vmem:[%s5680_s29 + $0x58] sm:$0xff]  ;;  %v985_v13 = vld [vmem:[%s5680_s29 + $0x50] sm:$0xff]  ;;  %s6587_s5 = sld [smem:[#allocation18_spill]]  ;;  %vm4031_vm10 = vcmask 253952   ;;  %vm5640_vm11 = vmmov 0  }
  0x53   : > { %4769 = vmatpush3.msra.mxu0 %v989_v3  ;;  %v5860_v8 = vld [vmem:[%s922_s22] sm:$0xff]  ;;  %s5869_s16 = scalar_lea.vmem %s6578_s9, %s5341_s23  ;;  %v1000_v14 = vld [vmem:[%s5680_s29 + $0xc8] sm:$0xff]  ;;  %v1038_v16 = vld [vmem:[%s5680_s29 + $0x1f8] sm:$0xff]  ;;  %s6520_s22 = smov 96   ;;  %vm4518_vm12 = vcmask 8192  }
  0x54   : > { %4770 = vmatprep.subr.mxu0 %v1004_v4  ;;  %v936_v10 = vsel %vm935_vm0, %v5860_v8, 0.0  ;;  %v984_v15 = vld [vmem:[%s5680_s29 + $0x48] sm:$0xff]  ;;  %v1022_v17 = vld [vmem:[%s5680_s29 + $0x178] sm:$0xff]  ;;  %v999_v18 = vld [vmem:[%s5680_s29 + $0xc0] sm:$0xff]  ;;  %4801 = vmatprep.subr.mxu1 %v1038_v16  ;;  %s6015_s23 = scalar_lea.vmem %s6582_s13, %s5851_s2  ;;  %s6516_s2 = smov 88  }
  0x55   : > { %4771 = vmatpush3.msra.mxu0 %v988_v5  ;;  %937 = vadd.xlane.f32.xlu0 %v936_v10  ;;  %v5877_v19 = vld [vmem:[%s5869_s16] sm:$0xff]  ;;  %v1037_v20 = vld [vmem:[%s5680_s29 + $0x1f0] sm:$0xff]  ;;  %v998_v24 = vld [vmem:[%s5680_s29 + $0xb8] sm:$0xff]  ;;  %s6589_s9 = sld [smem:[#allocation19_spill]]  ;;  %s6590_s13 = smov 96  }
  0x56   : > { %4772 = vmatprep.subr.mxu0 %v1003_v6  ;;  %v983_v21 = vld [vmem:[%s5680_s29 + $0x40] sm:$0xff]  ;;  %4802 = vmatpush3.msra.mxu1 %v1022_v17  ;;  %v1075_v22 = vcombine.high %v5877_v19, %v5877_v19  ;;  %v1021_v23 = vld [vmem:[%s5680_s29 + $0x170] sm:$0xff]  ;;  %v1036_v25 = vld [vmem:[%s5680_s29 + $0x1e8] sm:$0xff]  ;;  %s6609_s12 = sld [smem:[#allocation25_spill]] }
  0x57   : > { %4773 = vmatpush3.msra.mxu0 %v987_v7  ;;  %4803 = vmatprep.subr.mxu1 %v1037_v20  ;;  %v982_v26 = vld [vmem:[%s5680_s29 + $0x38] sm:$0xff]  ;;  %v1020_v27 = vld [vmem:[%s5680_s29 + $0x168] sm:$0xff]  ;;  %v997_v28 = vld [vmem:[%s5680_s29 + $0xb0] sm:$0xff] }
  0x58   : > { %4774 = vmatprep.subr.mxu0 %v1002_v9  ;;  %1145 = vmatprep.mubr.f32.mxu0 %v1075_v22  ;;  %v1035_v29 = vld [vmem:[%s5680_s29 + $0x1e0] sm:$0xff]  ;;  %v981_v30 = vld [vmem:[%s5680_s29 + $0x30] sm:$0xff]  ;;  %v996_v32 = vld [vmem:[%s5680_s29 + $0xa8] sm:$0xff] }
  0x59   : > { %4775 = vmatpush3.msra.mxu0 %v986_v11  ;;  %4804 = vmatpush3.msra.mxu1 %v1021_v23  ;;  %v1019_v31 = vld [vmem:[%s5680_s29 + $0x160] sm:$0xff]  ;;  %v1034_v33 = vld [vmem:[%s5680_s29 + $0x1d8] sm:$0xff]  ;;  %v980_v34 = vld [vmem:[%s5680_s29 + $0x28] sm:$0xff] }
  0x5a   : > { %4776 = vmatprep.subr.mxu0 %v1001_v12  ;;  %4805 = vmatprep.subr.mxu1 %v1036_v25  ;;  %v1018_v35 = vld [vmem:[%s5680_s29 + $0x158] sm:$0xff]  ;;  %v995_v36 = vld [vmem:[%s5680_s29 + $0xa0] sm:$0xff]  ;;  %v1033_v37 = vld [vmem:[%s5680_s29 + $0x1d0] sm:$0xff] }
  0x5b   : > { %4777 = vmatpush3.msra.mxu0 %v985_v13  ;;  %4806 = vmatpush3.msra.mxu1 %v1020_v27  ;;  %v979_v38 = vld [vmem:[%s5680_s29 + $0x20] sm:$0xff]  ;;  %v1017_v39 = vld [vmem:[%s5680_s29 + $0x150] sm:$0xff]  ;;  %v994_v40 = vld [vmem:[%s5680_s29 + $0x98] sm:$0xff] }
  0x5c   : > { %4778 = vmatprep.subr.mxu0 %v1000_v14  ;;  %4807 = vmatprep.subr.mxu1 %v1035_v29  ;;  %v1032_v41 = vld [vmem:[%s5680_s29 + $0x1c8] sm:$0xff]  ;;  %v978_v42 = vld [vmem:[%s5680_s29 + $0x18] sm:$0xff]  ;;  %v993_v44 = vld [vmem:[%s5680_s29 + $0x90] sm:$0xff] }
  0x5d   : > { %4779 = vmatpush3.msra.mxu0 %v984_v15  ;;  %4808 = vmatpush3.msra.mxu1 %v1019_v31  ;;  %v1016_v43 = vld [vmem:[%s5680_s29 + $0x148] sm:$0xff]  ;;  %v1031_v45 = vld [vmem:[%s5680_s29 + $0x1c0] sm:$0xff]  ;;  %v977_v46 = vld [vmem:[%s5680_s29 + $0x10] sm:$0xff] }
  0x5e   : > { %4780 = vmatprep.subr.mxu0 %v999_v18  ;;  %4809 = vmatprep.subr.mxu1 %v1034_v33  ;;  %v1015_v47 = vld [vmem:[%s5680_s29 + $0x140] sm:$0xff]  ;;  %v992_v48 = vld [vmem:[%s5680_s29 + $0x88] sm:$0xff]  ;;  %v1030_v49 = vld [vmem:[%s5680_s29 + $0x1b8] sm:$0xff] }
  0x5f   : > { %4781 = vmatpush3.msra.mxu0 %v983_v21  ;;  %4810 = vmatpush3.msra.mxu1 %v1018_v35  ;;  %v976_v50 = vld [vmem:[%s5680_s29 + $0x8] sm:$0xff]  ;;  %v1014_v51 = vld [vmem:[%s5680_s29 + $0x138] sm:$0xff]  ;;  %v991_v52 = vld [vmem:[%s5680_s29 + $0x80] sm:$0xff] }
  0x60   : > { %4782 = vmatprep.subr.mxu0 %v998_v24  ;;  %4811 = vmatprep.subr.mxu1 %v1033_v37  ;;  %v1029_v53 = vld [vmem:[%s5680_s29 + $0x1b0] sm:$0xff]  ;;  %v975_v54 = vld [vmem:[%s5680_s29] sm:$0xff]  ;;  %v1070_v56 = vld [vmem:[%s5680_s29 + $0x2f8] sm:$0xff] }
  0x61   : > { %4783 = vmatpush3.msra.mxu0 %v982_v26  ;;  %4812 = vmatpush3.msra.mxu1 %v1017_v39  ;;  %v1013_v55 = vld [vmem:[%s5680_s29 + $0x130] sm:$0xff]  ;;  %v1054_v57 = vld [vmem:[%s5680_s29 + $0x278] sm:$0xff]  ;;  %v1028_v58 = vld [vmem:[%s5680_s29 + $0x1a8] sm:$0xff] }
  0x62   : > { %4784 = vmatprep.subr.mxu0 %v997_v28  ;;  %4813 = vmatprep.subr.mxu1 %v1032_v41  ;;  %v1069_v59 = vld [vmem:[%s5680_s29 + $0x2f0] sm:$0xff]  ;;  %v1012_v60 = vld [vmem:[%s5680_s29 + $0x128] sm:$0xff]  ;;  %v1027_v62 = vld [vmem:[%s5680_s29 + $0x1a0] sm:$0xff] }
  0x63   : > { %4785 = vmatpush3.msra.mxu0 %v981_v30  ;;  %4814 = vmatpush3.msra.mxu1 %v1016_v43  ;;  %v1053_v61 = vld [vmem:[%s5680_s29 + $0x270] sm:$0xff]  ;;  %v1068_v63 = vld [vmem:[%s5680_s29 + $0x2e8] sm:$0xff]  ;;  %v1011_v0 = vld [vmem:[%s5680_s29 + $0x120] sm:$0xff] }
  0x64   : > { %4786 = vmatprep.subr.mxu0 %v996_v32  ;;  %4815 = vmatprep.subr.mxu1 %v1031_v45  ;;  %v1052_v1 = vld [vmem:[%s5680_s29 + $0x268] sm:$0xff]  ;;  %v1026_v2 = vld [vmem:[%s5680_s29 + $0x198] sm:$0xff]  ;;  %v1067_v3 = vld [vmem:[%s5680_s29 + $0x2e0] sm:$0xff] }
  0x65   : > { %4787 = vmatpush3.msra.mxu0 %v980_v34  ;;  %4816 = vmatpush3.msra.mxu1 %v1015_v47  ;;  %v1010_v4 = vld [vmem:[%s5680_s29 + $0x118] sm:$0xff]  ;;  %v1051_v5 = vld [vmem:[%s5680_s29 + $0x260] sm:$0xff]  ;;  %v1025_v6 = vld [vmem:[%s5680_s29 + $0x190] sm:$0xff] }
  0x66   : > { %4788 = vmatprep.subr.mxu0 %v995_v36  ;;  %4817 = vmatprep.subr.mxu1 %v1030_v49  ;;  %v1066_v7 = vld [vmem:[%s5680_s29 + $0x2d8] sm:$0xff]  ;;  %v1009_v9 = vld [vmem:[%s5680_s29 + $0x110] sm:$0xff]  ;;  %v1024_v11 = vld [vmem:[%s5680_s29 + $0x188] sm:$0xff] }
  0x67   : > { %4789 = vmatpush3.msra.mxu0 %v979_v38  ;;  %4818 = vmatpush3.msra.mxu1 %v1014_v51  ;;  %v1050_v10 = vld [vmem:[%s5680_s29 + $0x258] sm:$0xff]  ;;  %v973_v12 = vld [vmem:[%s5869_s16 + $0x8] sm:$0xff]  ;;  %v1065_v13 = vld [vmem:[%s5680_s29 + $0x2d0] sm:$0xff] }
  0x68   : > { %4790 = vmatprep.subr.mxu0 %v994_v40  ;;  %4819 = vmatprep.subr.mxu1 %v1029_v53  ;;  %v1008_v14 = vld [vmem:[%s5680_s29 + $0x108] sm:$0xff]  ;;  %v1049_v15 = vld [vmem:[%s5680_s29 + $0x250] sm:$0xff]  ;;  %v1023_v16 = vld [vmem:[%s5680_s29 + $0x180] sm:$0xff]  ;;  %v1076_v20 = vcombine.high %v973_v12, %v973_v12 }
  0x69   : > { %4791 = vmatpush3.msra.mxu0 %v978_v42  ;;  %4820 = vmatpush3.msra.mxu1 %v1013_v55  ;;  %v974_v17 = vld [vmem:[%s5869_s16 + $0x10] sm:$0xff]  ;;  %v1064_v18 = vld [vmem:[%s5680_s29 + $0x2c8] sm:$0xff]  ;;  %v1063_v22 = vld [vmem:[%s5680_s29 + $0x2c0] sm:$0xff]  ;;  %s6518_s16 = smov 64  }
  0x6a   : > { %4792 = vmatprep.subr.mxu0 %v993_v44  ;;  %4821 = vmatprep.subr.mxu1 %v1028_v58  ;;  %v1048_v21 = vld [vmem:[%s5680_s29 + $0x248] sm:$0xff]  ;;  %v1077_v23 = vcombine.high %v974_v17, %v974_v17  ;;  %v1047_v24 = vld [vmem:[%s5680_s29 + $0x240] sm:$0xff]  ;;  %v1062_v25 = vld [vmem:[%s5680_s29 + $0x2b8] sm:$0xff] }
  0x6b   : > { %4793 = vmatpush3.msra.mxu0 %v977_v46  ;;  %4822 = vmatpush3.msra.mxu1 %v1012_v60  ;;  %v1046_v26 = vld [vmem:[%s5680_s29 + $0x238] sm:$0xff]  ;;  %v1061_v27 = vld [vmem:[%s5680_s29 + $0x2b0] sm:$0xff]  ;;  %v1060_v29 = vld [vmem:[%s5680_s29 + $0x2a8] sm:$0xff] }
  0x6c   : > { %4794 = vmatprep.subr.mxu0 %v992_v48  ;;  %4823 = vmatprep.subr.mxu1 %v1027_v62  ;;  %v1045_v28 = vld [vmem:[%s5680_s29 + $0x230] sm:$0xff]  ;;  %v1044_v30 = vld [vmem:[%s5680_s29 + $0x228] sm:$0xff]  ;;  %v1059_v31 = vld [vmem:[%s5680_s29 + $0x2a0] sm:$0xff] }
  0x6d   : > { %4795 = vmatpush3.msra.mxu0 %v976_v50  ;;  %4824 = vmatpush3.msra.mxu1 %v1011_v0  ;;  %v1043_v32 = vld [vmem:[%s5680_s29 + $0x220] sm:$0xff]  ;;  %v1058_v33 = vld [vmem:[%s5680_s29 + $0x298] sm:$0xff]  ;;  %v1057_v35 = vld [vmem:[%s5680_s29 + $0x290] sm:$0xff] }
  0x6e   : > { %4796 = vmatprep.subr.mxu0 %v991_v52  ;;  %4825 = vmatprep.subr.mxu1 %v1026_v2  ;;  %v1042_v34 = vld [vmem:[%s5680_s29 + $0x218] sm:$0xff]  ;;  %v1041_v36 = vld [vmem:[%s5680_s29 + $0x210] sm:$0xff]  ;;  %v1056_v37 = vld [vmem:[%s5680_s29 + $0x288] sm:$0xff] }
  0x6f   : > { %4797 = vmatpush3.msra.mxu0 %v975_v54  ;;  %4826 = vmatpush3.msra.mxu1 %v1010_v4  ;;  %v1040_v38 = vld [vmem:[%s5680_s29 + $0x208] sm:$0xff]  ;;  %v1055_v39 = vld [vmem:[%s5680_s29 + $0x280] sm:$0xff] }
  0x70   : > { %4836 = vmatprep.subr.mxu0 %v1070_v56  ;;  %1146 = vmatmul.mubr.f32.vlgmr.msra.gmra.mxu0 %v5877_v19  ;;  %v1007_v19 = vld [vmem:[%s5680_s29 + $0x100] sm:$0xff] }
  0x71   : > { %4837 = vmatpush3.msra.mxu0 %v1054_v57  ;;  %4827 = vmatprep.subr.mxu1 %v1025_v6  ;;  %v1039_v40 = vld [vmem:[%s5680_s29 + $0x200] sm:$0xff] }
  0x72   : > { %4838 = vmatprep.subr.mxu0 %v1069_v59  ;;  %4828 = vmatpush3.msra.mxu1 %v1009_v9  ;;  %v1071_v53 = vld [vmem:[%s6579_s3] sm:$0xf]  ;;  %s6528_s3 = smov 104  }
  0x73   : > { %4839 = vmatpush3.msra.mxu0 %v1053_v61  ;;  %4829 = vmatprep.subr.mxu1 %v1024_v11  ;;  %v4644_v62 = vld [vmem:[%s6580_s17] ss:$0 sm:$0xff]  ;;  %s6595_s17 = smov 112  }
  0x74   : > { %4840 = vmatprep.subr.mxu0 %v1068_v63  ;;  %4830 = vmatpush3.msra.mxu1 %v1008_v14  ;;  %v4645_v0 = vld [vmem:[%s5670_s21] ss:$0 sm:$0xff] }
  0x75   : > { %4841 = vmatpush3.msra.mxu0 %v1052_v1  ;;  %4831 = vmatprep.subr.mxu1 %v1023_v16  ;;  %v1291_v4 = vld [vmem:[%s6581_s8] sm:$0x1]  ;;  %s6588_s8 = sld [smem:[#allocation17_spill]] }
  0x76   : > { %4842 = vmatprep.subr.mxu0 %v1067_v3  ;;  %4832 = vmatpush3.msra.mxu1 %v1007_v19  ;;  %v4646_v3 = vld [vmem:[%s5675_s25] ss:$0 sm:$0xff] }
  0x77   : > { %4843 = vmatpush3.msra.mxu0 %v1051_v5  ;;  %1215 = vmatprep.mubr.f32.mxu1 %v1076_v20 }
  0x78   : > { %4844 = vmatprep.subr.mxu0 %v1066_v7  ;;  %1216 = vmatmul.mubr.f32.vlgmr.msra.gmra.mxu1 %v973_v12 }
  0x79   : > { %4845 = vmatpush3.msra.mxu0 %v1050_v10  ;;  %1285 = vmatprep.mubr.f32.mxu0 %v1077_v23  ;;  %v1345_v23 = vld [vmem:[%s5705_s24 + $0x10] sm:$0xff] }
  0x7a   : > { %4846 = vmatprep.subr.mxu0 %v1065_v13 }
  0x7b   : > { %4847 = vmatpush3.msra.mxu0 %v1049_v15 }
  0x7c   : > { %4848 = vmatprep.subr.mxu0 %v1064_v18 }
  0x7d   : > { %4849 = vmatpush3.msra.mxu0 %v1048_v21 }
  0x7e   : > { %4850 = vmatprep.subr.mxu0 %v1063_v22  ;;  %v1346_v22 = vld [vmem:[%s5705_s24 + $0x18] sm:$0xff] }
  0x7f   : > { %4851 = vmatpush3.msra.mxu0 %v1047_v24  ;;  %5082 = vmatprep.subr.mxu1 %v1346_v22  ;;  %v1344_v24 = vld [vmem:[%s5705_s24 + $0x8] sm:$0xff] }
  0x80   : > { %4852 = vmatprep.subr.mxu0 %v1062_v25  ;;  %5083 = vmatpush3.msra.mxu1 %v1346_v22  ;;  %v1343_v25 = vld [vmem:[%s5705_s24] sm:$0xff] }
  0x81   : > { %4853 = vmatpush3.msra.mxu0 %v1046_v26  ;;  %5084 = vmatprep.subr.mxu1 %v1345_v23 }
  0x82   : > { %4854 = vmatprep.subr.mxu0 %v1061_v27  ;;  %5085 = vmatpush3.msra.mxu1 %v1345_v23 }
  0x83   : > { %4855 = vmatpush3.msra.mxu0 %v1045_v28  ;;  %5086 = vmatprep.subr.mxu1 %v1344_v24 }
  0x84   : > { %4856 = vmatprep.subr.mxu0 %v1060_v29  ;;  %5087 = vmatpush3.msra.mxu1 %v1344_v24 }
  0x85   : > { %4857 = vmatpush3.msra.mxu0 %v1044_v30  ;;  %5088 = vmatprep.subr.mxu1 %v1343_v25 }
  0x86   : > { %4858 = vmatprep.subr.mxu0 %v1059_v31  ;;  %5089 = vmatpush3.msra.mxu1 %v1343_v25 }
  0x87   : > { %4859 = vmatpush3.msra.mxu0 %v1043_v32 }
  0x88   : > { %4860 = vmatprep.subr.mxu0 %v1058_v33  ;;  %v4647_v33 = vld [vmem:[%s6574_s14] ss:$0 sm:$0xff] }
  0x89   : > { %4861 = vmatpush3.msra.mxu0 %v1042_v34 }
  0x8a   : > { %4862 = vmatprep.subr.mxu0 %v1057_v35  ;;  %v4648_v35 = vld [vmem:[%s5700_s19] ss:$0 sm:$0xff] }
  0x8b   : > { %4863 = vmatpush3.msra.mxu0 %v1041_v36 }
  0x8c   : > { %4864 = vmatprep.subr.mxu0 %v1056_v37 }
  0x8d   : > { %4865 = vmatpush3.msra.mxu0 %v1040_v38 }
  0x8e   : > { %4866 = vmatprep.subr.mxu0 %v1055_v39 }
  0x8f   : > { %4867 = vmatpush3.msra.mxu0 %v1039_v40 }
  0x90   : > { %1286 = vmatmul.mubr.f32.vlgmr.msra.gmra.mxu0 %v974_v17 }
  0xde   : > { %v938_v41 = vpop.xlane.xlu0 %937 }
  0xdf   : > { %v940_v42 = vmul.f32 0.03125, %v938_v41 }
  0xe1   : > { %v941_v43 = vsub.f32 %v5860_v8, %v940_v42  ;;  %v4649_v42 = vld [vmem:[%s5710_s30] ss:$0 sm:$0xff] }
  0xe3   : > { %v942_v44 = vmul.f32 %v941_v43, %v941_v43 }
  0xe5   : > { %v943_v45 = vsel %vm935_vm0, %v942_v44, 0.0 }
  0xe6   : > { %944 = vadd.xlane.f32.xlu0 %v943_v45 }
 0x130   : > { %v4798_v46 = vpop.f32.mrf.mxu0 }
 0x132   : > { %v4799_v49 = vpop.f32.mrf.mxu0 }
 0x133   : > { %v4800_v52 = vadd.f32 %v4799_v49, %v4798_v46 }
 0x135   : > { %v1148_v8 = vadd.f32 %v4800_v52, %v1071_v53 }
 0x138   : > { %v4833_v50 = vpop.f32.mrf.mxu1 }
 0x13a   : > { %v4834_v54 = vpop.f32.mrf.mxu1 }
 0x13b   : > { %v4835_v56 = vadd.f32 %v4834_v54, %v4833_v50 }
 0x13d   : > { %v1218_v58 = vadd.f32 %v4835_v56, %v1148_v8 }
 0x150   : > { %v4868_v55 = vpop.f32.mrf.mxu0 }
 0x152   : > { %v4869_v57 = vpop.f32.mrf.mxu0 }
 0x153   : > { %v4870_v59 = vadd.f32 %v4869_v57, %v4868_v55 }
 0x155   : > { %v1288_v60 = vadd.f32 %v4870_v59, %v1218_v58 }
 0x157   : > { %v1293_v1 = vrot.slane %v1288_v60, 7 }
 0x159   : > { %v1296_v7 = vsel %vm1295_vm1, %v1291_v4, %v1293_v1 }
 0x15a   : > { %v5974_v10 = vsel %vm1297_vm2, %v1296_v7, 0.0 }
 0x15b   : > { %v1304_v11 = vsel %vm935_vm0, %v5974_v10, 0.0 }
 0x16f   : > { %v945_v47 = vpop.xlane.xlu0 %944 }
 0x170   : > { %v946_v48 = vmul.f32 0.03125, %v945_v47 }
 0x172   : > { %v947_v51 = vadd.f32 1e-12, %v946_v48 }
 0x174   : > { %5430 = vrsqrt.f32 %v947_v51  ;;  %v6018_v51 = vld [vmem:[%s6015_s23] ss:$0 sm:$0xff] }
 0x181   : > { %v5431_v61 = vpop.eup %5430 }
 0x182   : > { %v949_v63 = vmul.f32 %v5431_v61, %v941_v43 }
 0x184   : > { %v956_v2 = vmul.f32 %v4644_v62, %v949_v63 }
 0x186   : > { %v963_v5 = vadd.f32 %v4645_v0, %v956_v2 }
 0x188   : > { %v5970_v6 = vadd.f32 %v4646_v3, %v963_v5 }
 0x18a   : > { %v1301_v9 = vsel %vm935_vm0, %v5970_v6, 0.0 }
 0x18b   : > { %1302 = vadd.xlane.f32.xlu1 %v1301_v9 }
 0x18f   : > { %1305 = vadd.xlane.f32.xlu1 %v1304_v11 }
 0x214   : > { %v1303_v12 = vpop.xlane.xlu1 %1302 }
 0x215   : > { %v1307_v13 = vmul.f32 0.03125, %v1303_v12 }
 0x217   : > { %v1309_v14 = vsub.f32 %v5970_v6, %v1307_v13 }
 0x218   : > { %v1306_v15 = vpop.xlane.xlu1 %1305 }
 0x219   : > { %v1308_v16 = vmul.f32 0.03125, %v1306_v15  ;;  %v1311_v17 = vmul.f32 %v1309_v14, %v1309_v14 }
 0x21b   : > { %v1310_v18 = vsub.f32 %v5974_v10, %v1308_v16  ;;  %v1313_v19 = vsel %vm935_vm0, %v1311_v17, 0.0 }
 0x21c   : > { %1314 = vadd.xlane.f32.xlu0 %v1313_v19 }
 0x21d   : > { %v1312_v20 = vmul.f32 %v1310_v18, %v1310_v18 }
 0x21f   : > { %v1316_v21 = vsel %vm935_vm0, %v1312_v20, 0.0 }
 0x220   : > { %1317 = vadd.xlane.f32.xlu1 %v1316_v21 }
 0x2a5   : > { %v1315_v26 = vpop.xlane.xlu0 %1314 }
 0x2a6   : > { %v1319_v27 = vmul.f32 0.03125, %v1315_v26 }
 0x2a8   : > { %v1321_v28 = vadd.f32 1e-12, %v1319_v27 }
 0x2a9   : > { %v1318_v29 = vpop.xlane.xlu1 %1317 }
 0x2aa   : > { %5432 = vrsqrt.f32 %v1321_v28  ;;  %v1320_v30 = vmul.f32 0.03125, %v1318_v29 }
 0x2ac   : > { %v1322_v31 = vadd.f32 1e-12, %v1320_v30 }
 0x2ae   : > { %5434 = vrsqrt.f32 %v1322_v31 }
 0x2b7   : > { %v5433_v32 = vpop.eup %5432 }
 0x2b8   : > { %v1325_v34 = vmul.f32 %v5433_v32, %v1309_v14 }
 0x2ba   : > { %v1333_v36 = vmul.f32 %v4647_v33, %v1325_v34 }
 0x2bb   : > { %v5435_v37 = vpop.eup %5434 }
 0x2bc   : > { %v1326_v38 = vmul.f32 %v5435_v37, %v1310_v18  ;;  %v1341_v39 = vadd.f32 %v4648_v35, %v1333_v36 }
 0x2be   : > { %v1334_v40 = vmul.f32 %v4647_v33, %v1326_v38  ;;  %5090 = vmatprep.mubr.msk.f32.mxu1 %vm935_vm0, %v1341_v39 }
 0x2c0   : > { %v1342_v41 = vadd.f32 %v4648_v35, %v1334_v40 }
 0x2c2   : > { %5091 = vmatmul.mubr.msk.f32.vlgmr.msra.gmra.mxu1 %vm935_vm0, %v1342_v41 }
 0x382   : > { %v5092_v43 = vpop.f32.mrf.mxu1 }
 0x383   : > { %v5991_v44 = vadd.f32 %v5092_v43, %v4649_v42 }
 0x384   : > { %v1426_v45 = vpop.f32.mrf.mxu1 }
 0x385   : > { %v5993_v46 = vadd.f32 %v4649_v42, %v1426_v45  ;;  %1447 = vrot.lane.b32.xlu0 %v5991_v44, %s6520_s22  ;;  %v6009_v50 = vmul.f32 0.35355338, %v5991_v44 }
 0x387   : > { %1445 = vrot.lane.b32.xlu1 %v5993_v46, %s6520_s22  ;;  %v6000_v47 = vmul.f32 0.35355338, %v5993_v46  ;;  %s6522_s22 = smov 112  }
 0x389   : > { %5097 = vmatprep.mubr.msk.f32.mxu1 %vm1449_vm3, %v6000_v47 }
 0x3f7   : > { %v1448_v48 = vpop.permute.xlu0 %1447 }
 0x3f8   : > { %5093 = vmatprep.subr.msk.mxu1 %vm1449_vm3, %v1448_v48 }
 0x3f9   : > { %5094 = vmatpush3.xpose.msk.msra.mxu1 %vm1449_vm3, %v1448_v48  ;;  %v1446_v49 = vpop.permute.xlu1 %1445 }
 0x3fa   : > { %5095 = vmatprep.subr.msk.mxu1 %vm1449_vm3, %v1446_v49 }
 0x3fd   : > { %5096 = vmatpush3.xpose.msk.msra.mxu1 %vm1449_vm3, %v1446_v49 }
 0x400   : > { %5098 = vmatmul.mubr.msk.f32.vlgmr.msra.gmra.mxu1 %vm1449_vm3, %v6009_v50 }
 0x4c0   : > { %v5099_v52 = vpop.f32.mrf.mxu1 }
 0x4c1   : > { %v1532_v53 = vadd.f32 %v5099_v52, %v6018_v51 }
 0x4c2   : > { %v1526_v54 = vpop.f32.mrf.mxu1 }
 0x4c3   : > { %v1527_v55 = vadd.f32 %v6018_v51, %v1526_v54  ;;  %v1539_v8 = vsel %vm1535_vm4, %v1532_v53, -inf }
 0x4c4   : > { %1540 = vmax.xlane.f32.xlu0 %v1539_v8 }
 0x4c5   : > { %v1536_v56 = vsel %vm1535_vm4, %v1527_v55, -inf }
 0x4c6   : > { %1537 = vmax.xlane.f32.xlu1 %v1536_v56 }
 0x4d7   : > { %1558 = vrot.lane.b32.xlu1 %v5993_v46, %s6518_s16 }
 0x4da   : > { %1560 = vrot.lane.b32.xlu0 %v5991_v44, %s6518_s16  ;;  %s6524_s16 = smov 80  }
 0x4db   : > { %1651 = vrot.lane.b32.xlu1 %v5991_v44, %s6516_s2 }
 0x4df   : > { %1649 = vrot.lane.b32.xlu1 %v5993_v46, %s6516_s2  ;;  %s6526_s2 = smov 120  }
 0x54d   : > { %v1541_v57 = vpop.xlane.xlu0 %1540 }
 0x54e   : > { %v1543_v58 = vsub.f32 %v1532_v53, %v1541_v57 }
 0x54f   : > { %v1538_v59 = vpop.xlane.xlu1 %1537 }
 0x550   : > { %v1546_v60 = vmul.f32 1.442695, %v1543_v58  ;;  %v1542_v61 = vsub.f32 %v1527_v55, %v1538_v59 }
 0x551   : > { %v1561_v62 = vpop.permute.xlu0 %1560 }
 0x552   : > { %5436 = vpow2.f32 %v1546_v60  ;;  %v1544_v63 = vmul.f32 1.442695, %v1542_v61  ;;  %5100 = vmatprep.subr.mxu1 %v1561_v62 }
 0x553   : > { %5101 = vmatpush3.msra.mxu1 %v1561_v62  ;;  %v1559_v0 = vpop.permute.xlu1 %1558 }
 0x554   : > { %5438 = vpow2.f32 %v1544_v63  ;;  %5102 = vmatprep.subr.mxu1 %v1559_v0 }
 0x555   : > { %5103 = vmatpush3.msra.mxu1 %v1559_v0 }
 0x557   : > { %v1652_v1 = vpop.permute.xlu1 %1651 }
 0x558   : > { %5107 = vmatprep.subr.msk.mxu1 %vm1449_vm3, %v1652_v1 }
 0x55b   : > { %v1650_v7 = vpop.permute.xlu1 %1649 }
 0x55f   : > { %v5437_v2 = vpop.eup %5436 }
 0x560   : > { %v1551_v3 = vsel %vm1535_vm4, %v5437_v2, 0.0 }
 0x561   : > { %v5439_v4 = vpop.eup %5438  ;;  %1552 = vadd.xlane.f32.xlu1 %v1551_v3 }
 0x562   : > { %v1548_v5 = vsel %vm1535_vm4, %v5439_v4, 0.0 }
 0x563   : > { %1549 = vadd.xlane.f32.xlu0 %v1548_v5 }
 0x572   : > { %1645 = vrot.lane.b32.xlu1 %v6000_v47, %s6526_s2 }
 0x576   : > { %1849 = vrot.lane.b32.xlu1 %v5993_v46, %s6524_s16 }
 0x579   : > { %1851 = vrot.lane.b32.xlu0 %v5991_v44, %s6524_s16  ;;  %s6532_s16 = smov 48  }
 0x57a   : > { %1847 = vrot.lane.b32.xlu1 %v6009_v50, %s6522_s22 }
 0x57d   : > { %1647 = vrot.lane.b32.xlu0 %v6009_v50, %s6526_s2  ;;  %s6530_s2 = smov 72  }
 0x581   : > { %1845 = vrot.lane.b32.xlu0 %v6000_v47, %s6522_s22  ;;  %s6542_s22 = smov 56  }
 0x5ea   : > { %v1553_v9 = vpop.xlane.xlu1 %1552 }
 0x5eb   : > { %5440 = vrcp.f32 %v1553_v9 }
 0x5ec   : > { %v1550_v11 = vpop.xlane.xlu0 %1549 }
 0x5ed   : > { %5442 = vrcp.f32 %v1550_v11 }
 0x5ee   : > { %v1646_v12 = vpop.permute.xlu1 %1645 }
 0x5f0   : > { %v1852_v13 = vpop.permute.xlu0 %1851 }
 0x5f1   : > { %5121 = vmatprep.subr.msk.mxu0 %vm1449_vm3, %v1852_v13 }
 0x5f2   : > { %5122 = vmatpush3.xpose.msk.msra.mxu0 %vm1449_vm3, %v1852_v13  ;;  %v1850_v14 = vpop.permute.xlu1 %1849 }
 0x5f3   : > { %5123 = vmatprep.subr.msk.mxu0 %vm1449_vm3, %v1850_v14 }
 0x5f4   : > { %v1648_v15 = vpop.permute.xlu0 %1647 }
 0x5f6   : > { %5124 = vmatpush3.xpose.msk.msra.mxu0 %vm1449_vm3, %v1850_v14  ;;  %v1848_v18 = vpop.permute.xlu1 %1847 }
 0x5f8   : > { %v1846_v16 = vpop.permute.xlu0 %1845  ;;  %v5441_v17 = vpop.eup %5440 }
 0x5f9   : > { %5125 = vmatprep.mubr.msk.f32.mxu0 %vm1449_vm3, %v1846_v16  ;;  %v1557_v21 = vmul.f32 %v5441_v17, %v5437_v2 }
 0x5fa   : > { %v5443_v19 = vpop.eup %5442  ;;  %5126 = vmatmul.mubr.msk.f32.vlgmr.msra.gmra.mxu0 %vm1449_vm3, %v1848_v18 }
 0x5fb   : > { %v1556_v20 = vmul.f32 %v5443_v19, %v5439_v4 }
 0x5fd   : > { %5104 = vmatprep.mubr.msk.f32.mxu1 %vm1535_vm4, %v1556_v20 }
 0x5fe   : > { %5105 = vmatmul.mubr.msk.f32.vlgmr.msra.gmra.mxu1 %vm1535_vm4, %v1557_v21 }
 0x5ff   : > { %5108 = vmatpush3.xpose.msk.msra.mxu1 %vm1449_vm3, %v1652_v1  ;;  %5111 = vmatprep.mubr.msk.f32.mxu1 %vm1449_vm3, %v1646_v12 }
 0x600   : > { %5109 = vmatprep.subr.msk.mxu1 %vm1449_vm3, %v1650_v7 }
 0x603   : > { %5110 = vmatpush3.xpose.msk.msra.mxu1 %vm1449_vm3, %v1650_v7 }
 0x606   : > { %5112 = vmatmul.mubr.msk.f32.vlgmr.msra.gmra.mxu1 %vm1449_vm3, %v1648_v15 }
 0x6ba   : > { %v5127_v23 = vpop.f32.mrf.mxu0 }
 0x6bb   : > { %v1933_v33 = vadd.f32 %v5127_v23, %v6018_v51 }
 0x6bc   : > { %v1927_v27 = vpop.f32.mrf.mxu0 }
 0x6bd   : > { %v1928_v31 = vadd.f32 %v6018_v51, %v1927_v27  ;;  %v1939_v35 = vsel %vm1535_vm4, %v1933_v33, -inf }
 0x6be   : > { %v6060_v22 = vpop.f32.mrf.mxu1 }
 0x6bf   : > { %v1936_v34 = vsel %vm1535_vm4, %v1928_v31, -inf }
 0x6c0   : > { %v6062_v24 = vpop.f32.mrf.mxu1 }
 0x6c6   : > { %v5113_v25 = vpop.f32.mrf.mxu1 }
 0x6c7   : > { %v1733_v26 = vadd.f32 %v5113_v25, %v6018_v51 }
 0x6c8   : > { %v1727_v28 = vpop.f32.mrf.mxu1 }
 0x6c9   : > { %v1728_v29 = vadd.f32 %v6018_v51, %v1727_v28  ;;  %v1739_v30 = vsel %vm1535_vm4, %v1733_v26, -inf }
 0x6ca   : > { %1740 = vmax.xlane.f32.xlu1 %v1739_v30 }
 0x6cb   : > { %v1736_v32 = vsel %vm1535_vm4, %v1728_v29, -inf }
 0x6cc   : > { %1737 = vmax.xlane.f32.xlu0 %v1736_v32 }
 0x6d0   : > { %1937 = vmax.xlane.f32.xlu0 %v1936_v34 }
 0x6d4   : > { %1940 = vmax.xlane.f32.xlu0 %v1939_v35 }
 0x753   : > { %v1741_v38 = vpop.xlane.xlu1 %1740 }
 0x754   : > { %v1743_v41 = vsub.f32 %v1733_v26, %v1741_v38 }
 0x755   : > { %v1738_v36 = vpop.xlane.xlu0 %1737 }
 0x756   : > { %v1742_v37 = vsub.f32 %v1728_v29, %v1738_v36  ;;  %v1746_v49 = vmul.f32 1.442695, %v1743_v41 }
 0x758   : > { %v1744_v42 = vmul.f32 1.442695, %v1742_v37 }
 0x759   : > { %v1938_v39 = vpop.xlane.xlu0 %1937 }
 0x75a   : > { %v1942_v40 = vsub.f32 %v1928_v31, %v1938_v39 }
 0x75c   : > { %v1944_v43 = vmul.f32 1.442695, %v1942_v40 }
 0x75d   : > { %v1941_v45 = vpop.xlane.xlu0 %1940 }
 0x75e   : > { %5444 = vpow2.f32 %v1944_v43  ;;  %v1943_v48 = vsub.f32 %v1933_v33, %v1941_v45 }
 0x75f   : > { %5446 = vpow2.f32 %v1744_v42 }
 0x760   : > { %v1946_v52 = vmul.f32 1.442695, %v1943_v48  ;;  %v2279_v48 = vld [vmem:[%s6573_s6 + $0x18] sm:$0xff] }
 0x761   : > { %5149 = vmatprep.subr.mxu0 %v2279_v48 }
 0x762   : > { %5448 = vpow2.f32 %v1946_v52  ;;  %5150 = vmatpush3.msra.mxu0 %v2279_v48  ;;  %v2277_v52 = vld [vmem:[%s6573_s6 + $0x8] sm:$0xff] }
 0x763   : > { %5450 = vpow2.f32 %v1746_v49  ;;  %v2278_v49 = vld [vmem:[%s6573_s6 + $0x10] sm:$0xff]  ;;  %v2571_v48 = vld [vmem:[%s6587_s5 + $0x48] sm:$0xff] }
 0x764   : > { %5151 = vmatprep.subr.mxu0 %v2278_v49 }
 0x765   : > { %5152 = vmatpush3.msra.mxu0 %v2278_v49  ;;  %v2570_v49 = vld [vmem:[%s6587_s5 + $0x40] sm:$0xff] }
 0x766   : > { %5153 = vmatprep.subr.mxu0 %v2277_v52 }
 0x767   : > { %5154 = vmatpush3.msra.mxu0 %v2277_v52  ;;  %v2569_v52 = vld [vmem:[%s6587_s5 + $0x38] sm:$0xff] }
 0x76b   : > { %v5445_v53 = vpop.eup %5444 }
 0x76c   : > { %v1948_v54 = vsel %vm1535_vm4, %v5445_v53, 0.0  ;;  %v5447_v55 = vpop.eup %5446 }
 0x76d   : > { %1949 = vadd.xlane.f32.xlu0 %v1948_v54  ;;  %v1748_v56 = vsel %vm1535_vm4, %v5447_v55, 0.0 }
 0x76f   : > { %v5449_v8 = vpop.eup %5448 }
 0x770   : > { %v1951_v57 = vsel %vm1535_vm4, %v5449_v8, 0.0  ;;  %v5451_v58 = vpop.eup %5450 }
 0x771   : > { %1749 = vadd.xlane.f32.xlu0 %v1748_v56  ;;  %1952 = vadd.xlane.f32.xlu1 %v1951_v57  ;;  %v1751_v59 = vsel %vm1535_vm4, %v5451_v58, 0.0 }
 0x775   : > { %1752 = vadd.xlane.f32.xlu1 %v1751_v59 }
 0x786   : > { %1758 = vrot.lane.b32.xlu1 %v5993_v46, %s6542_s22 }
 0x787   : > { %1760 = vrot.lane.b32.xlu0 %v5991_v44, %s6542_s22  ;;  %s6586_s22 = sld [smem:[#allocation15_spill]] }
 0x78a   : > { %1960 = vrot.lane.b32.xlu1 %v5991_v44, %s6532_s16 }
 0x78b   : > { %2051 = vrot.lane.b32.xlu0 %v5991_v44, %s6530_s2 }
 0x78e   : > { %1958 = vrot.lane.b32.xlu1 %v5993_v46, %s6532_s16  ;;  %s6534_s16 = smov 16  }
 0x78f   : > { %2045 = vrot.lane.b32.xlu0 %v6000_v47, %s6528_s3 }
 0x792   : > { %2049 = vrot.lane.b32.xlu1 %v5993_v46, %s6530_s2  ;;  %s6536_s2 = smov 8  }
 0x796   : > { %2047 = vrot.lane.b32.xlu1 %v6009_v50, %s6528_s3  ;;  %s6540_s3 = smov 40  }
 0x7f6   : > { %v1950_v60 = vpop.xlane.xlu0 %1949 }
 0x7fa   : > { %v1750_v61 = vpop.xlane.xlu0 %1749  ;;  %v1953_v62 = vpop.xlane.xlu1 %1952 }
 0x7fb   : > { %5452 = vrcp.f32 %v1750_v61 }
 0x7fc   : > { %5454 = vrcp.f32 %v1950_v60 }
 0x7fe   : > { %v1761_v63 = vpop.permute.xlu0 %1760  ;;  %v1753_v0 = vpop.xlane.xlu1 %1752 }
 0x7ff   : > { %5456 = vrcp.f32 %v1753_v0  ;;  %5114 = vmatprep.subr.mxu1 %v1761_v63 }
 0x800   : > { %5115 = vmatpush3.msra.mxu1 %v1761_v63  ;;  %5458 = vrcp.f32 %v1953_v62 }
 0x802   : > { %v1759_v1 = vpop.permute.xlu1 %1758  ;;  %v2052_v5 = vpop.permute.xlu0 %2051 }
 0x803   : > { %5116 = vmatprep.subr.mxu1 %v1759_v1 }
 0x804   : > { %5117 = vmatpush3.msra.mxu1 %v1759_v1 }
 0x806   : > { %v1961_v47 = vpop.permute.xlu1 %1960  ;;  %v2046_v14 = vpop.permute.xlu0 %2045 }
 0x807   : > { %5128 = vmatprep.subr.mxu1 %v1961_v47 }
 0x808   : > { %v5453_v2 = vpop.eup %5452 }
 0x809   : > { %v1756_v3 = vmul.f32 %v5453_v2, %v5447_v55  ;;  %v5455_v4 = vpop.eup %5454 }
 0x80a   : > { %v1959_v11 = vpop.permute.xlu1 %1958  ;;  %v1956_v12 = vmul.f32 %v5455_v4, %v5445_v53  ;;  %v2276_v53 = vld [vmem:[%s6573_s6] sm:$0xff] }
 0x80b   : > { %5118 = vmatprep.mubr.msk.f32.mxu1 %vm1535_vm4, %v1756_v3  ;;  %5155 = vmatprep.subr.mxu0 %v2276_v53 }
 0x80c   : > { %v5457_v50 = vpop.eup %5456  ;;  %5156 = vmatpush3.msra.mxu0 %v2276_v53  ;;  %v2568_v53 = vld [vmem:[%s6587_s5 + $0x30] sm:$0xff] }
 0x80d   : > { %v1757_v7 = vmul.f32 %v5457_v50, %v5451_v58  ;;  %v5459_v9 = vpop.eup %5458 }
 0x80e   : > { %v1957_v13 = vmul.f32 %v5459_v9, %v5449_v8  ;;  %v2050_v15 = vpop.permute.xlu1 %2049 }
 0x80f   : > { %5119 = vmatmul.mubr.msk.f32.vlgmr.msra.gmra.mxu1 %vm1535_vm4, %v1757_v7 }
 0x810   : > { %5129 = vmatpush3.msra.mxu1 %v1961_v47  ;;  %5132 = vmatprep.mubr.msk.f32.mxu1 %vm1535_vm4, %v1956_v12 }
 0x811   : > { %5130 = vmatprep.subr.mxu1 %v1959_v11 }
 0x812   : > { %5131 = vmatpush3.msra.mxu1 %v1959_v11  ;;  %v2048_v16 = vpop.permute.xlu1 %2047 }
 0x813   : > { %5135 = vmatprep.subr.msk.mxu1 %vm1449_vm3, %v2052_v5  ;;  %5133 = vmatmul.mubr.msk.f32.vlgmr.msra.gmra.mxu1 %vm1535_vm4, %v1957_v13 }
 0x814   : > { %5136 = vmatpush3.xpose.msk.msra.mxu1 %vm1449_vm3, %v2052_v5  ;;  %5139 = vmatprep.mubr.msk.f32.mxu1 %vm1449_vm3, %v2046_v14 }
 0x815   : > { %5137 = vmatprep.subr.msk.mxu1 %vm1449_vm3, %v2050_v15 }
 0x818   : > { %5138 = vmatpush3.xpose.msk.msra.mxu1 %vm1449_vm3, %v2050_v15 }
 0x81b   : > { %5140 = vmatmul.mubr.msk.f32.vlgmr.msra.gmra.mxu1 %vm1449_vm3, %v2048_v16 }
 0x8cf   : > { %v5120_v17 = vpop.f32.mrf.mxu1 }
 0x8d1   : > { %v1836_v18 = vpop.f32.mrf.mxu1 }
 0x8d3   : > { %v5134_v19 = vpop.f32.mrf.mxu1 }
 0x8d5   : > { %v2036_v20 = vpop.f32.mrf.mxu1 }
 0x8db   : > { %v5141_v21 = vpop.f32.mrf.mxu1 }
 0x8dc   : > { %v2133_v23 = vadd.f32 %v5141_v21, %v6018_v51 }
 0x8dd   : > { %v2127_v25 = vpop.f32.mrf.mxu1 }
 0x8de   : > { %v2128_v26 = vadd.f32 %v6018_v51, %v2127_v25  ;;  %v2139_v27 = vsel %vm1535_vm4, %v2133_v23, -inf }
 0x8df   : > { %2140 = vmax.xlane.f32.xlu1 %v2139_v27 }
 0x8e0   : > { %v2136_v28 = vsel %vm1535_vm4, %v2128_v26, -inf }
 0x8e1   : > { %2137 = vmax.xlane.f32.xlu0 %v2136_v28 }
 0x8f0   : > { %2158 = vrot.lane.b32.xlu1 %v5993_v46, %s6540_s3 }
 0x8f4   : > { %2247 = vrot.lane.b32.xlu1 %v1836_v18, %s6536_s2 }
 0x8f8   : > { %2249 = vrot.lane.b32.xlu1 %v5120_v17, %s6536_s2  ;;  %s6583_s2 = sld [smem:[#allocation13_spill]] }
 0x8fc   : > { %2257 = vrot.lane.b32.xlu1 %v5134_v19, %s6534_s16 }
 0x968   : > { %v2141_v29 = vpop.xlane.xlu1 %2140 }
 0x969   : > { %v2143_v30 = vsub.f32 %v2133_v23, %v2141_v29 }
 0x96a   : > { %v2138_v31 = vpop.xlane.xlu0 %2137 }
 0x96b   : > { %v2146_v32 = vmul.f32 1.442695, %v2143_v30  ;;  %v2142_v33 = vsub.f32 %v2128_v26, %v2138_v31 }
 0x96c   : > { %v2159_v41 = vpop.permute.xlu1 %2158 }
 0x96d   : > { %5460 = vpow2.f32 %v2146_v32  ;;  %v2144_v34 = vmul.f32 1.442695, %v2142_v33 }
 0x96f   : > { %5462 = vpow2.f32 %v2144_v34  ;;  %v4681_v34 = vld [vmem:[%s6586_s22] ss:$0 sm:$0xff] }
 0x970   : > { %v2248_v8 = vpop.permute.xlu1 %2247 }
 0x971   : > { %v2269_v59 = vsel %vm1449_vm3, %v6062_v24, %v2248_v8  ;;  %v4679_v24 = vld [vmem:[%s6583_s2] ss:$0 sm:$0xff]  ;;  %v2565_v8 = vld [vmem:[%s6587_s5 + $0x18] sm:$0xff] }
 0x974   : > { %v2250_v56 = vpop.permute.xlu1 %2249 }
 0x975   : > { %v2270_v61 = vsel %vm1449_vm3, %v6060_v22, %v2250_v56  ;;  %v2564_v56 = vld [vmem:[%s6587_s5 + $0x10] sm:$0xff] }
 0x978   : > { %v2258_v57 = vpop.permute.xlu1 %2257 }
 0x979   : > { %v2272_v0 = vsel %vm1535_vm4, %v2270_v61, %v2258_v57  ;;  %v2563_v57 = vld [vmem:[%s6587_s5 + $0x8] sm:$0xff] }
 0x97a   : > { %v5461_v35 = vpop.eup %5460 }
 0x97b   : > { %v2151_v36 = vsel %vm1535_vm4, %v5461_v35, 0.0 }
 0x97c   : > { %v5463_v46 = vpop.eup %5462  ;;  %2152 = vadd.xlane.f32.xlu0 %v2151_v36 }
 0x97d   : > { %v2148_v37 = vsel %vm1535_vm4, %v5463_v46, 0.0 }
 0x980   : > { %2149 = vadd.xlane.f32.xlu0 %v2148_v37 }
 0x996   : > { %2160 = vrot.lane.b32.xlu0 %v5991_v44, %s6540_s3  ;;  %s6585_s3 = sld [smem:[#allocation14_spill]] }
 0x99a   : > { %2255 = vrot.lane.b32.xlu0 %v2036_v20, %s6534_s16  ;;  %s6538_s16 = smov 24  }
 0x99c   : > { %v4680_v32 = vld [vmem:[%s6585_s3] ss:$0 sm:$0xff] }
 0xa05   : > { %v2153_v38 = vpop.xlane.xlu0 %2152 }
 0xa06   : > { %5464 = vrcp.f32 %v2153_v38 }
 0xa09   : > { %v2150_v39 = vpop.xlane.xlu0 %2149 }
 0xa0a   : > { %5466 = vrcp.f32 %v2150_v39 }
 0xa0d   : > { %v2161_v40 = vpop.permute.xlu0 %2160 }
 0xa0e   : > { %5142 = vmatprep.subr.mxu1 %v2161_v40 }
 0xa0f   : > { %5143 = vmatpush3.msra.mxu1 %v2161_v40  ;;  %v2577_v40 = vld [vmem:[%s6587_s5 + $0x78] sm:$0xff] }
 0xa10   : > { %5144 = vmatprep.subr.mxu1 %v2159_v41  ;;  %5171 = vmatprep.subr.mxu0 %v2577_v40 }
 0xa11   : > { %5145 = vmatpush3.msra.mxu1 %v2159_v41  ;;  %v2256_v58 = vpop.permute.xlu0 %2255  ;;  %v2576_v41 = vld [vmem:[%s6587_s5 + $0x70] sm:$0xff] }
 0xa12   : > { %v2271_v62 = vsel %vm1535_vm4, %v2269_v59, %v2256_v58  ;;  %v2562_v58 = vld [vmem:[%s6587_s5] sm:$0xff] }
 0xa13   : > { %v5465_v42 = vpop.eup %5464  ;;  %v4682_v59 = vld [vmem:[%s6588_s8] ss:$0 sm:$0xff] }
 0xa14   : > { %v2157_v44 = vmul.f32 %v5465_v42, %v5461_v35  ;;  %v2575_v42 = vld [vmem:[%s6587_s5 + $0x68] sm:$0xff] }
 0xa17   : > { %v5467_v43 = vpop.eup %5466 }
 0xa18   : > { %v2156_v45 = vmul.f32 %v5467_v43, %v5463_v46  ;;  %v2574_v43 = vld [vmem:[%s6587_s5 + $0x60] sm:$0xff] }
 0xa1a   : > { %5146 = vmatprep.mubr.msk.f32.mxu1 %vm1535_vm4, %v2156_v45  ;;  %v2573_v45 = vld [vmem:[%s6587_s5 + $0x58] sm:$0xff] }
 0xa1b   : > { %5147 = vmatmul.mubr.msk.f32.vlgmr.msra.gmra.mxu1 %vm1535_vm4, %v2157_v44  ;;  %v2572_v44 = vld [vmem:[%s6587_s5 + $0x50] sm:$0xff] }
 0xadb   : > { %v5148_v54 = vpop.f32.mrf.mxu1 }
 0xadc   : > { %2265 = vrot.lane.b32.xlu1 %v5148_v54, %s6538_s16  ;;  %v2567_v54 = vld [vmem:[%s6587_s5 + $0x28] sm:$0xff] }
 0xadd   : > { %v2236_v55 = vpop.f32.mrf.mxu1 }
 0xade   : > { %2263 = vrot.lane.b32.xlu0 %v2236_v55, %s6538_s16  ;;  %s6584_s16 = sld [smem:[#allocation16_spill]]  ;;  %v2566_v55 = vld [vmem:[%s6587_s5 + $0x20] sm:$0xff] }
 0xae4   : > { %v2419_v19 = vld [vmem:[%s6584_s16 + $0x18] sm:$0xff]  ;;  %v2418_v20 = vld [vmem:[%s6584_s16 + $0x10] sm:$0xff]  ;;  %v2417_v21 = vld [vmem:[%s6584_s16 + $0x8] sm:$0xff] }
 0xae5   : > { %5160 = vmatprep.subr.mxu1 %v2419_v19  ;;  %v2416_v23 = vld [vmem:[%s6584_s16] sm:$0xff] }
 0xae6   : > { %5161 = vmatpush3.msra.mxu1 %v2419_v19 }
 0xae7   : > { %5162 = vmatprep.subr.mxu1 %v2418_v20 }
 0xae8   : > { %5163 = vmatpush3.msra.mxu1 %v2418_v20 }
 0xae9   : > { %5164 = vmatprep.subr.mxu1 %v2417_v21 }
 0xaea   : > { %5165 = vmatpush3.msra.mxu1 %v2417_v21 }
 0xaeb   : > { %5166 = vmatprep.subr.mxu1 %v2416_v23 }
 0xaec   : > { %5167 = vmatpush3.msra.mxu1 %v2416_v23 }
 0xb4e   : > { %v2266_v60 = vpop.permute.xlu1 %2265 }
 0xb4f   : > { %v2275_v47 = vsel %vm2273_vm5, %v2272_v0, %v2266_v60 }
 0xb50   : > { %v2264_v63 = vpop.permute.xlu0 %2263 }
 0xb51   : > { %v2274_v1 = vsel %vm2273_vm5, %v2271_v62, %v2264_v63 }
 0xb52   : > { %5157 = vmatprep.mubr.msk.f32.mxu0 %vm935_vm0, %v2274_v1 }
 0xb53   : > { %5158 = vmatmul.mubr.msk.f32.vlgmr.msra.gmra.mxu0 %vm935_vm0, %v2275_v47 }
 0xb54   : > { %5172 = vmatpush3.msra.mxu0 %v2577_v40 }
 0xb55   : > { %5173 = vmatprep.subr.mxu0 %v2576_v41 }
 0xb56   : > { %5174 = vmatpush3.msra.mxu0 %v2576_v41 }
 0xb57   : > { %5175 = vmatprep.subr.mxu0 %v2575_v42 }
 0xb58   : > { %5176 = vmatpush3.msra.mxu0 %v2575_v42 }
 0xb59   : > { %5177 = vmatprep.subr.mxu0 %v2574_v43 }
 0xb5a   : > { %5178 = vmatpush3.msra.mxu0 %v2574_v43 }
 0xb5b   : > { %5179 = vmatprep.subr.mxu0 %v2573_v45 }
 0xb5c   : > { %5180 = vmatpush3.msra.mxu0 %v2573_v45 }
 0xb5d   : > { %5181 = vmatprep.subr.mxu0 %v2572_v44 }
 0xb5e   : > { %5182 = vmatpush3.msra.mxu0 %v2572_v44 }
 0xb5f   : > { %5183 = vmatprep.subr.mxu0 %v2571_v48 }
 0xb60   : > { %5184 = vmatpush3.msra.mxu0 %v2571_v48 }
 0xb61   : > { %5185 = vmatprep.subr.mxu0 %v2570_v49 }
 0xb62   : > { %5186 = vmatpush3.msra.mxu0 %v2570_v49 }
 0xb63   : > { %5187 = vmatprep.subr.mxu0 %v2569_v52 }
 0xb64   : > { %5188 = vmatpush3.msra.mxu0 %v2569_v52 }
 0xb65   : > { %5189 = vmatprep.subr.mxu0 %v2568_v53 }
 0xb66   : > { %5190 = vmatpush3.msra.mxu0 %v2568_v53 }
 0xb67   : > { %5191 = vmatprep.subr.mxu0 %v2567_v54 }
 0xb68   : > { %5192 = vmatpush3.msra.mxu0 %v2567_v54 }
 0xb69   : > { %5193 = vmatprep.subr.mxu0 %v2566_v55 }
 0xb6a   : > { %5194 = vmatpush3.msra.mxu0 %v2566_v55 }
 0xb6b   : > { %5195 = vmatprep.subr.mxu0 %v2565_v8 }
 0xb6c   : > { %5196 = vmatpush3.msra.mxu0 %v2565_v8  ;;  %v4685_v8 = vld [vmem:[%s6589_s9] ss:$0 sm:$0xff] }
 0xb6d   : > { %5197 = vmatprep.subr.mxu0 %v2564_v56 }
 0xb6e   : > { %5198 = vmatpush3.msra.mxu0 %v2564_v56 }
 0xb6f   : > { %5199 = vmatprep.subr.mxu0 %v2563_v57 }
 0xb70   : > { %5200 = vmatpush3.msra.mxu0 %v2563_v57 }
 0xb71   : > { %5201 = vmatprep.subr.mxu0 %v2562_v58 }
 0xb72   : > { %5202 = vmatpush3.msra.mxu0 %v2562_v58 }
 0xc13   : > { %v5159_v2 = vpop.f32.mrf.mxu0 }
 0xc14   : > { %v2362_v3 = vadd.f32 %v5159_v2, %v5974_v10 }
 0xc15   : > { %v2352_v4 = vpop.f32.mrf.mxu0 }
 0xc16   : > { %v6136_v50 = vadd.f32 %v4679_v24, %v2362_v3  ;;  %v2361_v22 = vadd.f32 %v2352_v4, %v5970_v6 }
 0xc18   : > { %v6139_v5 = vadd.f32 %v4679_v24, %v2361_v22  ;;  %v2377_v7 = vsel %vm935_vm0, %v6136_v50, 0.0 }
 0xc19   : > { %2378 = vadd.xlane.f32.xlu1 %v2377_v7 }
 0xc1a   : > { %v2374_v9 = vsel %vm935_vm0, %v6139_v5, 0.0 }
 0xc1b   : > { %2375 = vadd.xlane.f32.xlu0 %v2374_v9 }
 0xca2   : > { %v2379_v11 = vpop.xlane.xlu1 %2378 }
 0xca3   : > { %v2381_v10 = vmul.f32 0.03125, %v2379_v11 }
 0xca4   : > { %v2376_v12 = vpop.xlane.xlu0 %2375 }
 0xca5   : > { %v2380_v13 = vmul.f32 0.03125, %v2376_v12  ;;  %v2383_v14 = vsub.f32 %v6136_v50, %v2381_v10 }
 0xca7   : > { %v2382_v6 = vsub.f32 %v6139_v5, %v2380_v13  ;;  %v2385_v17 = vmul.f32 %v2383_v14, %v2383_v14 }
 0xca9   : > { %v2384_v15 = vmul.f32 %v2382_v6, %v2382_v6  ;;  %v2389_v18 = vsel %vm935_vm0, %v2385_v17, 0.0 }
 0xcab   : > { %v2386_v16 = vsel %vm935_vm0, %v2384_v15, 0.0 }
 0xcac   : > { %2387 = vadd.xlane.f32.xlu0 %v2386_v16 }
 0xcb0   : > { %2390 = vadd.xlane.f32.xlu0 %v2389_v18 }
 0xd35   : > { %v2388_v25 = vpop.xlane.xlu0 %2387 }
 0xd36   : > { %v2392_v26 = vmul.f32 0.03125, %v2388_v25 }
 0xd38   : > { %v2394_v27 = vadd.f32 1e-12, %v2392_v26 }
 0xd39   : > { %v2391_v28 = vpop.xlane.xlu0 %2390 }
 0xd3a   : > { %5468 = vrsqrt.f32 %v2394_v27  ;;  %v2393_v29 = vmul.f32 0.03125, %v2391_v28 }
 0xd3c   : > { %v2395_v30 = vadd.f32 1e-12, %v2393_v29 }
 0xd3e   : > { %5470 = vrsqrt.f32 %v2395_v30 }
 0xd47   : > { %v5469_v31 = vpop.eup %5468 }
 0xd48   : > { %v2398_v33 = vmul.f32 %v5469_v31, %v2382_v6 }
 0xd4a   : > { %v2406_v35 = vmul.f32 %v4680_v32, %v2398_v33 }
 0xd4b   : > { %v5471_v36 = vpop.eup %5470 }
 0xd4c   : > { %v2399_v46 = vmul.f32 %v5471_v36, %v2383_v14  ;;  %v2414_v37 = vadd.f32 %v4681_v34, %v2406_v35 }
 0xd4e   : > { %v2407_v38 = vmul.f32 %v4680_v32, %v2399_v46  ;;  %5168 = vmatprep.mubr.msk.f32.mxu1 %vm935_vm0, %v2414_v37 }
 0xd50   : > { %v2415_v39 = vadd.f32 %v4681_v34, %v2407_v38  ;;  %v5638_v38 = vmov -1.0  }
 0xd52   : > { %5169 = vmatmul.mubr.msk.f32.vlgmr.msra.gmra.mxu1 %vm935_vm0, %v2415_v39 }
 0xe12   : > { %v5170_v60 = vpop.f32.mrf.mxu1 }
 0xe13   : > { %v2505_v61 = vadd.f32 %v5170_v60, %v4682_v59 }
 0xe14   : > { %v2499_v62 = vpop.f32.mrf.mxu1 }
 0xe15   : > { %v2511_v63 = vmul.f32 0.70710677, %v2505_v61  ;;  %v2500_v0 = vadd.f32 %v4682_v59, %v2499_v62  ;;  %v2509_v52 = vmul.f32 0.5, %v2505_v61 }
 0xe17   : > { %v2517_v1 = vand.u32 2147483647, %v2511_v63  ;;  %v2510_v47 = vmul.f32 0.70710677, %v2500_v0  ;;  %vm2513_vm6 = vcmp.ge.f32.partialorder %v2511_v63, 0.0  ;;  %v2508_v48 = vmul.f32 0.5, %v2500_v0 }
 0xe18   : > { %v2515_v39 = vsel %vm2513_vm6, 1.0, %v5638_v38 }
 0xe19   : > { %v2519_v2 = vmul.f32 0.3275911, %v2517_v1  ;;  %v2516_v24 = vand.u32 2147483647, %v2510_v47  ;;  %v2545_v7 = vsub.f32 0.0, %v2517_v1  ;;  %vm2512_vm7 = vcmp.ge.f32.partialorder %v2510_v47, 0.0 }
 0xe1a   : > { %v2514_v43 = vsel %vm2512_vm7, 1.0, %v5638_v38 }
 0xe1b   : > { %v2521_v3 = vadd.f32 1.0, %v2519_v2  ;;  %v2518_v4 = vmul.f32 0.3275911, %v2516_v24  ;;  %v2544_v9 = vsub.f32 0.0, %v2516_v24  ;;  %v2547_v11 = vmul.f32 %v2545_v7, %v2517_v1  ;;  %v4692_v7 = vld [vmem:[%s5705_s24 + $0x30] sm:$0xff] }
 0xe1d   : > { %5472 = vrcp.f32 %v2521_v3  ;;  %v2520_v22 = vadd.f32 1.0, %v2518_v4  ;;  %v2546_v12 = vmul.f32 %v2544_v9, %v2516_v24  ;;  %v2550_v14 = vmul.f32 1.442695, %v2547_v11  ;;  %v4691_v9 = vld [vmem:[%s5705_s24 + $0x28] sm:$0xff]  ;;  %v4690_v11 = vld [vmem:[%s5705_s24 + $0x20] sm:$0xff] }
 0xe1f   : > { %5474 = vrcp.f32 %v2520_v22  ;;  %v2548_v16 = vmul.f32 1.442695, %v2546_v12  ;;  %v4693_v22 = vld [vmem:[%s5705_s24 + $0x38] sm:$0xff] }
 0xe20   : > { %5476 = vpow2.f32 %v2550_v14  ;;  %5206 = vmatprep.subr.mxu1 %v4693_v22 }
 0xe21   : > { %5478 = vpow2.f32 %v2548_v16  ;;  %5207 = vmatpush3.msra.mxu1 %v4693_v22 }
 0xe22   : > { %5208 = vmatprep.subr.mxu1 %v4692_v7 }
 0xe23   : > { %5209 = vmatpush3.msra.mxu1 %v4692_v7 }
 0xe24   : > { %5210 = vmatprep.subr.mxu1 %v4691_v9 }
 0xe25   : > { %5211 = vmatpush3.msra.mxu1 %v4691_v9 }
 0xe26   : > { %5212 = vmatprep.subr.mxu1 %v4690_v11 }
 0xe27   : > { %5213 = vmatpush3.msra.mxu1 %v4690_v11 }
 0xe2a   : > { %v5473_v10 = vpop.eup %5472 }
 0xe2b   : > { %v2527_v13 = vmul.f32 1.0614054, %v5473_v10 }
 0xe2c   : > { %v5475_v6 = vpop.eup %5474 }
 0xe2d   : > { %v2529_v15 = vadd.f32 -1.4531521, %v2527_v13  ;;  %v2526_v17 = vmul.f32 1.0614054, %v5475_v6  ;;  %v5477_v33 = vpop.eup %5476 }
 0xe2e   : > { %v5479_v46 = vpop.eup %5478 }
 0xe2f   : > { %v2531_v18 = vmul.f32 %v5473_v10, %v2529_v15  ;;  %v2528_v19 = vadd.f32 -1.4531521, %v2526_v17  ;;  %v4688_v17 = vld [vmem:[%s6574_s14 + $0x1] ss:$0 sm:$0xff]  ;;  %s6592_s14 = smov 88  }
 0xe31   : > { %v2533_v20 = vadd.f32 1.4214138, %v2531_v18  ;;  %v2530_v21 = vmul.f32 %v5475_v6, %v2528_v19 }
 0xe33   : > { %v2535_v23 = vmul.f32 %v5473_v10, %v2533_v20  ;;  %v2532_v25 = vadd.f32 1.4214138, %v2530_v21 }
 0xe35   : > { %v2537_v26 = vadd.f32 -0.28449672, %v2535_v23  ;;  %v2534_v27 = vmul.f32 %v5475_v6, %v2532_v25  ;;  %v4689_v23 = vld [vmem:[%s5700_s19 + $0x1] ss:$0 sm:$0xff] }
 0xe37   : > { %v2539_v28 = vmul.f32 %v5473_v10, %v2537_v26  ;;  %v2536_v29 = vadd.f32 -0.28449672, %v2534_v27 }
 0xe39   : > { %v2541_v30 = vadd.f32 0.2548296, %v2539_v28  ;;  %v2538_v31 = vmul.f32 %v5475_v6, %v2536_v29  ;;  %v4695_v28 = vld [vmem:[%s5710_s30 + $0x1] ss:$0 sm:$0xff] }
 0xe3b   : > { %v2543_v32 = vmul.f32 %v5473_v10, %v2541_v30  ;;  %v2540_v34 = vadd.f32 0.2548296, %v2538_v31 }
 0xe3d   : > { %v2553_v35 = vmul.f32 %v5477_v33, %v2543_v32  ;;  %v2542_v36 = vmul.f32 %v5475_v6, %v2540_v34 }
 0xe3f   : > { %v2555_v37 = vsub.f32 1.0, %v2553_v35  ;;  %v2552_v40 = vmul.f32 %v5479_v46, %v2542_v36 }
 0xe41   : > { %v2557_v41 = vmul.f32 %v2555_v37, %v2515_v39  ;;  %v2554_v42 = vsub.f32 1.0, %v2552_v40 }
 0xe43   : > { %v2556_v45 = vmul.f32 %v2554_v42, %v2514_v43  ;;  %v2559_v44 = vadd.f32 1.0, %v2557_v41 }
 0xe45   : > { %v2558_v49 = vadd.f32 1.0, %v2556_v45  ;;  %v2561_v54 = vmul.f32 %v2559_v44, %v2509_v52 }
 0xe47   : > { %v2560_v53 = vmul.f32 %v2558_v49, %v2508_v48 }
 0xe49   : > { %5203 = vmatprep.mubr.f32.mxu0 %v2560_v53 }
 0xe4a   : > { %5204 = vmatmul.mubr.f32.vlgmr.msra.gmra.mxu0 %v2561_v54 }
 0xf0a   : > { %v5205_v55 = vpop.f32.mrf.mxu0 }
 0xf0b   : > { %v2654_v56 = vadd.f32 %v5205_v55, %v6136_v50 }
 0xf0c   : > { %v2644_v57 = vpop.f32.mrf.mxu0 }
 0xf0d   : > { %v6178_v58 = vadd.f32 %v4685_v8, %v2654_v56  ;;  %v2653_v59 = vadd.f32 %v2644_v57, %v6139_v5 }
 0xf0f   : > { %v6181_v60 = vadd.f32 %v4685_v8, %v2653_v59  ;;  %v2671_v62 = vsel %vm935_vm0, %v6178_v58, 0.0 }
 0xf10   : > { %2672 = vadd.xlane.f32.xlu1 %v2671_v62 }
 0xf11   : > { %v2668_v61 = vsel %vm935_vm0, %v6181_v60, 0.0 }
 0xf12   : > { %2669 = vadd.xlane.f32.xlu0 %v2668_v61 }
 0xf99   : > { %v2673_v63 = vpop.xlane.xlu1 %2672 }
 0xf9a   : > { %v2675_v50 = vmul.f32 0.03125, %v2673_v63 }
 0xf9b   : > { %v2670_v0 = vpop.xlane.xlu0 %2669 }
 0xf9c   : > { %v2677_v1 = vsub.f32 %v6178_v58, %v2675_v50  ;;  %v2674_v5 = vmul.f32 0.03125, %v2670_v0 }
 0xf9e   : > { %v2676_v47 = vsub.f32 %v6181_v60, %v2674_v5  ;;  %v2679_v2 = vmul.f32 %v2677_v1, %v2677_v1 }
 0xfa0   : > { %v2683_v24 = vsel %vm935_vm0, %v2679_v2, 0.0  ;;  %v2678_v3 = vmul.f32 %v2676_v47, %v2676_v47 }
 0xfa1   : > { %2684 = vadd.xlane.f32.xlu1 %v2683_v24 }
 0xfa2   : > { %v2680_v4 = vsel %vm935_vm0, %v2678_v3, 0.0 }
 0xfa3   : > { %2681 = vadd.xlane.f32.xlu0 %v2680_v4 }
0x102a   : > { %v2685_v10 = vpop.xlane.xlu1 %2684 }
0x102b   : > { %v2687_v12 = vmul.f32 0.03125, %v2685_v10  ;;  %v6267_v10 = vld [vmem:[%s6015_s23] ss:$0 sm:$0xff]  ;;  %s6597_s23 = smov 48  }
0x102c   : > { %v2682_v13 = vpop.xlane.xlu0 %2681 }
0x102d   : > { %v2689_v14 = vadd.f32 1e-12, %v2687_v12  ;;  %v2686_v6 = vmul.f32 0.03125, %v2682_v13 }
0x102f   : > { %5480 = vrsqrt.f32 %v2689_v14  ;;  %v2688_v15 = vadd.f32 1e-12, %v2686_v6 }
0x1031   : > { %5482 = vrsqrt.f32 %v2688_v15 }
0x103c   : > { %v5481_v16 = vpop.eup %5480 }
0x103d   : > { %v2693_v18 = vmul.f32 %v5481_v16, %v2677_v1 }
0x103e   : > { %v5483_v19 = vpop.eup %5482 }
0x103f   : > { %v2692_v20 = vmul.f32 %v5483_v19, %v2676_v47  ;;  %v2701_v21 = vmul.f32 %v4688_v17, %v2693_v18 }
0x1041   : > { %v2700_v25 = vmul.f32 %v4688_v17, %v2692_v20  ;;  %v2709_v27 = vadd.f32 %v4689_v23, %v2701_v21 }
0x1043   : > { %v2708_v26 = vadd.f32 %v4689_v23, %v2700_v25 }
0x1045   : > { %5214 = vmatprep.mubr.msk.f32.mxu1 %vm935_vm0, %v2708_v26 }
0x1046   : > { %5215 = vmatmul.mubr.msk.f32.vlgmr.msra.gmra.mxu1 %vm935_vm0, %v2709_v27 }
0x1106   : > { %v5216_v29 = vpop.f32.mrf.mxu1 }
0x1107   : > { %v6200_v30 = vadd.f32 %v5216_v29, %v4695_v28 }
0x1108   : > { %v2795_v31 = vpop.f32.mrf.mxu1 }
0x1109   : > { %v6202_v32 = vadd.f32 %v4695_v28, %v2795_v31  ;;  %2810 = vrot.lane.b32.xlu0 %v6200_v30, %s6590_s13  ;;  %v6218_v36 = vmul.f32 0.35355338, %v6200_v30 }
0x110b   : > { %2808 = vrot.lane.b32.xlu1 %v6202_v32, %s6590_s13  ;;  %v6209_v33 = vmul.f32 0.35355338, %v6202_v32  ;;  %s6591_s13 = smov 64  }
0x110d   : > { %5221 = vmatprep.mubr.msk.f32.mxu1 %vm1449_vm3, %v6209_v33 }
0x117b   : > { %v2811_v34 = vpop.permute.xlu0 %2810 }
0x117c   : > { %5217 = vmatprep.subr.msk.mxu1 %vm1449_vm3, %v2811_v34 }
0x117d   : > { %5218 = vmatpush3.xpose.msk.msra.mxu1 %vm1449_vm3, %v2811_v34  ;;  %v2809_v35 = vpop.permute.xlu1 %2808 }
0x117e   : > { %5219 = vmatprep.subr.msk.mxu1 %vm1449_vm3, %v2809_v35 }
0x1181   : > { %5220 = vmatpush3.xpose.msk.msra.mxu1 %vm1449_vm3, %v2809_v35 }
0x1184   : > { %5222 = vmatmul.mubr.msk.f32.vlgmr.msra.gmra.mxu1 %vm1449_vm3, %v6218_v36 }
0x1244   : > { %v5223_v46 = vpop.f32.mrf.mxu1 }
0x1245   : > { %v2894_v37 = vadd.f32 %v5223_v46, %v6018_v51 }
0x1246   : > { %v2888_v39 = vpop.f32.mrf.mxu1 }
0x1247   : > { %v2889_v40 = vadd.f32 %v6018_v51, %v2888_v39  ;;  %v2900_v41 = vsel %vm1535_vm4, %v2894_v37, -inf }
0x1248   : > { %2901 = vmax.xlane.f32.xlu0 %v2900_v41 }
0x1249   : > { %v2897_v42 = vsel %vm1535_vm4, %v2889_v40, -inf }
0x124a   : > { %2898 = vmax.xlane.f32.xlu1 %v2897_v42 }
0x125b   : > { %2919 = vrot.lane.b32.xlu1 %v6202_v32, %s6591_s13 }
0x125e   : > { %2921 = vrot.lane.b32.xlu0 %v6200_v30, %s6591_s13  ;;  %s6594_s13 = smov 80  }
0x125f   : > { %3012 = vrot.lane.b32.xlu1 %v6200_v30, %s6592_s14 }
0x1263   : > { %3010 = vrot.lane.b32.xlu1 %v6202_v32, %s6592_s14  ;;  %s6593_s14 = smov 120  }
0x12d1   : > { %v2902_v43 = vpop.xlane.xlu0 %2901 }
0x12d2   : > { %v2904_v51 = vsub.f32 %v2894_v37, %v2902_v43 }
0x12d3   : > { %v2899_v45 = vpop.xlane.xlu1 %2898 }
0x12d4   : > { %v2907_v44 = vmul.f32 1.442695, %v2904_v51  ;;  %v2903_v48 = vsub.f32 %v2889_v40, %v2899_v45 }
0x12d5   : > { %v2922_v49 = vpop.permute.xlu0 %2921 }
0x12d6   : > { %5484 = vpow2.f32 %v2907_v44  ;;  %v2905_v52 = vmul.f32 1.442695, %v2903_v48  ;;  %5224 = vmatprep.subr.mxu1 %v2922_v49 }
0x12d7   : > { %5225 = vmatpush3.msra.mxu1 %v2922_v49  ;;  %v2920_v53 = vpop.permute.xlu1 %2919 }
0x12d8   : > { %5486 = vpow2.f32 %v2905_v52  ;;  %5226 = vmatprep.subr.mxu1 %v2920_v53 }
0x12d9   : > { %5227 = vmatpush3.msra.mxu1 %v2920_v53 }
0x12db   : > { %v3013_v54 = vpop.permute.xlu1 %3012 }
0x12dc   : > { %5231 = vmatprep.subr.msk.mxu1 %vm1449_vm3, %v3013_v54 }
0x12df   : > { %v3011_v59 = vpop.permute.xlu1 %3010 }
0x12e3   : > { %v5485_v55 = vpop.eup %5484 }
0x12e4   : > { %v2912_v8 = vsel %vm1535_vm4, %v5485_v55, 0.0 }
0x12e5   : > { %v5487_v56 = vpop.eup %5486  ;;  %2913 = vadd.xlane.f32.xlu1 %v2912_v8 }
0x12e6   : > { %v2909_v57 = vsel %vm1535_vm4, %v5487_v56, 0.0 }
0x12e7   : > { %2910 = vadd.xlane.f32.xlu0 %v2909_v57 }
0x12f6   : > { %3006 = vrot.lane.b32.xlu1 %v6209_v33, %s6593_s14 }
0x12fa   : > { %3210 = vrot.lane.b32.xlu1 %v6202_v32, %s6594_s13 }
0x12fd   : > { %3212 = vrot.lane.b32.xlu0 %v6200_v30, %s6594_s13  ;;  %s6599_s13 = smov 104  }
0x12fe   : > { %3208 = vrot.lane.b32.xlu1 %v6218_v36, %s6595_s17 }
0x1301   : > { %3008 = vrot.lane.b32.xlu0 %v6218_v36, %s6593_s14  ;;  %s6598_s14 = smov 72  }
0x1305   : > { %3206 = vrot.lane.b32.xlu0 %v6209_v33, %s6595_s17  ;;  %s6596_s17 = smov 56  }
0x136e   : > { %v2914_v62 = vpop.xlane.xlu1 %2913 }
0x136f   : > { %5488 = vrcp.f32 %v2914_v62 }
0x1370   : > { %v2911_v61 = vpop.xlane.xlu0 %2910 }
0x1371   : > { %5490 = vrcp.f32 %v2911_v61 }
0x1372   : > { %v3007_v63 = vpop.permute.xlu1 %3006 }
0x1374   : > { %v3213_v50 = vpop.permute.xlu0 %3212 }
0x1375   : > { %5245 = vmatprep.subr.msk.mxu0 %vm1449_vm3, %v3213_v50 }
0x1376   : > { %5246 = vmatpush3.xpose.msk.msra.mxu0 %vm1449_vm3, %v3213_v50  ;;  %v3211_v0 = vpop.permute.xlu1 %3210 }
0x1377   : > { %5247 = vmatprep.subr.msk.mxu0 %vm1449_vm3, %v3211_v0 }
0x1378   : > { %v3009_v1 = vpop.permute.xlu0 %3008 }
0x137a   : > { %5248 = vmatpush3.xpose.msk.msra.mxu0 %vm1449_vm3, %v3211_v0  ;;  %v3209_v2 = vpop.permute.xlu1 %3208 }
0x137c   : > { %v3207_v5 = vpop.permute.xlu0 %3206  ;;  %v5489_v47 = vpop.eup %5488 }
0x137d   : > { %5249 = vmatprep.mubr.msk.f32.mxu0 %vm1449_vm3, %v3207_v5  ;;  %v2918_v4 = vmul.f32 %v5489_v47, %v5485_v55 }
0x137e   : > { %v5491_v24 = vpop.eup %5490  ;;  %5250 = vmatmul.mubr.msk.f32.vlgmr.msra.gmra.mxu0 %vm1449_vm3, %v3209_v2 }
0x137f   : > { %v2917_v3 = vmul.f32 %v5491_v24, %v5487_v56 }
0x1381   : > { %5228 = vmatprep.mubr.msk.f32.mxu1 %vm1535_vm4, %v2917_v3 }
0x1382   : > { %5229 = vmatmul.mubr.msk.f32.vlgmr.msra.gmra.mxu1 %vm1535_vm4, %v2918_v4 }
0x1383   : > { %5232 = vmatpush3.xpose.msk.msra.mxu1 %vm1449_vm3, %v3013_v54  ;;  %5235 = vmatprep.mubr.msk.f32.mxu1 %vm1449_vm3, %v3007_v63 }
0x1384   : > { %5233 = vmatprep.subr.msk.mxu1 %vm1449_vm3, %v3011_v59 }
0x1387   : > { %5234 = vmatpush3.xpose.msk.msra.mxu1 %vm1449_vm3, %v3011_v59 }
0x138a   : > { %5236 = vmatmul.mubr.msk.f32.vlgmr.msra.gmra.mxu1 %vm1449_vm3, %v3009_v1 }
0x143e   : > { %v5251_v7 = vpop.f32.mrf.mxu0 }
0x143f   : > { %v3294_v18 = vadd.f32 %v6267_v10, %v5251_v7 }
0x1440   : > { %v3288_v13 = vpop.f32.mrf.mxu0 }
0x1441   : > { %v3289_v16 = vadd.f32 %v6267_v10, %v3288_v13  ;;  %v3300_v20 = vsel %vm1535_vm4, %v3294_v18, -inf }
0x1442   : > { %v6262_v22 = vpop.f32.mrf.mxu1 }
0x1443   : > { %v3297_v19 = vsel %vm1535_vm4, %v3289_v16, -inf }
0x1444   : > { %v6264_v9 = vpop.f32.mrf.mxu1 }
0x144a   : > { %v5237_v11 = vpop.f32.mrf.mxu1 }
0x144b   : > { %v3094_v12 = vadd.f32 %v6267_v10, %v5237_v11 }
0x144c   : > { %v3088_v14 = vpop.f32.mrf.mxu1 }
0x144d   : > { %v3089_v6 = vadd.f32 %v6267_v10, %v3088_v14  ;;  %v3100_v15 = vsel %vm1535_vm4, %v3094_v12, -inf }
0x144e   : > { %3101 = vmax.xlane.f32.xlu1 %v3100_v15 }
0x144f   : > { %v3097_v17 = vsel %vm1535_vm4, %v3089_v6, -inf }
0x1450   : > { %3098 = vmax.xlane.f32.xlu0 %v3097_v17 }
0x1454   : > { %3298 = vmax.xlane.f32.xlu0 %v3297_v19 }
0x1458   : > { %3301 = vmax.xlane.f32.xlu0 %v3300_v20 }
0x14d7   : > { %v3102_v25 = vpop.xlane.xlu1 %3101 }
0x14d8   : > { %v3104_v28 = vsub.f32 %v3094_v12, %v3102_v25 }
0x14d9   : > { %v3099_v21 = vpop.xlane.xlu0 %3098 }
0x14da   : > { %v3103_v23 = vsub.f32 %v3089_v6, %v3099_v21  ;;  %v3107_v46 = vmul.f32 1.442695, %v3104_v28 }
0x14dc   : > { %v3105_v29 = vmul.f32 1.442695, %v3103_v23 }
0x14dd   : > { %v3299_v26 = vpop.xlane.xlu0 %3298 }
0x14de   : > { %v3303_v27 = vsub.f32 %v3289_v16, %v3299_v26 }
0x14e0   : > { %v3305_v31 = vmul.f32 1.442695, %v3303_v27 }
0x14e1   : > { %v3302_v34 = vpop.xlane.xlu0 %3301 }
0x14e2   : > { %5492 = vpow2.f32 %v3305_v31  ;;  %v3304_v35 = vsub.f32 %v3294_v18, %v3302_v34 }
0x14e3   : > { %5494 = vpow2.f32 %v3105_v29 }
0x14e4   : > { %v3307_v37 = vmul.f32 1.442695, %v3304_v35  ;;  %v4725_v35 = vld [vmem:[%s6573_s6 + $0x38] sm:$0xff] }
0x14e6   : > { %5496 = vpow2.f32 %v3307_v37  ;;  %v4723_v37 = vld [vmem:[%s6573_s6 + $0x28] sm:$0xff] }
0x14e7   : > { %5498 = vpow2.f32 %v3107_v46  ;;  %v4724_v46 = vld [vmem:[%s6573_s6 + $0x30] sm:$0xff] }
0x14ef   : > { %v5493_v39 = vpop.eup %5492 }
0x14f0   : > { %v3309_v40 = vsel %vm1535_vm4, %v5493_v39, 0.0  ;;  %v5495_v41 = vpop.eup %5494 }
0x14f1   : > { %3310 = vadd.xlane.f32.xlu0 %v3309_v40  ;;  %v3109_v43 = vsel %vm1535_vm4, %v5495_v41, 0.0 }
0x14f3   : > { %v5497_v42 = vpop.eup %5496 }
0x14f4   : > { %v3312_v51 = vsel %vm1535_vm4, %v5497_v42, 0.0  ;;  %v5499_v45 = vpop.eup %5498 }
0x14f5   : > { %3110 = vadd.xlane.f32.xlu0 %v3109_v43  ;;  %3313 = vadd.xlane.f32.xlu1 %v3312_v51  ;;  %v3112_v44 = vsel %vm1535_vm4, %v5499_v45, 0.0 }
0x14f9   : > { %3113 = vadd.xlane.f32.xlu1 %v3112_v44 }
0x150a   : > { %3119 = vrot.lane.b32.xlu1 %v6202_v32, %s6596_s17 }
0x150b   : > { %3121 = vrot.lane.b32.xlu0 %v6200_v30, %s6596_s17  ;;  %s6600_s17 = smov 40  }
0x150e   : > { %3321 = vrot.lane.b32.xlu1 %v6200_v30, %s6597_s23 }
0x150f   : > { %3412 = vrot.lane.b32.xlu0 %v6200_v30, %s6598_s14 }
0x1512   : > { %3319 = vrot.lane.b32.xlu1 %v6202_v32, %s6597_s23  ;;  %s6601_s23 = smov 8  }
0x1513   : > { %3406 = vrot.lane.b32.xlu0 %v6209_v33, %s6599_s13 }
0x1516   : > { %3410 = vrot.lane.b32.xlu1 %v6202_v32, %s6598_s14  ;;  %s6602_s14 = smov 16  }
0x151a   : > { %3408 = vrot.lane.b32.xlu1 %v6218_v36, %s6599_s13  ;;  %s6603_s13 = smov 24  }
0x157a   : > { %v3311_v48 = vpop.xlane.xlu0 %3310 }
0x157e   : > { %v3111_v49 = vpop.xlane.xlu0 %3110  ;;  %v3314_v52 = vpop.xlane.xlu1 %3313 }
0x157f   : > { %5500 = vrcp.f32 %v3111_v49 }
0x1580   : > { %5502 = vrcp.f32 %v3311_v48 }
0x1582   : > { %v3122_v53 = vpop.permute.xlu0 %3121  ;;  %v3114_v54 = vpop.xlane.xlu1 %3113 }
0x1583   : > { %5504 = vrcp.f32 %v3114_v54  ;;  %5238 = vmatprep.subr.mxu1 %v3122_v53 }
0x1584   : > { %5239 = vmatpush3.msra.mxu1 %v3122_v53  ;;  %5506 = vrcp.f32 %v3314_v52 }
0x1586   : > { %v3120_v55 = vpop.permute.xlu1 %3119  ;;  %v3413_v59 = vpop.permute.xlu0 %3412 }
0x1587   : > { %5240 = vmatprep.subr.mxu1 %v3120_v55 }
0x1588   : > { %5241 = vmatpush3.msra.mxu1 %v3120_v55 }
0x158a   : > { %v3322_v33 = vpop.permute.xlu1 %3321  ;;  %v3407_v1 = vpop.permute.xlu0 %3406 }
0x158b   : > { %5252 = vmatprep.subr.mxu1 %v3322_v33 }
0x158c   : > { %v5501_v8 = vpop.eup %5500 }
0x158d   : > { %v3117_v56 = vmul.f32 %v5501_v8, %v5495_v41  ;;  %v5503_v57 = vpop.eup %5502 }
0x158e   : > { %v3320_v63 = vpop.permute.xlu1 %3319  ;;  %v3317_v50 = vmul.f32 %v5503_v57, %v5493_v39  ;;  %v4722_v39 = vld [vmem:[%s6573_s6 + $0x20] sm:$0xff] }
0x158f   : > { %5242 = vmatprep.mubr.msk.f32.mxu1 %vm1535_vm4, %v3117_v56  ;;  %v4729_v56 = vld [vmem:[%s6583_s2 + $0x1] ss:$0 sm:$0xff] }
0x1590   : > { %v5505_v36 = vpop.eup %5504 }
0x1591   : > { %v3118_v62 = vmul.f32 %v5505_v36, %v5499_v45  ;;  %v5507_v61 = vpop.eup %5506 }
0x1592   : > { %v3318_v0 = vmul.f32 %v5507_v61, %v5497_v42  ;;  %v3411_v5 = vpop.permute.xlu1 %3410 }
0x1593   : > { %5243 = vmatmul.mubr.msk.f32.vlgmr.msra.gmra.mxu1 %vm1535_vm4, %v3118_v62 }
0x1594   : > { %5253 = vmatpush3.msra.mxu1 %v3322_v33  ;;  %5256 = vmatprep.mubr.msk.f32.mxu1 %vm1535_vm4, %v3317_v50 }
0x1595   : > { %5254 = vmatprep.subr.mxu1 %v3320_v63 }
0x1596   : > { %5255 = vmatpush3.msra.mxu1 %v3320_v63  ;;  %v3409_v47 = vpop.permute.xlu1 %3408 }
0x1597   : > { %5259 = vmatprep.subr.msk.mxu1 %vm1449_vm3, %v3413_v59  ;;  %5257 = vmatmul.mubr.msk.f32.vlgmr.msra.gmra.mxu1 %vm1535_vm4, %v3318_v0 }
0x1598   : > { %5260 = vmatpush3.xpose.msk.msra.mxu1 %vm1449_vm3, %v3413_v59  ;;  %5263 = vmatprep.mubr.msk.f32.mxu1 %vm1449_vm3, %v3407_v1 }
0x1599   : > { %5261 = vmatprep.subr.msk.mxu1 %vm1449_vm3, %v3411_v5 }
0x159c   : > { %5262 = vmatpush3.xpose.msk.msra.mxu1 %vm1449_vm3, %v3411_v5 }
0x159f   : > { %5264 = vmatmul.mubr.msk.f32.vlgmr.msra.gmra.mxu1 %vm1449_vm3, %v3409_v47 }
0x1653   : > { %v5244_v2 = vpop.f32.mrf.mxu1 }
0x1655   : > { %v3197_v24 = vpop.f32.mrf.mxu1 }
0x1657   : > { %v5258_v3 = vpop.f32.mrf.mxu1 }
0x1659   : > { %v3397_v4 = vpop.f32.mrf.mxu1 }
0x165f   : > { %v5265_v7 = vpop.f32.mrf.mxu1 }
0x1660   : > { %v3494_v11 = vadd.f32 %v6267_v10, %v5265_v7  ;;  %v4735_v7 = vld [vmem:[%s6584_s16 + $0x28] sm:$0xff] }
0x1661   : > { %v3488_v12 = vpop.f32.mrf.mxu1 }
0x1662   : > { %v3489_v13 = vadd.f32 %v6267_v10, %v3488_v12  ;;  %v3500_v14 = vsel %vm1535_vm4, %v3494_v11, -inf }
0x1663   : > { %3501 = vmax.xlane.f32.xlu1 %v3500_v14 }
0x1664   : > { %v3497_v6 = vsel %vm1535_vm4, %v3489_v13, -inf }
0x1665   : > { %3498 = vmax.xlane.f32.xlu0 %v3497_v6 }
0x1674   : > { %3519 = vrot.lane.b32.xlu1 %v6202_v32, %s6600_s17 }
0x1678   : > { %3608 = vrot.lane.b32.xlu1 %v3197_v24, %s6601_s23 }
0x167c   : > { %3610 = vrot.lane.b32.xlu1 %v5244_v2, %s6601_s23  ;;  %s6605_s23 = sld [smem:[#allocation20_spill]] }
0x1680   : > { %3618 = vrot.lane.b32.xlu1 %v5258_v3, %s6602_s14  ;;  %v4737_v3 = vld [vmem:[%s6584_s16 + $0x38] sm:$0xff] }
0x1681   : > { %5284 = vmatprep.subr.mxu1 %v4737_v3 }
0x1682   : > { %5285 = vmatpush3.msra.mxu1 %v4737_v3 }
0x16ec   : > { %v3502_v15 = vpop.xlane.xlu1 %3501 }
0x16ed   : > { %v3504_v16 = vsub.f32 %v3494_v11, %v3502_v15  ;;  %v4734_v11 = vld [vmem:[%s6584_s16 + $0x20] sm:$0xff] }
0x16ee   : > { %v3499_v17 = vpop.xlane.xlu0 %3498 }
0x16ef   : > { %v3507_v18 = vmul.f32 1.442695, %v3504_v16  ;;  %v3503_v10 = vsub.f32 %v3489_v13, %v3499_v17 }
0x16f0   : > { %v3520_v28 = vpop.permute.xlu1 %3519 }
0x16f1   : > { %5508 = vpow2.f32 %v3507_v18  ;;  %v3505_v19 = vmul.f32 1.442695, %v3503_v10  ;;  %v4732_v18 = vld [vmem:[%s6585_s3 + $0x1] ss:$0 sm:$0xff] }
0x16f3   : > { %5510 = vpow2.f32 %v3505_v19  ;;  %v4733_v19 = vld [vmem:[%s6586_s22 + $0x1] ss:$0 sm:$0xff] }
0x16f4   : > { %v3609_v42 = vpop.permute.xlu1 %3608 }
0x16f5   : > { %v3630_v44 = vsel %vm1449_vm3, %v6264_v9, %v3609_v42  ;;  %v4745_v42 = vld [vmem:[%s6587_s5 + $0x98] sm:$0xff] }
0x16f8   : > { %v3611_v43 = vpop.permute.xlu1 %3610 }
0x16f9   : > { %v3631_v49 = vsel %vm1449_vm3, %v6262_v22, %v3611_v43  ;;  %v4744_v43 = vld [vmem:[%s6587_s5 + $0x90] sm:$0xff] }
0x16fc   : > { %v3619_v51 = vpop.permute.xlu1 %3618 }
0x16fd   : > { %v3633_v54 = vsel %vm1535_vm4, %v3631_v49, %v3619_v51  ;;  %v4743_v51 = vld [vmem:[%s6587_s5 + $0x88] sm:$0xff] }
0x16fe   : > { %v5509_v20 = vpop.eup %5508 }
0x16ff   : > { %v3512_v21 = vsel %vm1535_vm4, %v5509_v20, 0.0 }
0x1700   : > { %v5511_v23 = vpop.eup %5510  ;;  %3513 = vadd.xlane.f32.xlu0 %v3512_v21 }
0x1701   : > { %v3509_v32 = vsel %vm1535_vm4, %v5511_v23, 0.0 }
0x1704   : > { %3510 = vadd.xlane.f32.xlu0 %v3509_v32 }
0x171a   : > { %3521 = vrot.lane.b32.xlu0 %v6200_v30, %s6600_s17  ;;  %s6604_s17 = sld [smem:[#allocation22_spill]] }
0x171e   : > { %3616 = vrot.lane.b32.xlu0 %v3397_v4, %s6602_s14  ;;  %v4736_v4 = vld [vmem:[%s6584_s16 + $0x30] sm:$0xff]  ;;  %s6606_s14 = sld [smem:[#allocation21_spill]] }
0x171f   : > { %5286 = vmatprep.subr.mxu1 %v4736_v4 }
0x1720   : > { %5287 = vmatpush3.msra.mxu1 %v4736_v4 }
0x1721   : > { %5288 = vmatprep.subr.mxu1 %v4735_v7 }
0x1722   : > { %5289 = vmatpush3.msra.mxu1 %v4735_v7 }
0x1723   : > { %5290 = vmatprep.subr.mxu1 %v4734_v11 }
0x1724   : > { %5291 = vmatpush3.msra.mxu1 %v4734_v11 }
0x1789   : > { %v3514_v25 = vpop.xlane.xlu0 %3513 }
0x178a   : > { %5512 = vrcp.f32 %v3514_v25 }
0x178d   : > { %v3511_v26 = vpop.xlane.xlu0 %3510 }
0x178e   : > { %5514 = vrcp.f32 %v3511_v26 }
0x1791   : > { %v3522_v27 = vpop.permute.xlu0 %3521 }
0x1792   : > { %5266 = vmatprep.subr.mxu0 %v3522_v27 }
0x1793   : > { %5267 = vmatpush3.msra.mxu0 %v3522_v27  ;;  %v4757_v27 = vld [vmem:[%s6587_s5 + $0xf8] sm:$0xff] }
0x1794   : > { %5268 = vmatprep.subr.mxu0 %v3520_v28 }
0x1795   : > { %5269 = vmatpush3.msra.mxu0 %v3520_v28  ;;  %v3617_v45 = vpop.permute.xlu0 %3616  ;;  %v4756_v28 = vld [vmem:[%s6587_s5 + $0xf0] sm:$0xff] }
0x1796   : > { %5273 = vmatprep.subr.mxu0 %v4725_v35  ;;  %v3632_v52 = vsel %vm1535_vm4, %v3630_v44, %v3617_v45  ;;  %v4742_v45 = vld [vmem:[%s6587_s5 + $0x80] sm:$0xff] }
0x1797   : > { %v5513_v29 = vpop.eup %5512  ;;  %v4739_v44 = vld [vmem:[%s6588_s8 + $0x1] ss:$0 sm:$0xff] }
0x1798   : > { %v3518_v30 = vmul.f32 %v5513_v29, %v5509_v20  ;;  %v4755_v29 = vld [vmem:[%s6587_s5 + $0xe8] sm:$0xff] }
0x179b   : > { %v5515_v31 = vpop.eup %5514 }
0x179c   : > { %v3517_v34 = vmul.f32 %v5515_v31, %v5511_v23  ;;  %v4754_v31 = vld [vmem:[%s6587_s5 + $0xe0] sm:$0xff] }
0x179e   : > { %5270 = vmatprep.mubr.msk.f32.mxu0 %vm1535_vm4, %v3517_v34  ;;  %v4753_v34 = vld [vmem:[%s6587_s5 + $0xd8] sm:$0xff] }
0x179f   : > { %5271 = vmatmul.mubr.msk.f32.vlgmr.msra.gmra.mxu0 %vm1535_vm4, %v3518_v30  ;;  %v4752_v30 = vld [vmem:[%s6587_s5 + $0xd0] sm:$0xff] }
0x17a0   : > { %5274 = vmatpush3.msra.mxu0 %v4725_v35  ;;  %v4751_v35 = vld [vmem:[%s6587_s5 + $0xc8] sm:$0xff] }
0x17a1   : > { %5275 = vmatprep.subr.mxu0 %v4724_v46 }
0x17a2   : > { %5276 = vmatpush3.msra.mxu0 %v4724_v46  ;;  %v4750_v46 = vld [vmem:[%s6587_s5 + $0xc0] sm:$0xff] }
0x17a3   : > { %5277 = vmatprep.subr.mxu0 %v4723_v37 }
0x17a4   : > { %5278 = vmatpush3.msra.mxu0 %v4723_v37  ;;  %v4749_v37 = vld [vmem:[%s6587_s5 + $0xb8] sm:$0xff] }
0x17a5   : > { %5279 = vmatprep.subr.mxu0 %v4722_v39 }
0x17a6   : > { %5280 = vmatpush3.msra.mxu0 %v4722_v39  ;;  %v4748_v39 = vld [vmem:[%s6587_s5 + $0xb0] sm:$0xff] }
0x17a7   : > { %5295 = vmatprep.subr.mxu0 %v4757_v27 }
0x185f   : > { %v5272_v40 = vpop.f32.mrf.mxu0 }
0x1860   : > { %3626 = vrot.lane.b32.xlu1 %v5272_v40, %s6603_s13  ;;  %v4747_v40 = vld [vmem:[%s6587_s5 + $0xa8] sm:$0xff] }
0x1861   : > { %v3597_v41 = vpop.f32.mrf.mxu0 }
0x1862   : > { %3624 = vrot.lane.b32.xlu0 %v3597_v41, %s6603_s13  ;;  %v4746_v41 = vld [vmem:[%s6587_s5 + $0xa0] sm:$0xff]  ;;  %s6607_s13 = sld [smem:[#allocation24_spill]] }
0x18d2   : > { %v3627_v48 = vpop.permute.xlu1 %3626 }
0x18d3   : > { %v3635_v33 = vsel %vm2273_vm5, %v3633_v54, %v3627_v48 }
0x18d4   : > { %v3625_v53 = vpop.permute.xlu0 %3624 }
0x18d5   : > { %v3634_v55 = vsel %vm2273_vm5, %v3632_v52, %v3625_v53 }
0x18d6   : > { %5281 = vmatprep.mubr.msk.f32.mxu0 %vm935_vm0, %v3634_v55 }
0x18d7   : > { %5282 = vmatmul.mubr.msk.f32.vlgmr.msra.gmra.mxu0 %vm935_vm0, %v3635_v33 }
0x18d8   : > { %5296 = vmatpush3.msra.mxu0 %v4757_v27 }
0x18d9   : > { %5297 = vmatprep.subr.mxu0 %v4756_v28 }
0x18da   : > { %5298 = vmatpush3.msra.mxu0 %v4756_v28 }
0x18db   : > { %5299 = vmatprep.subr.mxu0 %v4755_v29 }
0x18dc   : > { %5300 = vmatpush3.msra.mxu0 %v4755_v29 }
0x18dd   : > { %5301 = vmatprep.subr.mxu0 %v4754_v31 }
0x18de   : > { %5302 = vmatpush3.msra.mxu0 %v4754_v31 }
0x18df   : > { %5303 = vmatprep.subr.mxu0 %v4753_v34 }
0x18e0   : > { %5304 = vmatpush3.msra.mxu0 %v4753_v34 }
0x18e1   : > { %5305 = vmatprep.subr.mxu0 %v4752_v30 }
0x18e2   : > { %5306 = vmatpush3.msra.mxu0 %v4752_v30 }
0x18e3   : > { %5307 = vmatprep.subr.mxu0 %v4751_v35 }
0x18e4   : > { %5308 = vmatpush3.msra.mxu0 %v4751_v35 }
0x18e5   : > { %5309 = vmatprep.subr.mxu0 %v4750_v46 }
0x18e6   : > { %5310 = vmatpush3.msra.mxu0 %v4750_v46 }
0x18e7   : > { %5311 = vmatprep.subr.mxu0 %v4749_v37 }
0x18e8   : > { %5312 = vmatpush3.msra.mxu0 %v4749_v37 }
0x18e9   : > { %5313 = vmatprep.subr.mxu0 %v4748_v39 }
0x18ea   : > { %5314 = vmatpush3.msra.mxu0 %v4748_v39 }
0x18eb   : > { %5315 = vmatprep.subr.mxu0 %v4747_v40 }
0x18ec   : > { %5316 = vmatpush3.msra.mxu0 %v4747_v40 }
0x18ed   : > { %5317 = vmatprep.subr.mxu0 %v4746_v41 }
0x18ee   : > { %5318 = vmatpush3.msra.mxu0 %v4746_v41  ;;  %v4759_v41 = vld [vmem:[%s6589_s9 + $0x1] ss:$0 sm:$0xff]  ;;  %s5641_s9 = smov [#allocation2]  }
0x18ef   : > { %5319 = vmatprep.subr.mxu0 %v4745_v42 }
0x18f0   : > { %5320 = vmatpush3.msra.mxu0 %v4745_v42 }
0x18f1   : > { %5321 = vmatprep.subr.mxu0 %v4744_v43 }
0x18f2   : > { %5322 = vmatpush3.msra.mxu0 %v4744_v43 }
0x18f3   : > { %5323 = vmatprep.subr.mxu0 %v4743_v51 }
0x18f4   : > { %5324 = vmatpush3.msra.mxu0 %v4743_v51 }
0x18f5   : > { %5325 = vmatprep.subr.mxu0 %v4742_v45 }
0x18f6   : > { %5326 = vmatpush3.msra.mxu0 %v4742_v45 }
0x1997   : > { %v5283_v8 = vpop.f32.mrf.mxu0 }
0x1998   : > { %v3723_v9 = vadd.f32 %v5283_v8, %v6178_v58 }
0x1999   : > { %v3713_v57 = vpop.f32.mrf.mxu0 }
0x199a   : > { %v3733_v36 = vadd.f32 %v4729_v56, %v3723_v9  ;;  %v3722_v22 = vadd.f32 %v3713_v57, %v6181_v60 }
0x199c   : > { %v6342_v59 = vadd.f32 %v4729_v56, %v3722_v22  ;;  %v3741_v62 = vsel %vm935_vm0, %v3733_v36, 0.0 }
0x199d   : > { %3742 = vadd.xlane.f32.xlu1 %v3741_v62 }
0x199e   : > { %v3738_v61 = vsel %vm935_vm0, %v6342_v59, 0.0 }
0x199f   : > { %3739 = vadd.xlane.f32.xlu0 %v3738_v61 }
0x1a26   : > { %v3743_v63 = vpop.xlane.xlu1 %3742 }
0x1a27   : > { %v3745_v50 = vmul.f32 0.03125, %v3743_v63 }
0x1a28   : > { %v3740_v0 = vpop.xlane.xlu0 %3739 }
0x1a29   : > { %v3744_v58 = vmul.f32 0.03125, %v3740_v0  ;;  %v3747_v1 = vsub.f32 %v3733_v36, %v3745_v50 }
0x1a2b   : > { %v3746_v5 = vsub.f32 %v6342_v59, %v3744_v58  ;;  %v3749_v2 = vmul.f32 %v3747_v1, %v3747_v1 }
0x1a2d   : > { %v3748_v60 = vmul.f32 %v3746_v5, %v3746_v5  ;;  %v3753_v24 = vsel %vm935_vm0, %v3749_v2, 0.0 }
0x1a2f   : > { %v3750_v47 = vsel %vm935_vm0, %v3748_v60, 0.0 }
0x1a30   : > { %3751 = vadd.xlane.f32.xlu0 %v3750_v47 }
0x1a34   : > { %3754 = vadd.xlane.f32.xlu0 %v3753_v24 }
0x1ab9   : > { %v3752_v12 = vpop.xlane.xlu0 %3751 }
0x1aba   : > { %v3756_v13 = vmul.f32 0.03125, %v3752_v12 }
0x1abc   : > { %v3758_v14 = vadd.f32 1e-12, %v3756_v13 }
0x1abd   : > { %v3755_v6 = vpop.xlane.xlu0 %3754 }
0x1abe   : > { %5516 = vrsqrt.f32 %v3758_v14  ;;  %v3757_v15 = vmul.f32 0.03125, %v3755_v6 }
0x1ac0   : > { %v3759_v16 = vadd.f32 1e-12, %v3757_v15 }
0x1ac2   : > { %5518 = vrsqrt.f32 %v3759_v16 }
0x1acb   : > { %v5517_v17 = vpop.eup %5516 }
0x1acc   : > { %v3762_v10 = vmul.f32 %v5517_v17, %v3746_v5 }
0x1ace   : > { %v3770_v20 = vmul.f32 %v4732_v18, %v3762_v10 }
0x1acf   : > { %v5519_v21 = vpop.eup %5518 }
0x1ad0   : > { %v3763_v23 = vmul.f32 %v5519_v21, %v3747_v1  ;;  %v3778_v32 = vadd.f32 %v4733_v19, %v3770_v20 }
0x1ad2   : > { %v3771_v25 = vmul.f32 %v4732_v18, %v3763_v23  ;;  %5292 = vmatprep.mubr.msk.f32.mxu1 %vm935_vm0, %v3778_v32 }
0x1ad4   : > { %v3779_v26 = vadd.f32 %v4733_v19, %v3771_v25 }
0x1ad6   : > { %5293 = vmatmul.mubr.msk.f32.vlgmr.msra.gmra.mxu1 %vm935_vm0, %v3779_v26 }
0x1b96   : > { %v5294_v48 = vpop.f32.mrf.mxu1 }
0x1b97   : > { %v3871_v49 = vadd.f32 %v5294_v48, %v4739_v44 }
0x1b98   : > { %v3865_v52 = vpop.f32.mrf.mxu1 }
0x1b99   : > { %v3877_v53 = vmul.f32 0.70710677, %v3871_v49  ;;  %v3866_v54 = vadd.f32 %v4739_v44, %v3865_v52  ;;  %v3875_v35 = vmul.f32 0.5, %v3871_v49  ;;  %v5639_v52 = vmov 0.0  }
0x1b9a   : > { %5330 = vmatprep.subr.mxu1 %v5639_v52  ;;  %5338 = vmatprep.mubr.msk.f32.mxu1 %vm5640_vm11, %v5639_v52 }
0x1b9b   : > { %v3883_v55 = vand.u32 2147483647, %v3877_v53  ;;  %v3876_v33 = vmul.f32 0.70710677, %v3866_v54  ;;  %vm3879_vm8 = vcmp.ge.f32.partialorder %v3877_v53, 0.0  ;;  %v3874_v34 = vmul.f32 0.5, %v3866_v54 }
0x1b9c   : > { %v3881_v32 = vsel %vm3879_vm8, 1.0, %v5638_v38  ;;  %v4050_v53 = vld [vmem:[%s6604_s17 + $0x18] sm:$0xff]  ;;  %v4048_v54 = vld [vmem:[%s6604_s17 + $0x8] sm:$0xff] }
0x1b9d   : > { %v3885_v8 = vmul.f32 0.3275911, %v3883_v55  ;;  %v3882_v56 = vand.u32 2147483647, %v3876_v33  ;;  %v3911_v22 = vsub.f32 0.0, %v3883_v55  ;;  %vm3878_vm9 = vcmp.ge.f32.partialorder %v3876_v33, 0.0  ;;  %5331 = vmatpush3.msra.mxu1 %v4050_v53 }
0x1b9e   : > { %v3880_v28 = vsel %vm3878_vm9, 1.0, %v5638_v38  ;;  %5332 = vmatprep.subr.mxu1 %v5639_v52  ;;  %v4322_v53 = vld [vmem:[%s5785_s20 + $0x48] sm:$0xff] }
0x1b9f   : > { %v3887_v9 = vadd.f32 1.0, %v3885_v8  ;;  %v3884_v57 = vmul.f32 0.3275911, %v3882_v56  ;;  %v3910_v62 = vsub.f32 0.0, %v3882_v56  ;;  %v3913_v61 = vmul.f32 %v3911_v22, %v3883_v55  ;;  %v4047_v55 = vld [vmem:[%s6604_s17] sm:$0xff] }
0x1ba0   : > { %v4030_v22 = vld [vmem:[%s6606_s14] sm:$0x1]  ;;  %s917_s14 = sand.u32 1, %s5585_s10  }
0x1ba1   : > { %5520 = vrcp.f32 %v3887_v9  ;;  %v3886_v36 = vadd.f32 1.0, %v3884_v57  ;;  %v3912_v50 = vmul.f32 %v3910_v62, %v3882_v56  ;;  %v3916_v58 = vmul.f32 1.442695, %v3913_v61  ;;  %v4029_v57 = vld [vmem:[%s6605_s23] sm:$0x1]  ;;  %s6608_s23 = sld [smem:[#allocation23_spill]] }
0x1ba2   : > { %s918_s2 = scalar_lea.vmem [#allocation2], %s917_s14  ;;  %s4521_s6 = scalar_lea.sflag [#allocation3], %s917_s14 }
0x1ba3   : > { %5522 = vrcp.f32 %v3886_v36  ;;  %v3914_v60 = vmul.f32 1.442695, %v3912_v50  ;;  %v4138_v50 = vld [vmem:[%s6607_s13 + $0x60] sm:$0xff]  ;;  %s4533_s3 = sshll.u32 %s918_s2, 4  ;;  %s4534_s3 = int_to_ptr.vmem [resolvable:$true] %s4533_s3 }
0x1ba4   : > { %5524 = vpow2.f32 %v3916_v58  ;;  %v4134_v58 = vld [vmem:[%s6607_s13 + $0x40] sm:$0xff]  ;;  %s5533_s8 = scalar_lea.vmem %s4534_s3, 16 }
0x1ba5   : > { %5526 = vpow2.f32 %v3914_v60  ;;  %v4127_v60 = vld [vmem:[%s6607_s13 + $0x8] sm:$0xff]  ;;  %p5534_p11 = scmp.ne.s32.totalorder %s4534_s3, %s5533_s8 }
0x1ba7   : > { %p5535_p12 = pnand %p5534_p11, %p5835_p5 }
0x1ba9   : > { %p5536_p13 = pneg %p5535_p12 }
0x1bae   : > { %v5521_v63 = vpop.eup %5520 }
0x1baf   : > { %v3893_v0 = vmul.f32 1.0614054, %v5521_v63 }
0x1bb0   : > { %v5523_v1 = vpop.eup %5522 }
0x1bb1   : > { %v3895_v5 = vadd.f32 -1.4531521, %v3893_v0  ;;  %v3892_v47 = vmul.f32 1.0614054, %v5523_v1  ;;  %v5525_v18 = vpop.eup %5524  ;;  %v4135_v0 = vld [vmem:[%s6607_s13 + $0x48] sm:$0xff] }
0x1bb2   : > { %v5527_v21 = vpop.eup %5526 }
0x1bb3   : > { %v3897_v2 = vmul.f32 %v5521_v63, %v3895_v5  ;;  %v3894_v24 = vadd.f32 -1.4531521, %v3892_v47  ;;  %v4130_v5 = vld [vmem:[%s6607_s13 + $0x20] sm:$0xff] }
0x1bb4   : > { %v4126_v47 = vld [vmem:[%s6607_s13] sm:$0xff] }
0x1bb5   : > { %v3899_v3 = vadd.f32 1.4214138, %v3897_v2  ;;  %v3896_v4 = vmul.f32 %v5523_v1, %v3894_v24  ;;  %v4141_v2 = vld [vmem:[%s6607_s13 + $0x78] sm:$0xff] }
0x1bb6   : > { %v4376_v24 = vld [vmem:[%s5785_s20 + $0x1f8] sm:$0xff] }
0x1bb7   : > { %v3901_v7 = vmul.f32 %v5521_v63, %v3899_v3  ;;  %v3898_v11 = vadd.f32 1.4214138, %v3896_v4  ;;  %5047 = vmatprep.subr.mxu0 %v4376_v24  ;;  %v4360_v3 = vld [vmem:[%s5785_s20 + $0x178] sm:$0xff]  ;;  %v4375_v4 = vld [vmem:[%s5785_s20 + $0x1f0] sm:$0xff]  ;;  %v4365_v24 = vld [vmem:[%s5785_s20 + $0x1a0] sm:$0xff] }
0x1bb9   : > { %v3903_v12 = vadd.f32 -0.28449672, %v3901_v7  ;;  %v3900_v13 = vmul.f32 %v5523_v1, %v3898_v11  ;;  %v4359_v7 = vld [vmem:[%s5785_s20 + $0x170] sm:$0xff]  ;;  %v4374_v11 = vld [vmem:[%s5785_s20 + $0x1e8] sm:$0xff] }
0x1bbb   : > { %v3905_v14 = vmul.f32 %v5521_v63, %v3903_v12  ;;  %v3902_v6 = vadd.f32 -0.28449672, %v3900_v13  ;;  %v4358_v12 = vld [vmem:[%s5785_s20 + $0x168] sm:$0xff]  ;;  %v4373_v13 = vld [vmem:[%s5785_s20 + $0x1e0] sm:$0xff] }
0x1bbd   : > { %v3907_v15 = vadd.f32 0.2548296, %v3905_v14  ;;  %v3904_v16 = vmul.f32 %v5523_v1, %v3902_v6  ;;  %v4357_v14 = vld [vmem:[%s5785_s20 + $0x160] sm:$0xff]  ;;  %v4372_v6 = vld [vmem:[%s5785_s20 + $0x1d8] sm:$0xff] }
0x1bbf   : > { %v3909_v17 = vmul.f32 %v5521_v63, %v3907_v15  ;;  %v3906_v10 = vadd.f32 0.2548296, %v3904_v16  ;;  %v4139_v63 = vld [vmem:[%s6607_s13 + $0x68] sm:$0xff]  ;;  %v4356_v15 = vld [vmem:[%s5785_s20 + $0x158] sm:$0xff]  ;;  %v4371_v16 = vld [vmem:[%s5785_s20 + $0x1d0] sm:$0xff] }
0x1bc1   : > { %v3919_v19 = vmul.f32 %v5525_v18, %v3909_v17  ;;  %v3908_v20 = vmul.f32 %v5523_v1, %v3906_v10  ;;  %v4131_v1 = vld [vmem:[%s6607_s13 + $0x28] sm:$0xff]  ;;  %v4355_v17 = vld [vmem:[%s5785_s20 + $0x150] sm:$0xff] }
0x1bc2   : > { %v4370_v18 = vld [vmem:[%s5785_s20 + $0x1c8] sm:$0xff] }
0x1bc3   : > { %v3921_v23 = vsub.f32 1.0, %v3919_v19  ;;  %v3918_v25 = vmul.f32 %v5527_v21, %v3908_v20  ;;  %v4354_v10 = vld [vmem:[%s5785_s20 + $0x148] sm:$0xff]  ;;  %v4369_v19 = vld [vmem:[%s5785_s20 + $0x1c0] sm:$0xff]  ;;  %v4368_v21 = vld [vmem:[%s5785_s20 + $0x1b8] sm:$0xff] }
0x1bc4   : > { %v4353_v20 = vld [vmem:[%s5785_s20 + $0x140] sm:$0xff] }
0x1bc5   : > { %v3923_v26 = vmul.f32 %v3921_v23, %v3881_v32  ;;  %v3920_v27 = vsub.f32 1.0, %v3918_v25  ;;  %v4051_v23 = vld [vmem:[%s6608_s23] sm:$0x1]  ;;  %s4763_s23 = sshll.u32 %s5818_s0, 4 }
0x1bc6   : > { %s4531_s5 = scalar_lea.hbm %s5795_s4, %s4763_s23 }
0x1bc7   : > { %v3922_v29 = vmul.f32 %v3920_v27, %v3880_v28  ;;  %v3925_v31 = vadd.f32 1.0, %v3923_v26  ;;  %v4140_v27 = vld [vmem:[%s6607_s13 + $0x70] sm:$0xff] }
0x1bc9   : > { %v3924_v30 = vadd.f32 1.0, %v3922_v29  ;;  %v3927_v37 = vmul.f32 %v3925_v31, %v3875_v35  ;;  %v4137_v29 = vld [vmem:[%s6607_s13 + $0x58] sm:$0xff]  ;;  %v4136_v31 = vld [vmem:[%s6607_s13 + $0x50] sm:$0xff] }
0x1bca   : > { %v4129_v35 = vld [vmem:[%s6607_s13 + $0x18] sm:$0xff] }
0x1bcb   : > { %v3926_v46 = vmul.f32 %v3924_v30, %v3874_v34  ;;  %v4133_v34 = vld [vmem:[%s6607_s13 + $0x38] sm:$0xff]  ;;  %v4132_v30 = vld [vmem:[%s6607_s13 + $0x30] sm:$0xff] }
0x1bcd   : > { %5327 = vmatprep.mubr.f32.mxu0 %v3926_v46  ;;  %v4128_v46 = vld [vmem:[%s6607_s13 + $0x10] sm:$0xff] }
0x1bce   : > { %5328 = vmatmul.mubr.f32.vlgmr.msra.gmra.mxu0 %v3927_v37  ;;  %v4344_v37 = vld [vmem:[%s5785_s20 + $0xf8] sm:$0xff] }
0x1bcf   : > { %5048 = vmatpush3.msra.mxu0 %v4360_v3  ;;  %v4329_v3 = vld [vmem:[%s5785_s20 + $0x80] sm:$0xff] }
0x1bd0   : > { %5049 = vmatprep.subr.mxu0 %v4375_v4  ;;  %v4349_v4 = vld [vmem:[%s5785_s20 + $0x120] sm:$0xff] }
0x1bd1   : > { %5050 = vmatpush3.msra.mxu0 %v4359_v7  ;;  %v4313_v7 = vld [vmem:[%s5785_s20] sm:$0xff] }
0x1bd2   : > { %5051 = vmatprep.subr.mxu0 %v4374_v11  ;;  %v4364_v11 = vld [vmem:[%s5785_s20 + $0x198] sm:$0xff] }
0x1bd3   : > { %5052 = vmatpush3.msra.mxu0 %v4358_v12  ;;  %v4348_v12 = vld [vmem:[%s5785_s20 + $0x118] sm:$0xff] }
0x1bd4   : > { %5053 = vmatprep.subr.mxu0 %v4373_v13  ;;  %v4363_v13 = vld [vmem:[%s5785_s20 + $0x190] sm:$0xff] }
0x1bd5   : > { %5054 = vmatpush3.msra.mxu0 %v4357_v14  ;;  %v4347_v14 = vld [vmem:[%s5785_s20 + $0x110] sm:$0xff] }
0x1bd6   : > { %5055 = vmatprep.subr.mxu0 %v4372_v6  ;;  %v4362_v6 = vld [vmem:[%s5785_s20 + $0x188] sm:$0xff] }
0x1bd7   : > { %5056 = vmatpush3.msra.mxu0 %v4356_v15  ;;  %v4346_v15 = vld [vmem:[%s5785_s20 + $0x108] sm:$0xff] }
0x1bd8   : > { %5057 = vmatprep.subr.mxu0 %v4371_v16  ;;  %v4361_v16 = vld [vmem:[%s5785_s20 + $0x180] sm:$0xff] }
0x1bd9   : > { %5058 = vmatpush3.msra.mxu0 %v4355_v17  ;;  %v4345_v17 = vld [vmem:[%s5785_s20 + $0x100] sm:$0xff] }
0x1bda   : > { %5059 = vmatprep.subr.mxu0 %v4370_v18  ;;  %v4144_v18 = vlaneseq }
0x1bdb   : > { %5060 = vmatpush3.msra.mxu0 %v4354_v10 }
0x1bdc   : > { %5061 = vmatprep.subr.mxu0 %v4369_v19  ;;  %v4145_v10 = vshrl.u32 %v4144_v18, 7 }
0x1bdd   : > { %5062 = vmatpush3.msra.mxu0 %v4353_v20  ;;  %v4142_v20 = vld [vmem:[%s6609_s12] sm:$0xf]  ;;  %s5537_s12 = sshll.u32 %s5641_s9, 4  ;;  %s5538_s12 = int_to_ptr.vmem [resolvable:$false] %s5537_s12 }
0x1bde   : > { %5063 = vmatprep.subr.mxu0 %v4368_v21  ;;  %v4146_v19 = vsub.s32 0, %v4145_v10  ;;  %v4150_v21 = vsub.s32 1, %v4145_v10  ;;  %s5539_s13 = scalar_lea.vmem %s5538_s12, 32  ;;  %p5540_p0 = scmp.lt.s32.totalorder %s4534_s3, %s5538_s12 }
0x1bdf   : > { %p5541_p1 = scmp.lt.s32.totalorder %s5539_s13, %s5533_s8 }
0x1be1   : > { %p5542_p2 = por %p5541_p1, %p5540_p0 }
0x1be3   : > { %p5543_p3 = pnand %p5542_p2, %p5536_p13 }
0x1c8e   : > { %v5329_v39 = vpop.f32.mrf.mxu0 }
0x1c8f   : > { %v4328_v39 = vld [vmem:[%s5785_s20 + $0x78] sm:$0xff] }
0x1c90   : > { %v4011_v40 = vpop.f32.mrf.mxu0 }
0x1c91   : > { %v4019_v42 = vadd.f32 %v4011_v40, %v6342_v59  ;;  %v4049_v59 = vld [vmem:[%s6604_s17 + $0x10] sm:$0xff] }
0x1c92   : > { %5333 = vmatpush3.msra.mxu1 %v4049_v59  ;;  %v4343_v40 = vld [vmem:[%s5785_s20 + $0xf0] sm:$0xff]  ;;  %v4337_v59 = vld [vmem:[%s5785_s20 + $0xc0] sm:$0xff] }
0x1c93   : > { %v4028_v43 = vadd.f32 %v4759_v41, %v4019_v42  ;;  %5334 = vmatprep.subr.mxu1 %v5639_v52  ;;  %v4327_v41 = vld [vmem:[%s5785_s20 + $0x70] sm:$0xff]  ;;  %v4342_v42 = vld [vmem:[%s5785_s20 + $0xe8] sm:$0xff] }
0x1c94   : > { %5335 = vmatpush3.msra.mxu1 %v4048_v54  ;;  %v4321_v54 = vld [vmem:[%s5785_s20 + $0x40] sm:$0xff] }
0x1c95   : > { %v4032_v38 = vsel %vm4031_vm10, %v4028_v43, 0.0  ;;  %5336 = vmatprep.subr.mxu1 %v5639_v52 }
0x1c96   : > { %4033 = vadd.xlane.f32.xlu0 %v4032_v38  ;;  %5337 = vmatpush3.msra.mxu1 %v4047_v55  ;;  %v4341_v38 = vld [vmem:[%s5785_s20 + $0xe0] sm:$0xff]  ;;  %v4336_v55 = vld [vmem:[%s5785_s20 + $0xb8] sm:$0xff] }
0x1c97   : > { %4191 = vmatprep.subr.mxu1 %v4139_v63  ;;  %v4316_v63 = vld [vmem:[%s5785_s20 + $0x18] sm:$0xff] }
0x1d1f   : > { %v4034_v51 = vpop.xlane.xlu0 %4033 }
0x1d20   : > { %v4035_v45 = vmul.f32 0.03125, %v4034_v51  ;;  %v4325_v51 = vld [vmem:[%s5785_s20 + $0x60] sm:$0xff] }
0x1d22   : > { %v4036_v44 = vsub.f32 %v4028_v43, %v4035_v45  ;;  %v4326_v43 = vld [vmem:[%s5785_s20 + $0x68] sm:$0xff]  ;;  %v4340_v45 = vld [vmem:[%s5785_s20 + $0xd8] sm:$0xff] }
0x1d24   : > { %v4037_v48 = vmul.f32 %v4036_v44, %v4036_v44 }
0x1d26   : > { %v4038_v49 = vsel %vm4031_vm10, %v4037_v48, 0.0  ;;  %v4339_v48 = vld [vmem:[%s5785_s20 + $0xd0] sm:$0xff] }
0x1d27   : > { %4039 = vadd.xlane.f32.xlu1 %v4038_v49  ;;  %v4323_v49 = vld [vmem:[%s5785_s20 + $0x50] sm:$0xff] }
0x1db0   : > { %v4040_v33 = vpop.xlane.xlu1 %4039 }
0x1db1   : > { %v4041_v8 = vmul.f32 0.03125, %v4040_v33  ;;  %v4320_v33 = vld [vmem:[%s5785_s20 + $0x38] sm:$0xff] }
0x1db3   : > { %v4042_v56 = vadd.f32 1e-12, %v4041_v8  ;;  %v4335_v8 = vld [vmem:[%s5785_s20 + $0xb0] sm:$0xff] }
0x1db5   : > { %5528 = vrsqrt.f32 %v4042_v56  ;;  %v4319_v56 = vld [vmem:[%s5785_s20 + $0x30] sm:$0xff] }
0x1dc2   : > { %v5529_v9 = vpop.eup %5528 }
0x1dc3   : > { %v4044_v36 = vmul.f32 %v5529_v9, %v4036_v44  ;;  %v4324_v44 = vld [vmem:[%s5785_s20 + $0x58] sm:$0xff]  ;;  %v4334_v9 = vld [vmem:[%s5785_s20 + $0xa8] sm:$0xff] }
0x1dc5   : > { %v4045_v62 = vmul.f32 %v4044_v36, %v4029_v57  ;;  %v4318_v57 = vld [vmem:[%s5785_s20 + $0x28] sm:$0xff]  ;;  %v4333_v36 = vld [vmem:[%s5785_s20 + $0xa0] sm:$0xff] }
0x1dc7   : > { %v4046_v61 = vadd.f32 %v4045_v62, %v4030_v22  ;;  %v4317_v22 = vld [vmem:[%s5785_s20 + $0x20] sm:$0xff]  ;;  %v4332_v62 = vld [vmem:[%s5785_s20 + $0x98] sm:$0xff] }
0x1dc9   : > { %5339 = vmatmul.mubr.msk.f32.vlgmr.msra.gmra.mxu1 %vm935_vm0, %v4046_v61  ;;  %v4352_v61 = vld [vmem:[%s5785_s20 + $0x138] sm:$0xff] }
0x1dca   : > { %4231 = vmatprep.mubr.f32.mxu1 %v5639_v52  ;;  %4192 = vmatpush1.msra.mxu1 %v4138_v50  ;;  %v4367_v50 = vld [vmem:[%s5785_s20 + $0x1b0] sm:$0xff] }
0x1dcb   : > { %4193 = vmatprep.subr.mxu1 %v4135_v0  ;;  %5064 = vmatpush3.msra.mxu0 %v4352_v61  ;;  %v4331_v0 = vld [vmem:[%s5785_s20 + $0x90] sm:$0xff] }
0x1dcc   : > { %4194 = vmatpush1.msra.mxu1 %v4134_v58  ;;  %5065 = vmatprep.subr.mxu0 %v4367_v50  ;;  %v4351_v58 = vld [vmem:[%s5785_s20 + $0x130] sm:$0xff] }
0x1dcd   : > { %4195 = vmatprep.subr.mxu1 %v4131_v1  ;;  %5066 = vmatpush3.msra.mxu0 %v4351_v58  ;;  %v4315_v1 = vld [vmem:[%s5785_s20 + $0x10] sm:$0xff] }
0x1dce   : > { %4196 = vmatpush1.msra.mxu1 %v4130_v5  ;;  %v4366_v5 = vld [vmem:[%s5785_s20 + $0x1a8] sm:$0xff] }
0x1dcf   : > { %4197 = vmatprep.subr.mxu1 %v4127_v60  ;;  %5067 = vmatprep.subr.mxu0 %v4366_v5  ;;  %v4330_v60 = vld [vmem:[%s5785_s20 + $0x88] sm:$0xff] }
0x1dd0   : > { %4198 = vmatpush1.msra.mxu1 %v4126_v47  ;;  %v4350_v47 = vld [vmem:[%s5785_s20 + $0x128] sm:$0xff] }
0x1dd1   : > { %4262 = vmatprep.subr.mxu1 %v4141_v2  ;;  %5068 = vmatpush3.msra.mxu0 %v4350_v47  ;;  %v4314_v2 = vld [vmem:[%s5785_s20 + $0x8] sm:$0xff] }
0x1dd2   : > { %5069 = vmatprep.subr.mxu0 %v4365_v24 }
0x1dd3   : > { %5070 = vmatpush3.msra.mxu0 %v4349_v4 }
0x1dd4   : > { %5071 = vmatprep.subr.mxu0 %v4364_v11 }
0x1dd5   : > { %5072 = vmatpush3.msra.mxu0 %v4348_v12 }
0x1dd6   : > { %5073 = vmatprep.subr.mxu0 %v4363_v13 }
0x1dd7   : > { %5074 = vmatpush3.msra.mxu0 %v4347_v14 }
0x1dd8   : > { %5075 = vmatprep.subr.mxu0 %v4362_v6 }
0x1dd9   : > { %5076 = vmatpush3.msra.mxu0 %v4346_v15 }
0x1dda   : > { %5077 = vmatprep.subr.mxu0 %v4361_v16 }
0x1ddb   : > { %5078 = vmatpush3.msra.mxu0 %v4345_v17 }
0x1e89   : > { %v4121_v32 = vpop.f32.mrf.mxu1 }
0x1e8a   : > { %v4122_v25 = vadd.f32 %v4121_v32, %v4051_v23  ;;  %v4147_v23 = vrot.slane %v4142_v20, %v4146_v19  ;;  %v4151_v32 = vrot.slane %v4142_v20, %v4150_v21 }
0x1e8b   : > { %v5340_v26 = vpop.f32.mrf.mxu1 }
0x1e8c   : > { %5530 = vtanh.f32 %v4122_v25 }
0x1e99   : > { %v5531_v28 = vpop.eup %5530 }
0x1e9a   : > { %4761 = vmatmul.mubr.msk.f32.vlgmr.msra.gmra.mxu1 %vm935_vm0, %v5531_v28 }
0x1e9b   : > { %4263 = vmatpush1.msra.mxu1 %v4140_v27  ;;  %4302 = vmatprep.mubr.f32.mxu1 %v5639_v52  ;;  %v4338_v52 = vld [vmem:[%s5785_s20 + $0xc8] sm:$0xff] }
0x1e9c   : > { %4264 = vmatprep.subr.mxu1 %v4137_v29 }
0x1e9d   : > { %4265 = vmatpush1.msra.mxu1 %v4136_v31  ;;  %v4158_v31 = vsub.s32 3, %v4145_v10 }
0x1e9e   : > { %4266 = vmatprep.subr.mxu1 %v4133_v34 }
0x1e9f   : > { %4267 = vmatpush1.msra.mxu1 %v4132_v30 }
0x1ea0   : > { %4268 = vmatprep.subr.mxu1 %v4129_v35 }
0x1ea1   : > { %4269 = vmatpush1.msra.mxu1 %v4128_v46  ;;  %v4159_v46 = vrot.slane %v4142_v20, %v4158_v31 }
0x1ea2   : > { %4762 = vmatmul.mubr.msk.f32.vlgmr.msra.gmra.mxu1 %vm935_vm0, %v5531_v28  ;;  %5012 = vmatprep.subr.mxu1 %v4344_v37  ;;  %v4154_v28 = vsub.s32 2, %v4145_v10 }
0x1ea3   : > { %5013 = vmatpush3.msra.mxu1 %v4328_v39 }
0x1ea4   : > { %5014 = vmatprep.subr.mxu1 %v4343_v40  ;;  %v4155_v35 = vrot.slane %v4142_v20, %v4154_v28 }
0x1ea5   : > { %5015 = vmatpush3.msra.mxu1 %v4327_v41 }
0x1ea6   : > { %5016 = vmatprep.subr.mxu1 %v4342_v42 }
0x1ea7   : > { %5017 = vmatpush3.msra.mxu1 %v4326_v43 }
0x1ea8   : > { %5018 = vmatprep.subr.mxu1 %v4341_v38 }
0x1ea9   : > { %5019 = vmatpush3.msra.mxu1 %v4325_v51 }
0x1eaa   : > { %5020 = vmatprep.subr.mxu1 %v4340_v45 }
0x1eab   : > { %5021 = vmatpush3.msra.mxu1 %v4324_v44  ;;  %v4377_v44 = vld [vmem:[%s5790_s27] sm:$0x1] }
0x1eac   : > { %5022 = vmatprep.subr.mxu1 %v4339_v48 }
0x1ead   : > { %5023 = vmatpush3.msra.mxu1 %v4323_v49 }
0x1eae   : > { %5024 = vmatprep.subr.mxu1 %v4338_v52 }
0x1eaf   : > { %5025 = vmatpush3.msra.mxu1 %v4322_v53 }
0x1eb0   : > { %5026 = vmatprep.subr.mxu1 %v4337_v59 }
0x1eb1   : > { %5027 = vmatpush3.msra.mxu1 %v4321_v54 }
0x1eb2   : > { %5028 = vmatprep.subr.mxu1 %v4336_v55 }
0x1eb3   : > { %5029 = vmatpush3.msra.mxu1 %v4320_v33 }
0x1eb4   : > { %5030 = vmatprep.subr.mxu1 %v4335_v8 }
0x1eb5   : > { %5031 = vmatpush3.msra.mxu1 %v4319_v56 }
0x1eb6   : > { %5032 = vmatprep.subr.mxu1 %v4334_v9 }
0x1eb7   : > { %5033 = vmatpush3.msra.mxu1 %v4318_v57 }
0x1eb8   : > { %5034 = vmatprep.subr.mxu1 %v4333_v36 }
0x1eb9   : > { %5035 = vmatpush3.msra.mxu1 %v4317_v22 }
0x1eba   : > { %5036 = vmatprep.subr.mxu1 %v4332_v62 }
0x1ebb   : > { %5037 = vmatpush3.msra.mxu1 %v4316_v63 }
0x1ebc   : > { %5038 = vmatprep.subr.mxu1 %v4331_v0 }
0x1ebd   : > { %5039 = vmatpush3.msra.mxu1 %v4315_v1 }
0x1ebe   : > { %5040 = vmatprep.subr.mxu1 %v4330_v60 }
0x1ebf   : > { %5041 = vmatpush3.msra.mxu1 %v4314_v2 }
0x1ec0   : > { %5042 = vmatprep.subr.mxu1 %v4329_v3 }
0x1ec1   : > { %5043 = vmatpush3.msra.mxu1 %v4313_v7 }
0x1f5a   : > { %v4233_v25 = vpop.f32.mrf.mxu1 }
0x1f5b   : > { %v4234_v26 = vadd.f32 %v4233_v25, %v4147_v23 }
0x1f5c   : > { %v4235_v27 = vpop.f32.mrf.mxu1 }
0x1f5d   : > { %v4236_v29 = vadd.f32 %v4235_v27, %v4151_v32  ;;  %v4309_v30 = vmax.f32 %v4234_v26, 0.0 }
0x1f5f   : > { %v4310_v34 = vmax.f32 %v4236_v29, 0.0 }
0x1f61   : > { %4442 = vmatprep.mubr.f32.mxu1 %v4310_v34 }
0x1f62   : > { %v4304_v37 = vpop.f32.mrf.mxu1  ;;  %4443 = vmatmul.mubr.f32.vlgmr.msra.gmra.mxu1 %v4309_v30 }
0x1f63   : > { %v4305_v39 = vadd.f32 %v4304_v37, %v4155_v35 }
0x1f64   : > { %v4306_v40 = vpop.f32.mrf.mxu1 }
0x1f65   : > { %v4307_v41 = vadd.f32 %v4306_v40, %v4159_v46  ;;  %v4311_v43 = vmax.f32 %v4305_v39, 0.0 }
0x1f67   : > { %v4312_v42 = vmax.f32 %v4307_v41, 0.0 }
0x1f69   : > { %4512 = vmatprep.mubr.f32.mxu0 %v4312_v42 }
0x1f6a   : > { %4513 = vmatmul.mubr.f32.vlgmr.msra.gmra.mxu0 %v4311_v43 }
0x2022   : > { %v5044_v38 = vpop.f32.mrf.mxu1 }
0x2024   : > { %v5045_v51 = vpop.f32.mrf.mxu1 }
0x2025   : > { %v5046_v45 = vadd.f32 %v5045_v51, %v5044_v38 }
0x2027   : > { %v4445_v52 = vadd.f32 %v5046_v45, %v4377_v44 }
0x202a   : > { %v5079_v48 = vpop.f32.mrf.mxu0 }
0x202c   : > { %v5080_v49 = vpop.f32.mrf.mxu0 }
0x202d   : > { %v5081_v53 = vadd.f32 %v5080_v49, %v5079_v48 }
0x202f   : > { %v4515_v59 = vadd.f32 %v5081_v53, %v4445_v52 }
0x2031   : > { %4519 = vst.msk [vmem:[%s918_s2] sm:$0x1] %vm4518_vm12, %v4515_v59 }
0x2032   : > { %5546 = shalt.err (!%p5543_p3)
}
0x2033   : > { %s5547_s0 = scalar_lea.hbm %s4531_s5, 16  ;;  %s5551_s2 = scalar_lea.hbm %s5795_s4, 32 }
0x2034   : > { %p5548_p4 = scmp.ne.s32.totalorder %s4531_s5, %s5547_s0  ;;  %p5552_p9 = scmp.lt.s32.totalorder %s4531_s5, %s5795_s4 }
0x2035   : > { %p5553_p10 = scmp.lt.s32.totalorder %s5551_s2, %s5547_s0 }
0x2036   : > { %p5549_p7 = pnand %p5548_p4, %p5835_p5 }
0x2037   : > { %p5554_p11 = por %p5553_p10, %p5552_p9 }
0x2038   : > { %p5550_p8 = pneg %p5549_p7 }
0x203a   : > { %p5555_p12 = pnand %p5554_p11, %p5550_p8 }
0x203c   : > { %5558 = shalt.err (!%p5555_p12)
}
0x203d   : > { %5342 = dma.vmem_to_hbm [thread:$0]  (%p5835_p5), %s4534_s3, 16, %s4531_s5, %s4521_s6  }
0x203e PF: > { %p5348_p13 = scmp.ge.s32.totalorder %s5593_s15, 2  ;;  %s4545_s9 = sand.u32 1, %s5581_s7  }
0x203f   : > { %s4546_s8 = scalar_lea.sflag [#allocation3], %s4545_s9 }
0x2040   : > { %p5345_p0 = pnand %p5348_p13, %p5839_p6 }
0x2042   : > { %p5346_p1 = pneg %p5345_p0 }
0x2044   : > { %5576 = dma.done.wait (%p5346_p1), %s4546_s8, 16  }
0x2045   : > { %5578 = vsyncadd (%p5346_p1), %s4546_s8, 4294967280  ;;  %p69_p2 = scmp.ge.s32.totalorder %s5822_s18, 4   ;;  %s6610_s7 = smov %s5585_s10 }
0x2046   : > { %s6611_s10 = smov %s5589_s11  ;;  %s6612_s11 = smov %s5833_s26 }
0x2047   : > { %s6613_s15 = smov %s5822_s18  ;;  %71 = sbr.rel (!%p69_p2) target bundleno = 62 (0x3e), region = 218 }
0x204c   :  { %4550 = vsyncpa [#allocation3], 1 }
0x204d   :  { %4552 = vsyncpa [#allocation3 + $0x1], 1 }

</bundles_post_ra>
